<compile_context>
chip_gen: v7x
topology: tpu7x:2x2x1
jax: 0.10.0
libtpu: 0.0.40
codegen_flags: <defaults>
</compile_context>

<pallas_src>
import functools

import jax
import jax.numpy as jnp
from jax import lax
from jax.experimental import pallas as pl
from jax.experimental.pallas import tpu as pltpu

CP = 128      # hidden channel dims zero-padded to one 128-lane register width
SLOPE = 0.2   # LeakyReLU negative slope


# ----------------------------------------------------------------------------
# Pallas kernels
# ----------------------------------------------------------------------------

def _conv_s1_kernel(x_ref, w_ref, b_ref, o_ref, *, ho, wo, slope):
    """3x3 stride-1 conv (input already zero-padded) + bias + LeakyReLU.

    x_ref: (nb, ho+2, wo+2, cin)   NHWC activation tile
    w_ref: (9, cin, CP)            tap-major packed weights (zero-padded cout)
    b_ref: (1, CP)
    o_ref: (nb*ho*wo, CP)          lane-dense output

    im2col is done in-kernel: 9 static window slices -> 9 MXU matmuls.
    """
    nb = x_ref.shape[0]
    cin = x_ref.shape[3]
    cp = w_ref.shape[2]
    m = nb * ho * wo
    acc = jnp.zeros((m, cp), jnp.float32)
    for t in range(9):
        i, j = divmod(t, 3)
        tap = x_ref[:, i:i + ho, j:j + wo, :].reshape(m, cin)
        acc = acc + jnp.dot(tap, w_ref[t], preferred_element_type=jnp.float32)
    acc = acc + b_ref[...]
    o_ref[...] = jnp.where(acc > 0.0, acc, slope * acc)


def _conv_s2_kernel(p00_ref, p01_ref, p10_ref, p11_ref, w_ref, b_ref, o_ref,
                    *, ho, wo, slope):
    """3x3 stride-2 conv + bias + LeakyReLU, reading a parity-phase-split input.

    p{r}{c}_ref: (nb, ho+1, wo+1, CP), with p[r][c][b, a, e, :] == x_pad[b, 2a+r, 2e+c, :]
    so tap (i, j) is the unit-stride slice
        p[i%2][j%2][:, i//2 : i//2+ho, j//2 : j//2+wo, :]
    (no strided access is needed inside the kernel).
    o_ref: (nb*ho*wo, CP)
    """
    phases = ((p00_ref, p01_ref), (p10_ref, p11_ref))
    nb = p00_ref.shape[0]
    cp = w_ref.shape[2]
    m = nb * ho * wo
    acc = jnp.zeros((m, cp), jnp.float32)
    for t in range(9):
        i, j = divmod(t, 3)
        pref = phases[i % 2][j % 2]
        tap = pref[:, i // 2:i // 2 + ho, j // 2:j // 2 + wo, :].reshape(m, cp)
        acc = acc + jnp.dot(tap, w_ref[t], preferred_element_type=jnp.float32)
    acc = acc + b_ref[...]
    o_ref[...] = jnp.where(acc > 0.0, acc, slope * acc)


def _tail_kernel(p_ref, w_ref, b_ref, fcw_ref, fcb_ref, loss_d_ref, loss_g_ref,
                 *, nb, hw, slope):
    """Fused epilogue: conv3 (single K = 9*CP matmul on pre-built patches) +
    LeakyReLU + global mean pool + dense head + both BCE-with-logits losses.

    p_ref  : (nb*hw, 9*CP)   im2col patches of the last conv layer
    w_ref  : (9*CP, CP)      b_ref: (1, CP)
    fcw_ref: (CP, 1)         fcb_ref: (1, 1)
    loss_d_ref / loss_g_ref : (1, 1)
    Rows 0..nb/2-1 of the batch are the fake images, rows nb/2..nb-1 the real ones.
    """
    y = jnp.dot(p_ref[...], w_ref[...], preferred_element_type=jnp.float32)
    y = y + b_ref[...]
    y = jnp.where(y > 0.0, y, slope * y)                           # (nb*hw, CP)

    feat = jnp.sum(y.reshape(nb, hw, y.shape[1]), axis=1) * (1.0 / hw)   # (nb, CP)
    logits = jnp.dot(feat, fcw_ref[...], preferred_element_type=jnp.float32)
    logits = logits + fcb_ref[...]                                 # (nb, 1)

    half = nb // 2
    d_fake = logits[:half, :]
    d_real = logits[half:, :]

    def bce_sum(x, target):
        # numerically stable binary_cross_entropy_with_logits, sum reduction
        v = jnp.maximum(x, 0.0) - x * target + jnp.log1p(jnp.exp(-jnp.abs(x)))
        return jnp.sum(v, axis=(0, 1), keepdims=True)              # (1, 1)

    inv_n = 1.0 / half
    loss_d_ref[...] = (bce_sum(d_real, 1.0) + bce_sum(d_fake, 0.0)) * inv_n
    loss_g_ref[...] = bce_sum(d_fake, 1.0) * inv_n


# ----------------------------------------------------------------------------
# pallas_call wrappers
# ----------------------------------------------------------------------------

def conv_s1(x_pad, w, b, *, ho, wo):
    nb, hp, wp, cin = x_pad.shape
    cp = w.shape[2]
    nt = 2 if nb % 2 == 0 else 1          # batch tiles -> megacore-parallel axis
    tb = nb // nt
    kern = functools.partial(_conv_s1_kernel, ho=ho, wo=wo, slope=SLOPE)
    return pl.pallas_call(
        kern,
        out_shape=jax.ShapeDtypeStruct((nb * ho * wo, cp), jnp.float32),
        grid=(nt,),
        in_specs=[
            pl.BlockSpec((tb, hp, wp, cin), lambda i: (i, 0, 0, 0)),
            pl.BlockSpec((9, cin, cp), lambda i: (0, 0, 0)),
            pl.BlockSpec((1, cp), lambda i: (0, 0)),
        ],
        out_specs=pl.BlockSpec((tb * ho * wo, cp), lambda i: (i, 0)),
        compiler_params=pltpu.CompilerParams(dimension_semantics=("parallel",)),
    )(x_pad, w, b)


def conv_s2(p00, p01, p10, p11, w, b, *, ho, wo):
    nb, hq, wq, cp = p00.shape
    nt = 2 if nb % 2 == 0 else 1
    tb = nb // nt
    kern = functools.partial(_conv_s2_kernel, ho=ho, wo=wo, slope=SLOPE)
    phase_spec = pl.BlockSpec((tb, hq, wq, cp), lambda i: (i, 0, 0, 0))
    return pl.pallas_call(
        kern,
        out_shape=jax.ShapeDtypeStruct((nb * ho * wo, cp), jnp.float32),
        grid=(nt,),
        in_specs=[
            phase_spec, phase_spec, phase_spec, phase_spec,
            pl.BlockSpec((9, cp, cp), lambda i: (0, 0, 0)),
            pl.BlockSpec((1, cp), lambda i: (0, 0)),
        ],
        out_specs=pl.BlockSpec((tb * ho * wo, cp), lambda i: (i, 0)),
        compiler_params=pltpu.CompilerParams(dimension_semantics=("parallel",)),
    )(p00, p01, p10, p11, w, b)


def tail_losses(patches, w, b, fcw, fcb, nb):
    m, k = patches.shape
    cp = w.shape[1]
    hw = m // nb
    kern = functools.partial(_tail_kernel, nb=nb, hw=hw, slope=SLOPE)
    loss_d, loss_g = pl.pallas_call(
        kern,
        out_shape=(jax.ShapeDtypeStruct((1, 1), jnp.float32),
                   jax.ShapeDtypeStruct((1, 1), jnp.float32)),
        grid=(1,),
        in_specs=[
            pl.BlockSpec((m, k), lambda i: (0, 0)),
            pl.BlockSpec((k, cp), lambda i: (0, 0)),
            pl.BlockSpec((1, cp), lambda i: (0, 0)),
            pl.BlockSpec((cp, 1), lambda i: (0, 0)),
            pl.BlockSpec((1, 1), lambda i: (0, 0)),
        ],
        out_specs=(pl.BlockSpec((1, 1), lambda i: (0, 0)),
                   pl.BlockSpec((1, 1), lambda i: (0, 0))),
        compiler_params=pltpu.CompilerParams(dimension_semantics=("arbitrary",)),
    )(patches, w, b, fcw, fcb)
    return loss_d[0, 0], loss_g[0, 0]


# ----------------------------------------------------------------------------
# XLA-side glue (inside jit): layout prep only, no duplicated patch matrices
# ----------------------------------------------------------------------------

def _phase_split(y):
    """(nb, h, w, c) -> 4 parity phases (nb, h//2+1, w//2+1, c) of the pad-1 input."""
    yp = jnp.pad(y, ((0, 0), (1, 1), (1, 1), (0, 0)))
    return tuple(yp[:, r::2, c::2, :] for r in range(2) for c in range(2))


def _im2col_s2(y):
    """(nb, h, w, c) -> (nb*(h//2)*(w//2), 9*c) stride-2 3x3 patches (pad=1)."""
    nb, h, w, c = y.shape
    ho, wo = h // 2, w // 2
    yp = jnp.pad(y, ((0, 0), (1, 1), (1, 1), (0, 0)))
    taps = [yp[:, i::2, j::2, :][:, :ho, :wo, :] for i in range(3) for j in range(3)]
    p = jnp.stack(taps, axis=3)                       # (nb, ho, wo, 9, c)
    return p.reshape(nb * ho * wo, 9 * c)


# ----------------------------------------------------------------------------
# Discriminator parameters (synthetic, deterministic)
# ----------------------------------------------------------------------------

def make_discriminator_params(key, in_ch=3, widths=(16, 32, 64)):
    """Raw (unpadded) parameters: 3 conv(3x3)+LeakyReLU layers (strides 1,2,2),
    global mean pool, dense -> 1 logit."""
    raw = {"convs": []}
    strides = (1, 2, 2)
    c_prev = in_ch
    for c_out, s in zip(widths, strides):
        key, kw_, kb_ = jax.random.split(key, 3)
        w = 0.05 * jax.random.normal(kw_, (3, 3, c_prev, c_out), jnp.float32)
        b = 0.01 * jax.random.normal(kb_, (c_out,), jnp.float32)
        raw["convs"].append((w, b, s))
        c_prev = c_out
    key, kw_, kb_ = jax.random.split(key, 3)
    raw["fc_w"] = 0.05 * jax.random.normal(kw_, (c_prev, 1), jnp.float32)
    raw["fc_b"] = 0.01 * jax.random.normal(kb_, (1,), jnp.float32)
    return raw


def pack_params(raw, cp=CP):
    """Zero-pad hidden channel dims to `cp` lanes and pack weights tap-major for
    the kernels (padded rows/cols are exact zeros -> results unchanged)."""
    (w1, b1, _), (w2, b2, _), (w3, b3, _) = raw["convs"]
    c0 = w1.shape[2]

    def pad_w(w, cin_to, cout_to):
        return jnp.pad(w, ((0, 0), (0, 0),
                           (0, cin_to - w.shape[2]), (0, cout_to - w.shape[3])))

    def pad_b(b, cout_to):
        return jnp.pad(b, (0, cout_to - b.shape[0])).reshape(1, cout_to)

    return {
        "w1": pad_w(w1, c0, cp).reshape(9, c0, cp),
        "b1": pad_b(b1, cp),
        "w2": pad_w(w2, cp, cp).reshape(9, cp, cp),
        "b2": pad_b(b2, cp),
        "w3": pad_w(w3, cp, cp).reshape(9 * cp, cp),
        "b3": pad_b(b3, cp),
        "fc_w": jnp.pad(raw["fc_w"], ((0, cp - raw["fc_w"].shape[0]), (0, 0))),
        "fc_b": raw["fc_b"].reshape(1, 1),
    }


# ----------------------------------------------------------------------------
# Adversarial.forward equivalent (gan_type='GAN', gan_k=1)
# ----------------------------------------------------------------------------

@jax.jit
def adversarial_forward(fake, real, packed):
    """Returns (loss_g, loss_d). One batched discriminator evaluation serves all
    paths: since the D optimizer update is skipped (TODO above), d_fake_bp
    equals d_fake, and the previously-dead d_real_bp pass has been removed."""
    x = jnp.concatenate([fake, real], axis=0)                 # fake first, then real
    x = jnp.transpose(x, (0, 2, 3, 1)).astype(jnp.float32)    # NCHW -> NHWC
    nb, h, w, _ = x.shape

    # layer 1: 3x3 stride-1 conv, in-kernel im2col
    xp = jnp.pad(x, ((0, 0), (1, 1), (1, 1), (0, 0)))
    y1 = conv_s1(xp, packed["w1"], packed["b1"], ho=h, wo=w)           # (2B*H*W, CP)
    y1 = y1.reshape(nb, h, w, CP)

    # layer 2: 3x3 stride-2 conv; parity-phase split so the kernel only needs
    # unit-stride slices
    h2, w2 = h // 2, w // 2
    p00, p01, p10, p11 = _phase_split(y1)
    y2 = conv_s2(p00, p01, p10, p11, packed["w2"], packed["b2"], ho=h2, wo=w2)
    y2 = y2.reshape(nb, h2, w2, CP)

    # layer 3 + mean pool + dense head + both BCE losses fused in one kernel
    patches3 = _im2col_s2(y2)                                          # (2B*h3*w3, 9*CP)
    loss_d, loss_g = tail_losses(patches3, packed["w3"], packed["b3"],
                                 packed["fc_w"], packed["fc_b"], nb)
    return loss_g, loss_d


# ----------------------------------------------------------------------------
# Pure-JAX reference (XLA conv) for a correctness check
# ----------------------------------------------------------------------------

def reference_forward(fake, real, raw):
    def leaky(v):
        return jnp.where(v > 0, v, SLOPE * v)

    def disc(x_nchw):
        x = jnp.transpose(x_nchw, (0, 2, 3, 1)).astype(jnp.float32)
        for w, b, s in raw["convs"]:
            x = lax.conv_general_dilated(
                x, w, window_strides=(s, s), padding=((1, 1), (1, 1)),
                dimension_numbers=("NHWC", "HWIO", "NHWC"),
                precision=lax.Precision.HIGHEST)
            x = leaky(x + b)
        feat = jnp.mean(x, axis=(1, 2))
        return jnp.dot(feat, raw["fc_w"], precision=lax.Precision.HIGHEST) + raw["fc_b"]

    def bce(x, t):
        v = jnp.maximum(x, 0.0) - x * t + jnp.log1p(jnp.exp(-jnp.abs(x)))
        return jnp.mean(v)

    d_fake = disc(fake)
    d_real = disc(real)
    loss_d = bce(d_real, 1.0) + bce(d_fake, 0.0)
    loss_g = bce(d_fake, 1.0)
    return loss_g, loss_d


if __name__ == "__main__":
    key = jax.random.PRNGKey(0)
    k_fake, k_real, k_params = jax.random.split(key, 3)

    B, C, H, W = 2, 3, 16, 16
    fake = jax.random.uniform(k_fake, (B, C, H, W), jnp.float32)
    real = jax.random.uniform(k_real, (B, C, H, W), jnp.float32)

    raw = make_discriminator_params(k_params, in_ch=C)
    packed = pack_params(raw)

    loss_g, loss_d = adversarial_forward(fake, real, packed)
    jax.block_until_ready((loss_g, loss_d))

    # check against a pure-JAX/XLA reference of the same forward
    ref_g, ref_d = reference_forward(fake, real, raw)
    assert abs(float(loss_g) - float(ref_g)) < 5e-3, (float(loss_g), float(ref_g))
    assert abs(float(loss_d) - float(ref_d)) < 5e-3, (float(loss_d), float(ref_d))

    print("KERNEL_OK")
</pallas_src>

<mosaic_0001>
module attributes {stable_mosaic.version = 11 : i64} {
  func.func @_conv_s1_kernel(%arg0: i32, %arg1: memref<2x18x18x3xf32, #tpu.memory_space<vmem>>, %arg2: memref<9x3x128xf32, #tpu.memory_space<vmem>>, %arg3: memref<1x128xf32, #tpu.memory_space<vmem>>, %arg4: memref<512x128xf32, #tpu.memory_space<vmem>>) attributes {dimension_semantics = [#tpu.dimension_semantics<parallel>], iteration_bounds = array<i64: 2>, scalar_prefetch = 0 : i64, scratch_operands = 0 : i64, tpu.core_type = #tpu.core_type<tc>, window_params = [{transform_indices = @transform_0, window_bounds = array<i64: 2, 18, 18, 3>}, {pipeline_mode = #tpu.pipeline_mode<synchronous>, transform_indices = @transform_1, window_bounds = array<i64: 9, 3, 128>}, {pipeline_mode = #tpu.pipeline_mode<synchronous>, transform_indices = @transform_2, window_bounds = array<i64: 1, 128>}, {transform_indices = @transform_3, window_bounds = array<i64: 512, 128>}]} {
    %cst = arith.constant 0.000000e+00 : f32
    %0 = vector.broadcast %cst : f32 to vector<512x128xf32>
    %c0 = arith.constant 0 : index
    %c0_0 = arith.constant 0 : index
    %c0_1 = arith.constant 0 : index
    %c0_2 = arith.constant 0 : index
    %1 = vector.load %arg1[%c0, %c0_0, %c0_1, %c0_2] : memref<2x18x18x3xf32, #tpu.memory_space<vmem>>, vector<2x16x16x3xf32>
    %2 = vector.shape_cast %1 : vector<2x16x16x3xf32> to vector<512x3xf32>
    %c0_3 = arith.constant 0 : index
    %c0_4 = arith.constant 0 : index
    %c0_5 = arith.constant 0 : index
    %3 = vector.load %arg2[%c0_3, %c0_4, %c0_5] : memref<9x3x128xf32, #tpu.memory_space<vmem>>, vector<1x3x128xf32>
    %4 = vector.shape_cast %3 : vector<1x3x128xf32> to vector<3x128xf32>
    %cst_6 = arith.constant dense<0.000000e+00> : vector<512x128xf32>
    %5 = tpu.matmul %2, %4, %cst_6 {dimension_numbers = #tpu.dot_dimension_numbers<[1], [0], [0], [1], [0, 0, 1, 1], [], []>} : vector<512x3xf32>, vector<3x128xf32>, vector<512x128xf32> -> vector<512x128xf32>
    %6 = arith.addf %0, %5 : vector<512x128xf32>
    %c0_7 = arith.constant 0 : index
    %c0_8 = arith.constant 0 : index
    %c1 = arith.constant 1 : index
    %c0_9 = arith.constant 0 : index
    %7 = vector.load %arg1[%c0_7, %c0_8, %c1, %c0_9] : memref<2x18x18x3xf32, #tpu.memory_space<vmem>>, vector<2x16x16x3xf32>
    %8 = vector.shape_cast %7 : vector<2x16x16x3xf32> to vector<512x3xf32>
    %c1_10 = arith.constant 1 : index
    %c0_11 = arith.constant 0 : index
    %c0_12 = arith.constant 0 : index
    %9 = vector.load %arg2[%c1_10, %c0_11, %c0_12] : memref<9x3x128xf32, #tpu.memory_space<vmem>>, vector<1x3x128xf32>
    %10 = vector.shape_cast %9 : vector<1x3x128xf32> to vector<3x128xf32>
    %cst_13 = arith.constant dense<0.000000e+00> : vector<512x128xf32>
    %11 = tpu.matmul %8, %10, %cst_13 {dimension_numbers = #tpu.dot_dimension_numbers<[1], [0], [0], [1], [0, 0, 1, 1], [], []>} : vector<512x3xf32>, vector<3x128xf32>, vector<512x128xf32> -> vector<512x128xf32>
    %12 = arith.addf %6, %11 : vector<512x128xf32>
    %c0_14 = arith.constant 0 : index
    %c0_15 = arith.constant 0 : index
    %c2 = arith.constant 2 : index
    %c0_16 = arith.constant 0 : index
    %13 = vector.load %arg1[%c0_14, %c0_15, %c2, %c0_16] : memref<2x18x18x3xf32, #tpu.memory_space<vmem>>, vector<2x16x16x3xf32>
    %14 = vector.shape_cast %13 : vector<2x16x16x3xf32> to vector<512x3xf32>
    %c2_17 = arith.constant 2 : index
    %c0_18 = arith.constant 0 : index
    %c0_19 = arith.constant 0 : index
    %15 = vector.load %arg2[%c2_17, %c0_18, %c0_19] : memref<9x3x128xf32, #tpu.memory_space<vmem>>, vector<1x3x128xf32>
    %16 = vector.shape_cast %15 : vector<1x3x128xf32> to vector<3x128xf32>
    %cst_20 = arith.constant dense<0.000000e+00> : vector<512x128xf32>
    %17 = tpu.matmul %14, %16, %cst_20 {dimension_numbers = #tpu.dot_dimension_numbers<[1], [0], [0], [1], [0, 0, 1, 1], [], []>} : vector<512x3xf32>, vector<3x128xf32>, vector<512x128xf32> -> vector<512x128xf32>
    %18 = arith.addf %12, %17 : vector<512x128xf32>
    %c0_21 = arith.constant 0 : index
    %c1_22 = arith.constant 1 : index
    %c0_23 = arith.constant 0 : index
    %c0_24 = arith.constant 0 : index
    %19 = vector.load %arg1[%c0_21, %c1_22, %c0_23, %c0_24] : memref<2x18x18x3xf32, #tpu.memory_space<vmem>>, vector<2x16x16x3xf32>
    %20 = vector.shape_cast %19 : vector<2x16x16x3xf32> to vector<512x3xf32>
    %c3 = arith.constant 3 : index
    %c0_25 = arith.constant 0 : index
    %c0_26 = arith.constant 0 : index
    %21 = vector.load %arg2[%c3, %c0_25, %c0_26] : memref<9x3x128xf32, #tpu.memory_space<vmem>>, vector<1x3x128xf32>
    %22 = vector.shape_cast %21 : vector<1x3x128xf32> to vector<3x128xf32>
    %cst_27 = arith.constant dense<0.000000e+00> : vector<512x128xf32>
    %23 = tpu.matmul %20, %22, %cst_27 {dimension_numbers = #tpu.dot_dimension_numbers<[1], [0], [0], [1], [0, 0, 1, 1], [], []>} : vector<512x3xf32>, vector<3x128xf32>, vector<512x128xf32> -> vector<512x128xf32>
    %24 = arith.addf %18, %23 : vector<512x128xf32>
    %c0_28 = arith.constant 0 : index
    %c1_29 = arith.constant 1 : index
    %c1_30 = arith.constant 1 : index
    %c0_31 = arith.constant 0 : index
    %25 = vector.load %arg1[%c0_28, %c1_29, %c1_30, %c0_31] : memref<2x18x18x3xf32, #tpu.memory_space<vmem>>, vector<2x16x16x3xf32>
    %26 = vector.shape_cast %25 : vector<2x16x16x3xf32> to vector<512x3xf32>
    %c4 = arith.constant 4 : index
    %c0_32 = arith.constant 0 : index
    %c0_33 = arith.constant 0 : index
    %27 = vector.load %arg2[%c4, %c0_32, %c0_33] : memref<9x3x128xf32, #tpu.memory_space<vmem>>, vector<1x3x128xf32>
    %28 = vector.shape_cast %27 : vector<1x3x128xf32> to vector<3x128xf32>
    %cst_34 = arith.constant dense<0.000000e+00> : vector<512x128xf32>
    %29 = tpu.matmul %26, %28, %cst_34 {dimension_numbers = #tpu.dot_dimension_numbers<[1], [0], [0], [1], [0, 0, 1, 1], [], []>} : vector<512x3xf32>, vector<3x128xf32>, vector<512x128xf32> -> vector<512x128xf32>
    %30 = arith.addf %24, %29 : vector<512x128xf32>
    %c0_35 = arith.constant 0 : index
    %c1_36 = arith.constant 1 : index
    %c2_37 = arith.constant 2 : index
    %c0_38 = arith.constant 0 : index
    %31 = vector.load %arg1[%c0_35, %c1_36, %c2_37, %c0_38] : memref<2x18x18x3xf32, #tpu.memory_space<vmem>>, vector<2x16x16x3xf32>
    %32 = vector.shape_cast %31 : vector<2x16x16x3xf32> to vector<512x3xf32>
    %c5 = arith.constant 5 : index
    %c0_39 = arith.constant 0 : index
    %c0_40 = arith.constant 0 : index
    %33 = vector.load %arg2[%c5, %c0_39, %c0_40] : memref<9x3x128xf32, #tpu.memory_space<vmem>>, vector<1x3x128xf32>
    %34 = vector.shape_cast %33 : vector<1x3x128xf32> to vector<3x128xf32>
    %cst_41 = arith.constant dense<0.000000e+00> : vector<512x128xf32>
    %35 = tpu.matmul %32, %34, %cst_41 {dimension_numbers = #tpu.dot_dimension_numbers<[1], [0], [0], [1], [0, 0, 1, 1], [], []>} : vector<512x3xf32>, vector<3x128xf32>, vector<512x128xf32> -> vector<512x128xf32>
    %36 = arith.addf %30, %35 : vector<512x128xf32>
    %c0_42 = arith.constant 0 : index
    %c2_43 = arith.constant 2 : index
    %c0_44 = arith.constant 0 : index
    %c0_45 = arith.constant 0 : index
    %37 = vector.load %arg1[%c0_42, %c2_43, %c0_44, %c0_45] : memref<2x18x18x3xf32, #tpu.memory_space<vmem>>, vector<2x16x16x3xf32>
    %38 = vector.shape_cast %37 : vector<2x16x16x3xf32> to vector<512x3xf32>
    %c6 = arith.constant 6 : index
    %c0_46 = arith.constant 0 : index
    %c0_47 = arith.constant 0 : index
    %39 = vector.load %arg2[%c6, %c0_46, %c0_47] : memref<9x3x128xf32, #tpu.memory_space<vmem>>, vector<1x3x128xf32>
    %40 = vector.shape_cast %39 : vector<1x3x128xf32> to vector<3x128xf32>
    %cst_48 = arith.constant dense<0.000000e+00> : vector<512x128xf32>
    %41 = tpu.matmul %38, %40, %cst_48 {dimension_numbers = #tpu.dot_dimension_numbers<[1], [0], [0], [1], [0, 0, 1, 1], [], []>} : vector<512x3xf32>, vector<3x128xf32>, vector<512x128xf32> -> vector<512x128xf32>
    %42 = arith.addf %36, %41 : vector<512x128xf32>
    %c0_49 = arith.constant 0 : index
    %c2_50 = arith.constant 2 : index
    %c1_51 = arith.constant 1 : index
    %c0_52 = arith.constant 0 : index
    %43 = vector.load %arg1[%c0_49, %c2_50, %c1_51, %c0_52] : memref<2x18x18x3xf32, #tpu.memory_space<vmem>>, vector<2x16x16x3xf32>
    %44 = vector.shape_cast %43 : vector<2x16x16x3xf32> to vector<512x3xf32>
    %c7 = arith.constant 7 : index
    %c0_53 = arith.constant 0 : index
    %c0_54 = arith.constant 0 : index
    %45 = vector.load %arg2[%c7, %c0_53, %c0_54] : memref<9x3x128xf32, #tpu.memory_space<vmem>>, vector<1x3x128xf32>
    %46 = vector.shape_cast %45 : vector<1x3x128xf32> to vector<3x128xf32>
    %cst_55 = arith.constant dense<0.000000e+00> : vector<512x128xf32>
    %47 = tpu.matmul %44, %46, %cst_55 {dimension_numbers = #tpu.dot_dimension_numbers<[1], [0], [0], [1], [0, 0, 1, 1], [], []>} : vector<512x3xf32>, vector<3x128xf32>, vector<512x128xf32> -> vector<512x128xf32>
    %48 = arith.addf %42, %47 : vector<512x128xf32>
    %c0_56 = arith.constant 0 : index
    %c2_57 = arith.constant 2 : index
    %c2_58 = arith.constant 2 : index
    %c0_59 = arith.constant 0 : index
    %49 = vector.load %arg1[%c0_56, %c2_57, %c2_58, %c0_59] : memref<2x18x18x3xf32, #tpu.memory_space<vmem>>, vector<2x16x16x3xf32>
    %50 = vector.shape_cast %49 : vector<2x16x16x3xf32> to vector<512x3xf32>
    %c8 = arith.constant 8 : index
    %c0_60 = arith.constant 0 : index
    %c0_61 = arith.constant 0 : index
    %51 = vector.load %arg2[%c8, %c0_60, %c0_61] : memref<9x3x128xf32, #tpu.memory_space<vmem>>, vector<1x3x128xf32>
    %52 = vector.shape_cast %51 : vector<1x3x128xf32> to vector<3x128xf32>
    %cst_62 = arith.constant dense<0.000000e+00> : vector<512x128xf32>
    %53 = tpu.matmul %50, %52, %cst_62 {dimension_numbers = #tpu.dot_dimension_numbers<[1], [0], [0], [1], [0, 0, 1, 1], [], []>} : vector<512x3xf32>, vector<3x128xf32>, vector<512x128xf32> -> vector<512x128xf32>
    %54 = arith.addf %48, %53 : vector<512x128xf32>
    %c0_63 = arith.constant 0 : index
    %c0_64 = arith.constant 0 : index
    %55 = vector.load %arg3[%c0_63, %c0_64] : memref<1x128xf32, #tpu.memory_space<vmem>>, vector<1x128xf32>
    %56 = vector.broadcast %55 : vector<1x128xf32> to vector<512x128xf32>
    %57 = arith.addf %54, %56 : vector<512x128xf32>
    %cst_65 = arith.constant 0.000000e+00 : f32
    %58 = vector.broadcast %cst_65 : f32 to vector<512x128xf32>
    %59 = arith.cmpf ogt, %57, %58 : vector<512x128xf32>
    %cst_66 = arith.constant 2.000000e-01 : f32
    %60 = vector.broadcast %cst_66 : f32 to vector<512x128xf32>
    %61 = arith.mulf %60, %57 : vector<512x128xf32>
    %62 = arith.select %59, %57, %61 : vector<512x128xi1>, vector<512x128xf32>
    %c0_67 = arith.constant 0 : index
    %c0_68 = arith.constant 0 : index
    %63 = vector.load %arg4[%c0_67, %c0_68] : memref<512x128xf32, #tpu.memory_space<vmem>>, vector<512x128xf32>
    tpu.vector_store %arg4[%c0_67, %c0_68], %62 {strides = array<i32>} : memref<512x128xf32, #tpu.memory_space<vmem>>, vector<512x128xf32>,
    return
  }
  func.func @transform_0(%arg0: i32) -> (i32, i32, i32, i32) {
    %c0_i32 = arith.constant 0 : i32
    %c0_i32_0 = arith.constant 0 : i32
    %c0_i32_1 = arith.constant 0 : i32
    %c0_i32_2 = arith.constant 0 : i32
    return %arg0, %c0_i32, %c0_i32_0, %c0_i32_1 : i32, i32, i32, i32
  }
  func.func @transform_1(%arg0: i32) -> (i32, i32, i32) {
    %c0_i32 = arith.constant 0 : i32
    %c0_i32_0 = arith.constant 0 : i32
    %c0_i32_1 = arith.constant 0 : i32
    %c0_i32_2 = arith.constant 0 : i32
    return %c0_i32, %c0_i32_0, %c0_i32_1 : i32, i32, i32
  }
  func.func @transform_2(%arg0: i32) -> (i32, i32) {
    %c0_i32 = arith.constant 0 : i32
    %c0_i32_0 = arith.constant 0 : i32
    %c0_i32_1 = arith.constant 0 : i32
    return %c0_i32, %c0_i32_0 : i32, i32
  }
  func.func @transform_3(%arg0: i32) -> (i32, i32) {
    %c0_i32 = arith.constant 0 : i32
    %c0_i32_0 = arith.constant 0 : i32
    return %arg0, %c0_i32 : i32, i32
  }
}

module attributes {stable_mosaic.version = 11 : i64} {
  func.func @_conv_s2_kernel(%arg0: i32, %arg1: memref<2x9x9x128xf32, #tpu.memory_space<vmem>>, %arg2: memref<2x9x9x128xf32, #tpu.memory_space<vmem>>, %arg3: memref<2x9x9x128xf32, #tpu.memory_space<vmem>>, %arg4: memref<2x9x9x128xf32, #tpu.memory_space<vmem>>, %arg5: memref<9x128x128xf32, #tpu.memory_space<vmem>>, %arg6: memref<1x128xf32, #tpu.memory_space<vmem>>, %arg7: memref<128x128xf32, #tpu.memory_space<vmem>>) attributes {dimension_semantics = [#tpu.dimension_semantics<parallel>], iteration_bounds = array<i64: 2>, scalar_prefetch = 0 : i64, scratch_operands = 0 : i64, tpu.core_type = #tpu.core_type<tc>, window_params = [{transform_indices = @transform_0, window_bounds = array<i64: 2, 9, 9, 128>}, {transform_indices = @transform_1, window_bounds = array<i64: 2, 9, 9, 128>}, {transform_indices = @transform_2, window_bounds = array<i64: 2, 9, 9, 128>}, {transform_indices = @transform_3, window_bounds = array<i64: 2, 9, 9, 128>}, {pipeline_mode = #tpu.pipeline_mode<synchronous>, transform_indices = @transform_4, window_bounds = array<i64: 9, 128, 128>}, {pipeline_mode = #tpu.pipeline_mode<synchronous>, transform_indices = @transform_5, window_bounds = array<i64: 1, 128>}, {transform_indices = @transform_6, window_bounds = array<i64: 128, 128>}]} {
    %cst = arith.constant 0.000000e+00 : f32
    %0 = vector.broadcast %cst : f32 to vector<128x128xf32>
    %c0 = arith.constant 0 : index
    %c0_0 = arith.constant 0 : index
    %c0_1 = arith.constant 0 : index
    %c0_2 = arith.constant 0 : index
    %1 = vector.load %arg1[%c0, %c0_0, %c0_1, %c0_2] : memref<2x9x9x128xf32, #tpu.memory_space<vmem>>, vector<2x8x8x128xf32>
    %2 = vector.shape_cast %1 : vector<2x8x8x128xf32> to vector<128x128xf32>
    %c0_3 = arith.constant 0 : index
    %c0_4 = arith.constant 0 : index
    %c0_5 = arith.constant 0 : index
    %3 = vector.load %arg5[%c0_3, %c0_4, %c0_5] : memref<9x128x128xf32, #tpu.memory_space<vmem>>, vector<1x128x128xf32>
    %4 = vector.shape_cast %3 : vector<1x128x128xf32> to vector<128x128xf32>
    %cst_6 = arith.constant dense<0.000000e+00> : vector<128x128xf32>
    %5 = tpu.matmul %2, %4, %cst_6 {dimension_numbers = #tpu.dot_dimension_numbers<[1], [0], [0], [1], [0, 0, 1, 1], [], []>} : vector<128x128xf32>, vector<128x128xf32>, vector<128x128xf32> -> vector<128x128xf32>
    %6 = arith.addf %0, %5 : vector<128x128xf32>
    %c0_7 = arith.constant 0 : index
    %c0_8 = arith.constant 0 : index
    %c0_9 = arith.constant 0 : index
    %c0_10 = arith.constant 0 : index
    %7 = vector.load %arg2[%c0_7, %c0_8, %c0_9, %c0_10] : memref<2x9x9x128xf32, #tpu.memory_space<vmem>>, vector<2x8x8x128xf32>
    %8 = vector.shape_cast %7 : vector<2x8x8x128xf32> to vector<128x128xf32>
    %c1 = arith.constant 1 : index
    %c0_11 = arith.constant 0 : index
    %c0_12 = arith.constant 0 : index
    %9 = vector.load %arg5[%c1, %c0_11, %c0_12] : memref<9x128x128xf32, #tpu.memory_space<vmem>>, vector<1x128x128xf32>
    %10 = vector.shape_cast %9 : vector<1x128x128xf32> to vector<128x128xf32>
    %cst_13 = arith.constant dense<0.000000e+00> : vector<128x128xf32>
    %11 = tpu.matmul %8, %10, %cst_13 {dimension_numbers = #tpu.dot_dimension_numbers<[1], [0], [0], [1], [0, 0, 1, 1], [], []>} : vector<128x128xf32>, vector<128x128xf32>, vector<128x128xf32> -> vector<128x128xf32>
    %12 = arith.addf %6, %11 : vector<128x128xf32>
    %c0_14 = arith.constant 0 : index
    %c0_15 = arith.constant 0 : index
    %c1_16 = arith.constant 1 : index
    %c0_17 = arith.constant 0 : index
    %13 = vector.load %arg1[%c0_14, %c0_15, %c1_16, %c0_17] : memref<2x9x9x128xf32, #tpu.memory_space<vmem>>, vector<2x8x8x128xf32>
    %14 = vector.shape_cast %13 : vector<2x8x8x128xf32> to vector<128x128xf32>
    %c2 = arith.constant 2 : index
    %c0_18 = arith.constant 0 : index
    %c0_19 = arith.constant 0 : index
    %15 = vector.load %arg5[%c2, %c0_18, %c0_19] : memref<9x128x128xf32, #tpu.memory_space<vmem>>, vector<1x128x128xf32>
    %16 = vector.shape_cast %15 : vector<1x128x128xf32> to vector<128x128xf32>
    %cst_20 = arith.constant dense<0.000000e+00> : vector<128x128xf32>
    %17 = tpu.matmul %14, %16, %cst_20 {dimension_numbers = #tpu.dot_dimension_numbers<[1], [0], [0], [1], [0, 0, 1, 1], [], []>} : vector<128x128xf32>, vector<128x128xf32>, vector<128x128xf32> -> vector<128x128xf32>
    %18 = arith.addf %12, %17 : vector<128x128xf32>
    %c0_21 = arith.constant 0 : index
    %c0_22 = arith.constant 0 : index
    %c0_23 = arith.constant 0 : index
    %c0_24 = arith.constant 0 : index
    %19 = vector.load %arg3[%c0_21, %c0_22, %c0_23, %c0_24] : memref<2x9x9x128xf32, #tpu.memory_space<vmem>>, vector<2x8x8x128xf32>
    %20 = vector.shape_cast %19 : vector<2x8x8x128xf32> to vector<128x128xf32>
    %c3 = arith.constant 3 : index
    %c0_25 = arith.constant 0 : index
    %c0_26 = arith.constant 0 : index
    %21 = vector.load %arg5[%c3, %c0_25, %c0_26] : memref<9x128x128xf32, #tpu.memory_space<vmem>>, vector<1x128x128xf32>
    %22 = vector.shape_cast %21 : vector<1x128x128xf32> to vector<128x128xf32>
    %cst_27 = arith.constant dense<0.000000e+00> : vector<128x128xf32>
    %23 = tpu.matmul %20, %22, %cst_27 {dimension_numbers = #tpu.dot_dimension_numbers<[1], [0], [0], [1], [0, 0, 1, 1], [], []>} : vector<128x128xf32>, vector<128x128xf32>, vector<128x128xf32> -> vector<128x128xf32>
    %24 = arith.addf %18, %23 : vector<128x128xf32>
    %c0_28 = arith.constant 0 : index
    %c0_29 = arith.constant 0 : index
    %c0_30 = arith.constant 0 : index
    %c0_31 = arith.constant 0 : index
    %25 = vector.load %arg4[%c0_28, %c0_29, %c0_30, %c0_31] : memref<2x9x9x128xf32, #tpu.memory_space<vmem>>, vector<2x8x8x128xf32>
    %26 = vector.shape_cast %25 : vector<2x8x8x128xf32> to vector<128x128xf32>
    %c4 = arith.constant 4 : index
    %c0_32 = arith.constant 0 : index
    %c0_33 = arith.constant 0 : index
    %27 = vector.load %arg5[%c4, %c0_32, %c0_33] : memref<9x128x128xf32, #tpu.memory_space<vmem>>, vector<1x128x128xf32>
    %28 = vector.shape_cast %27 : vector<1x128x128xf32> to vector<128x128xf32>
    %cst_34 = arith.constant dense<0.000000e+00> : vector<128x128xf32>
    %29 = tpu.matmul %26, %28, %cst_34 {dimension_numbers = #tpu.dot_dimension_numbers<[1], [0], [0], [1], [0, 0, 1, 1], [], []>} : vector<128x128xf32>, vector<128x128xf32>, vector<128x128xf32> -> vector<128x128xf32>
    %30 = arith.addf %24, %29 : vector<128x128xf32>
    %c0_35 = arith.constant 0 : index
    %c0_36 = arith.constant 0 : index
    %c1_37 = arith.constant 1 : index
    %c0_38 = arith.constant 0 : index
    %31 = vector.load %arg3[%c0_35, %c0_36, %c1_37, %c0_38] : memref<2x9x9x128xf32, #tpu.memory_space<vmem>>, vector<2x8x8x128xf32>
    %32 = vector.shape_cast %31 : vector<2x8x8x128xf32> to vector<128x128xf32>
    %c5 = arith.constant 5 : index
    %c0_39 = arith.constant 0 : index
    %c0_40 = arith.constant 0 : index
    %33 = vector.load %arg5[%c5, %c0_39, %c0_40] : memref<9x128x128xf32, #tpu.memory_space<vmem>>, vector<1x128x128xf32>
    %34 = vector.shape_cast %33 : vector<1x128x128xf32> to vector<128x128xf32>
    %cst_41 = arith.constant dense<0.000000e+00> : vector<128x128xf32>
    %35 = tpu.matmul %32, %34, %cst_41 {dimension_numbers = #tpu.dot_dimension_numbers<[1], [0], [0], [1], [0, 0, 1, 1], [], []>} : vector<128x128xf32>, vector<128x128xf32>, vector<128x128xf32> -> vector<128x128xf32>
    %36 = arith.addf %30, %35 : vector<128x128xf32>
    %c0_42 = arith.constant 0 : index
    %c1_43 = arith.constant 1 : index
    %c0_44 = arith.constant 0 : index
    %c0_45 = arith.constant 0 : index
    %37 = vector.load %arg1[%c0_42, %c1_43, %c0_44, %c0_45] : memref<2x9x9x128xf32, #tpu.memory_space<vmem>>, vector<2x8x8x128xf32>
    %38 = vector.shape_cast %37 : vector<2x8x8x128xf32> to vector<128x128xf32>
    %c6 = arith.constant 6 : index
    %c0_46 = arith.constant 0 : index
    %c0_47 = arith.constant 0 : index
    %39 = vector.load %arg5[%c6, %c0_46, %c0_47] : memref<9x128x128xf32, #tpu.memory_space<vmem>>, vector<1x128x128xf32>
    %40 = vector.shape_cast %39 : vector<1x128x128xf32> to vector<128x128xf32>
    %cst_48 = arith.constant dense<0.000000e+00> : vector<128x128xf32>
    %41 = tpu.matmul %38, %40, %cst_48 {dimension_numbers = #tpu.dot_dimension_numbers<[1], [0], [0], [1], [0, 0, 1, 1], [], []>} : vector<128x128xf32>, vector<128x128xf32>, vector<128x128xf32> -> vector<128x128xf32>
    %42 = arith.addf %36, %41 : vector<128x128xf32>
    %c0_49 = arith.constant 0 : index
    %c1_50 = arith.constant 1 : index
    %c0_51 = arith.constant 0 : index
    %c0_52 = arith.constant 0 : index
    %43 = vector.load %arg2[%c0_49, %c1_50, %c0_51, %c0_52] : memref<2x9x9x128xf32, #tpu.memory_space<vmem>>, vector<2x8x8x128xf32>
    %44 = vector.shape_cast %43 : vector<2x8x8x128xf32> to vector<128x128xf32>
    %c7 = arith.constant 7 : index
    %c0_53 = arith.constant 0 : index
    %c0_54 = arith.constant 0 : index
    %45 = vector.load %arg5[%c7, %c0_53, %c0_54] : memref<9x128x128xf32, #tpu.memory_space<vmem>>, vector<1x128x128xf32>
    %46 = vector.shape_cast %45 : vector<1x128x128xf32> to vector<128x128xf32>
    %cst_55 = arith.constant dense<0.000000e+00> : vector<128x128xf32>
    %47 = tpu.matmul %44, %46, %cst_55 {dimension_numbers = #tpu.dot_dimension_numbers<[1], [0], [0], [1], [0, 0, 1, 1], [], []>} : vector<128x128xf32>, vector<128x128xf32>, vector<128x128xf32> -> vector<128x128xf32>
    %48 = arith.addf %42, %47 : vector<128x128xf32>
    %c0_56 = arith.constant 0 : index
    %c1_57 = arith.constant 1 : index
    %c1_58 = arith.constant 1 : index
    %c0_59 = arith.constant 0 : index
    %49 = vector.load %arg1[%c0_56, %c1_57, %c1_58, %c0_59] : memref<2x9x9x128xf32, #tpu.memory_space<vmem>>, vector<2x8x8x128xf32>
    %50 = vector.shape_cast %49 : vector<2x8x8x128xf32> to vector<128x128xf32>
    %c8 = arith.constant 8 : index
    %c0_60 = arith.constant 0 : index
    %c0_61 = arith.constant 0 : index
    %51 = vector.load %arg5[%c8, %c0_60, %c0_61] : memref<9x128x128xf32, #tpu.memory_space<vmem>>, vector<1x128x128xf32>
    %52 = vector.shape_cast %51 : vector<1x128x128xf32> to vector<128x128xf32>
    %cst_62 = arith.constant dense<0.000000e+00> : vector<128x128xf32>
    %53 = tpu.matmul %50, %52, %cst_62 {dimension_numbers = #tpu.dot_dimension_numbers<[1], [0], [0], [1], [0, 0, 1, 1], [], []>} : vector<128x128xf32>, vector<128x128xf32>, vector<128x128xf32> -> vector<128x128xf32>
    %54 = arith.addf %48, %53 : vector<128x128xf32>
    %c0_63 = arith.constant 0 : index
    %c0_64 = arith.constant 0 : index
    %55 = vector.load %arg6[%c0_63, %c0_64] : memref<1x128xf32, #tpu.memory_space<vmem>>, vector<1x128xf32>
    %56 = vector.broadcast %55 : vector<1x128xf32> to vector<128x128xf32>
    %57 = arith.addf %54, %56 : vector<128x128xf32>
    %cst_65 = arith.constant 0.000000e+00 : f32
    %58 = vector.broadcast %cst_65 : f32 to vector<128x128xf32>
    %59 = arith.cmpf ogt, %57, %58 : vector<128x128xf32>
    %cst_66 = arith.constant 2.000000e-01 : f32
    %60 = vector.broadcast %cst_66 : f32 to vector<128x128xf32>
    %61 = arith.mulf %60, %57 : vector<128x128xf32>
    %62 = arith.select %59, %57, %61 : vector<128x128xi1>, vector<128x128xf32>
    %c0_67 = arith.constant 0 : index
    %c0_68 = arith.constant 0 : index
    %63 = vector.load %arg7[%c0_67, %c0_68] : memref<128x128xf32, #tpu.memory_space<vmem>>, vector<128x128xf32>
    tpu.vector_store %arg7[%c0_67, %c0_68], %62 {strides = array<i32>} : memref<128x128xf32, #tpu.memory_space<vmem>>, vector<128x128xf32>,
    return
  }
  func.func @transform_0(%arg0: i32) -> (i32, i32, i32, i32) {
    %c0_i32 = arith.constant 0 : i32
    %c0_i32_0 = arith.constant 0 : i32
    %c0_i32_1 = arith.constant 0 : i32
    %c0_i32_2 = arith.constant 0 : i32
    return %arg0, %c0_i32, %c0_i32_0, %c0_i32_1 : i32, i32, i32, i32
  }
  func.func @transform_1(%arg0: i32) -> (i32, i32, i32, i32) {
    %c0_i32 = arith.constant 0 : i32
    %c0_i32_0 = arith.constant 0 : i32
    %c0_i32_1 = arith.constant 0 : i32
    %c0_i32_2 = arith.constant 0 : i32
    return %arg0, %c0_i32, %c0_i32_0, %c0_i32_1 : i32, i32, i32, i32
  }
  func.func @transform_2(%arg0: i32) -> (i32, i32, i32, i32) {
    %c0_i32 = arith.constant 0 : i32
    %c0_i32_0 = arith.constant 0 : i32
    %c0_i32_1 = arith.constant 0 : i32
    %c0_i32_2 = arith.constant 0 : i32
    return %arg0, %c0_i32, %c0_i32_0, %c0_i32_1 : i32, i32, i32, i32
  }
  func.func @transform_3(%arg0: i32) -> (i32, i32, i32, i32) {
    %c0_i32 = arith.constant 0 : i32
    %c0_i32_0 = arith.constant 0 : i32
    %c0_i32_1 = arith.constant 0 : i32
    %c0_i32_2 = arith.constant 0 : i32
    return %arg0, %c0_i32, %c0_i32_0, %c0_i32_1 : i32, i32, i32, i32
  }
  func.func @transform_4(%arg0: i32) -> (i32, i32, i32) {
    %c0_i32 = arith.constant 0 : i32
    %c0_i32_0 = arith.constant 0 : i32
    %c0_i32_1 = arith.constant 0 : i32
    %c0_i32_2 = arith.constant 0 : i32
    return %c0_i32, %c0_i32_0, %c0_i32_1 : i32, i32, i32
  }
  func.func @transform_5(%arg0: i32) -> (i32, i32) {
    %c0_i32 = arith.constant 0 : i32
    %c0_i32_0 = arith.constant 0 : i32
    %c0_i32_1 = arith.constant 0 : i32
    return %c0_i32, %c0_i32_0 : i32, i32
  }
  func.func @transform_6(%arg0: i32) -> (i32, i32) {
    %c0_i32 = arith.constant 0 : i32
    %c0_i32_0 = arith.constant 0 : i32
    return %arg0, %c0_i32 : i32, i32
  }
}

module attributes {stable_mosaic.version = 11 : i64} {
  func.func @_tail_kernel(%arg0: i32, %arg1: memref<64x1152xf32, #tpu.memory_space<vmem>>, %arg2: memref<1152x128xf32, #tpu.memory_space<vmem>>, %arg3: memref<1x128xf32, #tpu.memory_space<vmem>>, %arg4: memref<128x1xf32, #tpu.memory_space<vmem>>, %arg5: memref<1x1xf32, #tpu.memory_space<vmem>>, %arg6: memref<1x1xf32, #tpu.memory_space<vmem>>, %arg7: memref<1x1xf32, #tpu.memory_space<vmem>>) attributes {dimension_semantics = [#tpu.dimension_semantics<arbitrary>], iteration_bounds = array<i64: 1>, scalar_prefetch = 0 : i64, scratch_operands = 0 : i64, tpu.core_type = #tpu.core_type<tc>, window_params = [{pipeline_mode = #tpu.pipeline_mode<synchronous>, transform_indices = @transform_0, window_bounds = array<i64: 64, 1152>}, {pipeline_mode = #tpu.pipeline_mode<synchronous>, transform_indices = @transform_1, window_bounds = array<i64: 1152, 128>}, {pipeline_mode = #tpu.pipeline_mode<synchronous>, transform_indices = @transform_2, window_bounds = array<i64: 1, 128>}, {pipeline_mode = #tpu.pipeline_mode<synchronous>, transform_indices = @transform_3, window_bounds = array<i64: 128, 1>}, {pipeline_mode = #tpu.pipeline_mode<synchronous>, transform_indices = @transform_4, window_bounds = array<i64: 1, 1>}, {pipeline_mode = #tpu.pipeline_mode<synchronous>, transform_indices = @transform_5, window_bounds = array<i64: 1, 1>}, {pipeline_mode = #tpu.pipeline_mode<synchronous>, transform_indices = @transform_6, window_bounds = array<i64: 1, 1>}]} {
    %c0 = arith.constant 0 : index
    %c0_0 = arith.constant 0 : index
    %0 = vector.load %arg1[%c0, %c0_0] : memref<64x1152xf32, #tpu.memory_space<vmem>>, vector<64x1152xf32>
    %c0_1 = arith.constant 0 : index
    %c0_2 = arith.constant 0 : index
    %1 = vector.load %arg2[%c0_1, %c0_2] : memref<1152x128xf32, #tpu.memory_space<vmem>>, vector<1152x128xf32>
    %cst = arith.constant dense<0.000000e+00> : vector<64x128xf32>
    %2 = tpu.matmul %0, %1, %cst {dimension_numbers = #tpu.dot_dimension_numbers<[1], [0], [0], [1], [0, 0, 1, 1], [], []>} : vector<64x1152xf32>, vector<1152x128xf32>, vector<64x128xf32> -> vector<64x128xf32>
    %c0_3 = arith.constant 0 : index
    %c0_4 = arith.constant 0 : index
    %3 = vector.load %arg3[%c0_3, %c0_4] : memref<1x128xf32, #tpu.memory_space<vmem>>, vector<1x128xf32>
    %4 = vector.broadcast %3 : vector<1x128xf32> to vector<64x128xf32>
    %5 = arith.addf %2, %4 : vector<64x128xf32>
    %cst_5 = arith.constant 0.000000e+00 : f32
    %6 = vector.broadcast %cst_5 : f32 to vector<64x128xf32>
    %7 = arith.cmpf ogt, %5, %6 : vector<64x128xf32>
    %cst_6 = arith.constant 2.000000e-01 : f32
    %8 = vector.broadcast %cst_6 : f32 to vector<64x128xf32>
    %9 = arith.mulf %8, %5 : vector<64x128xf32>
    %10 = arith.select %7, %5, %9 : vector<64x128xi1>, vector<64x128xf32>
    %11 = vector.shape_cast %10 : vector<64x128xf32> to vector<4x16x128xf32>
    %cst_7 = arith.constant dense<0.000000e+00> : vector<4x128xf32>
    %12 = vector.multi_reduction <add>, %11, %cst_7 [1] : vector<4x16x128xf32> to vector<4x128xf32>
    %cst_8 = arith.constant 6.250000e-02 : f32
    %13 = vector.broadcast %cst_8 : f32 to vector<4x128xf32>
    %14 = arith.mulf %12, %13 : vector<4x128xf32>
    %c0_9 = arith.constant 0 : index
    %c0_10 = arith.constant 0 : index
    %15 = vector.load %arg4[%c0_9, %c0_10] : memref<128x1xf32, #tpu.memory_space<vmem>>, vector<128x1xf32>
    %cst_11 = arith.constant dense<0.000000e+00> : vector<4x1xf32>
    %16 = tpu.matmul %14, %15, %cst_11 {dimension_numbers = #tpu.dot_dimension_numbers<[1], [0], [0], [1], [0, 0, 1, 1], [], []>} : vector<4x128xf32>, vector<128x1xf32>, vector<4x1xf32> -> vector<4x1xf32>
    %c0_12 = arith.constant 0 : index
    %c0_13 = arith.constant 0 : index
    %17 = vector.load %arg5[%c0_12, %c0_13] : memref<1x1xf32, #tpu.memory_space<vmem>>, vector<1x1xf32>
    %18 = vector.broadcast %17 : vector<1x1xf32> to vector<4x1xf32>
    %19 = arith.addf %16, %18 : vector<4x1xf32>
    %20 = vector.extract_strided_slice %19 {offsets = [0, 0], sizes = [2, 1], strides = [1, 1]} : vector<4x1xf32> to vector<2x1xf32>
    %21 = vector.extract_strided_slice %19 {offsets = [2, 0], sizes = [2, 1], strides = [1, 1]} : vector<4x1xf32> to vector<2x1xf32>
    %cst_14 = arith.constant 0.000000e+00 : f32
    %22 = vector.broadcast %cst_14 : f32 to vector<2x1xf32>
    %23 = arith.maximumf %21, %22 : vector<2x1xf32>
    %cst_15 = arith.constant 1.000000e+00 : f32
    %24 = vector.broadcast %cst_15 : f32 to vector<2x1xf32>
    %25 = arith.mulf %21, %24 : vector<2x1xf32>
    %26 = arith.subf %23, %25 : vector<2x1xf32>
    %27 = math.absf %21 : vector<2x1xf32>
    %cst_16 = arith.constant 0.000000e+00 : f32
    %28 = vector.broadcast %cst_16 : f32 to vector<2x1xf32>
    %29 = arith.subf %28, %27 : vector<2x1xf32>
    %30 = math.exp %29 : vector<2x1xf32>
    %31 = math.log1p %30 : vector<2x1xf32>
    %32 = arith.addf %26, %31 : vector<2x1xf32>
    %33 = vector.shape_cast %32 : vector<2x1xf32> to vector<1x2x1xf32>
    %cst_17 = arith.constant dense<0.000000e+00> : vector<1xf32>
    %34 = vector.multi_reduction <add>, %33, %cst_17 [1, 2] : vector<1x2x1xf32> to vector<1xf32>
    %35 = vector.shape_cast %34 : vector<1xf32> to vector<1x1x1xf32>
    %36 = vector.extract %35[0, 0, 0] : f32 from vector<1x1x1xf32>
    %37 = vector.broadcast %36 : f32 to vector<1x1xf32>
    %cst_18 = arith.constant 0.000000e+00 : f32
    %38 = vector.broadcast %cst_18 : f32 to vector<2x1xf32>
    %39 = arith.maximumf %20, %38 : vector<2x1xf32>
    %cst_19 = arith.constant 0.000000e+00 : f32
    %40 = vector.broadcast %cst_19 : f32 to vector<2x1xf32>
    %41 = arith.mulf %20, %40 : vector<2x1xf32>
    %42 = arith.subf %39, %41 : vector<2x1xf32>
    %43 = math.absf %20 : vector<2x1xf32>
    %cst_20 = arith.constant 0.000000e+00 : f32
    %44 = vector.broadcast %cst_20 : f32 to vector<2x1xf32>
    %45 = arith.subf %44, %43 : vector<2x1xf32>
    %46 = math.exp %45 : vector<2x1xf32>
    %47 = math.log1p %46 : vector<2x1xf32>
    %48 = arith.addf %42, %47 : vector<2x1xf32>
    %49 = vector.shape_cast %48 : vector<2x1xf32> to vector<1x2x1xf32>
    %cst_21 = arith.constant dense<0.000000e+00> : vector<1xf32>
    %50 = vector.multi_reduction <add>, %49, %cst_21 [1, 2] : vector<1x2x1xf32> to vector<1xf32>
    %51 = vector.shape_cast %50 : vector<1xf32> to vector<1x1x1xf32>
    %52 = vector.extract %51[0, 0, 0] : f32 from vector<1x1x1xf32>
    %53 = vector.broadcast %52 : f32 to vector<1x1xf32>
    %54 = arith.addf %37, %53 : vector<1x1xf32>
    %cst_22 = arith.constant 5.000000e-01 : f32
    %55 = vector.broadcast %cst_22 : f32 to vector<1x1xf32>
    %56 = arith.mulf %54, %55 : vector<1x1xf32>
    %c0_23 = arith.constant 0 : index
    %c0_24 = arith.constant 0 : index
    %57 = vector.load %arg6[%c0_23, %c0_24] : memref<1x1xf32, #tpu.memory_space<vmem>>, vector<1x1xf32>
    tpu.vector_store %arg6[%c0_23, %c0_24], %56 {strides = array<i32>} : memref<1x1xf32, #tpu.memory_space<vmem>>, vector<1x1xf32>,
    %cst_25 = arith.constant 0.000000e+00 : f32
    %58 = vector.broadcast %cst_25 : f32 to vector<2x1xf32>
    %59 = arith.maximumf %20, %58 : vector<2x1xf32>
    %cst_26 = arith.constant 1.000000e+00 : f32
    %60 = vector.broadcast %cst_26 : f32 to vector<2x1xf32>
    %61 = arith.mulf %20, %60 : vector<2x1xf32>
    %62 = arith.subf %59, %61 : vector<2x1xf32>
    %63 = math.absf %20 : vector<2x1xf32>
    %cst_27 = arith.constant 0.000000e+00 : f32
    %64 = vector.broadcast %cst_27 : f32 to vector<2x1xf32>
    %65 = arith.subf %64, %63 : vector<2x1xf32>
    %66 = math.exp %65 : vector<2x1xf32>
    %67 = math.log1p %66 : vector<2x1xf32>
    %68 = arith.addf %62, %67 : vector<2x1xf32>
    %69 = vector.shape_cast %68 : vector<2x1xf32> to vector<1x2x1xf32>
    %cst_28 = arith.constant dense<0.000000e+00> : vector<1xf32>
    %70 = vector.multi_reduction <add>, %69, %cst_28 [1, 2] : vector<1x2x1xf32> to vector<1xf32>
    %71 = vector.shape_cast %70 : vector<1xf32> to vector<1x1x1xf32>
    %72 = vector.extract %71[0, 0, 0] : f32 from vector<1x1x1xf32>
    %73 = vector.broadcast %72 : f32 to vector<1x1xf32>
    %cst_29 = arith.constant 5.000000e-01 : f32
    %74 = vector.broadcast %cst_29 : f32 to vector<1x1xf32>
    %75 = arith.mulf %73, %74 : vector<1x1xf32>
    %c0_30 = arith.constant 0 : index
    %c0_31 = arith.constant 0 : index
    %76 = vector.load %arg7[%c0_30, %c0_31] : memref<1x1xf32, #tpu.memory_space<vmem>>, vector<1x1xf32>
    tpu.vector_store %arg7[%c0_30, %c0_31], %75 {strides = array<i32>} : memref<1x1xf32, #tpu.memory_space<vmem>>, vector<1x1xf32>,
    return
  }
  func.func @transform_0(%arg0: i32) -> (i32, i32) {
    %c0_i32 = arith.constant 0 : i32
    %c0_i32_0 = arith.constant 0 : i32
    %c0_i32_1 = arith.constant 0 : i32
    return %c0_i32, %c0_i32_0 : i32, i32
  }
  func.func @transform_1(%arg0: i32) -> (i32, i32) {
    %c0_i32 = arith.constant 0 : i32
    %c0_i32_0 = arith.constant 0 : i32
    %c0_i32_1 = arith.constant 0 : i32
    return %c0_i32, %c0_i32_0 : i32, i32
  }
  func.func @transform_2(%arg0: i32) -> (i32, i32) {
    %c0_i32 = arith.constant 0 : i32
    %c0_i32_0 = arith.constant 0 : i32
    %c0_i32_1 = arith.constant 0 : i32
    return %c0_i32, %c0_i32_0 : i32, i32
  }
  func.func @transform_3(%arg0: i32) -> (i32, i32) {
    %c0_i32 = arith.constant 0 : i32
    %c0_i32_0 = arith.constant 0 : i32
    %c0_i32_1 = arith.constant 0 : i32
    return %c0_i32, %c0_i32_0 : i32, i32
  }
  func.func @transform_4(%arg0: i32) -> (i32, i32) {
    %c0_i32 = arith.constant 0 : i32
    %c0_i32_0 = arith.constant 0 : i32
    %c0_i32_1 = arith.constant 0 : i32
    return %c0_i32, %c0_i32_0 : i32, i32
  }
  func.func @transform_5(%arg0: i32) -> (i32, i32) {
    %c0_i32 = arith.constant 0 : i32
    %c0_i32_0 = arith.constant 0 : i32
    %c0_i32_1 = arith.constant 0 : i32
    return %c0_i32, %c0_i32_0 : i32, i32
  }
  func.func @transform_6(%arg0: i32) -> (i32, i32) {
    %c0_i32 = arith.constant 0 : i32
    %c0_i32_0 = arith.constant 0 : i32
    %c0_i32_1 = arith.constant 0 : i32
    return %c0_i32, %c0_i32_0 : i32, i32
  }
}

</mosaic_0001>

<bundles_post_ra>
// kernel: adversarial_forward.4
= control target key start
LH: loop header
LB: loop body
LE: loop exit
PB: predicated region body
PF: predicated region fallthrough
CT: control target
= control target key end

     0   :  { %s3697_s21 = smov 0   ;;  %s4507_s0 = inlined_call_operand.vmem [shape: f32[4,9,9,128], index: 0, kind: input, shape index: {}]   ;;  %s4508_s1 = inlined_call_operand.vmem [shape: f32[4,9,9,128], index: 1, kind: input, shape index: {}]   ;;  %s4509_s2 = inlined_call_operand.vmem [shape: f32[4,9,9,128], index: 2, kind: input, shape index: {}]   ;;  %s4510_s3 = inlined_call_operand.vmem [shape: f32[4,9,9,128], index: 3, kind: input, shape index: {}]   ;;  %s4511_s4 = inlined_call_operand.vmem [shape: f32[9,128,128], index: 4, kind: input, shape index: {}]   ;;  %s4512_s5 = inlined_call_operand.vmem [shape: f32[1,128], index: 5, kind: input, shape index: {}]   ;;  %s4513_s6 = inlined_call_operand.vmem [shape: f32[256,128], index: 6, kind: output, shape index: {}]  }
   0x1 LB: > { %s2227_s22 = sadd.s32 4294967295, %s3660_s21   ;;  %p2231_p0 = scmp.ge.s32.totalorder %s3660_s21, 1  ;;  %s3660_s21 = sphi %s3697_s21, %s16_s21  }
   0x2   : > { %p250_p1 = scmp.lt.s32.totalorder %s3660_s21, 3 }
   0x4   : > { %p251_p2 = pnand %p2231_p0, %p250_p1 }
   0x5   : > { %v2242_v0 = vld [vmem:[%s4511_s4 + $0x80] sm:$0xff] (!%p251_p2)  ;;  %v2243_v1 = vld [vmem:[%s4511_s4 + $0x88] sm:$0xff] (!%p251_p2)  ;;  %s2232_s29 = sshll.u32 (!%p251_p2), %s2227_s22, 1  ;;  %v2244_v5 = vld [vmem:[%s4511_s4 + $0x90] sm:$0xff] (!%p251_p2) }
   0x6   : > { %254 = sbr.rel (%p251_p2) target bundleno = 407 (0x197), region = 44  ;;  %v2290_v2 = vld [vmem:[%s4511_s4 + $0x200] sm:$0xff] (!%p251_p2)  ;;  %v3213_v3 = vpack.c.bf16 (!%p251_p2), %v2243_v1, %v2242_v0  ;;  %v2291_v4 = vld [vmem:[%s4511_s4 + $0x208] sm:$0xff] (!%p251_p2)  ;;  %v2245_v6 = vld [vmem:[%s4511_s4 + $0x98] sm:$0xff] (!%p251_p2)  ;;  %p300_p3 = scmp.lt.s32.totalorder (!%p251_p2), %s2232_s29, 3 }
   0x7   : > { %v3341_v7 = vpack.c.bf16 (!%p251_p2), %v2291_v4, %v2290_v2  ;;  %v3217_v8 = vpack.c.bf16 (!%p251_p2), %v2245_v6, %v2244_v5  ;;  %v2292_v9 = vld [vmem:[%s4511_s4 + $0x210] sm:$0xff] (!%p251_p2)  ;;  %v2293_v10 = vld [vmem:[%s4511_s4 + $0x218] sm:$0xff] (!%p251_p2)  ;;  %v2246_v11 = vld [vmem:[%s4511_s4 + $0xa0] sm:$0xff] (!%p251_p2) }
   0x8   : > { %3214 = vmatprep.subr.bf16.mxu1 (!%p251_p2), %v3213_v3  ;;  %v3345_v12 = vpack.c.bf16 (!%p251_p2), %v2293_v10, %v2292_v9  ;;  %v2247_v13 = vld [vmem:[%s4511_s4 + $0xa8] sm:$0xff] (!%p251_p2)  ;;  %v2294_v14 = vld [vmem:[%s4511_s4 + $0x220] sm:$0xff] (!%p251_p2)  ;;  %v2248_v18 = vld [vmem:[%s4511_s4 + $0xb0] sm:$0xff] (!%p251_p2) }
   0x9   : > { %v2295_v15 = vld [vmem:[%s4511_s4 + $0x228] sm:$0xff] (!%p251_p2)  ;;  %3342 = vmatprep.subr.bf16.mxu0 (!%p251_p2), %v3341_v7  ;;  %3216 = vmatpush3.bf16.msra.mxu1 (!%p251_p2), %v3213_v3  ;;  %v3221_v16 = vpack.c.bf16 (!%p251_p2), %v2247_v13, %v2246_v11  ;;  %v2249_v19 = vld [vmem:[%s4511_s4 + $0xb8] sm:$0xff] (!%p251_p2)  ;;  %v2296_v20 = vld [vmem:[%s4511_s4 + $0x230] sm:$0xff] (!%p251_p2) }
   0xa   : > { %3344 = vmatpush3.bf16.msra.mxu0 (!%p251_p2), %v3341_v7  ;;  %3218 = vmatprep.subr.bf16.mxu1 (!%p251_p2), %v3217_v8  ;;  %v3349_v17 = vpack.c.bf16 (!%p251_p2), %v2295_v15, %v2294_v14  ;;  %v2297_v21 = vld [vmem:[%s4511_s4 + $0x238] sm:$0xff] (!%p251_p2)  ;;  %v3225_v22 = vpack.c.bf16 (!%p251_p2), %v2249_v19, %v2248_v18  ;;  %v2250_v24 = vld [vmem:[%s4511_s4 + $0xc0] sm:$0xff] (!%p251_p2)  ;;  %v2251_v25 = vld [vmem:[%s4511_s4 + $0xc8] sm:$0xff] (!%p251_p2) }
   0xb   : > { %3346 = vmatprep.subr.bf16.mxu0 (!%p251_p2), %v3345_v12  ;;  %v3353_v23 = vpack.c.bf16 (!%p251_p2), %v2297_v21, %v2296_v20  ;;  %v2298_v27 = vld [vmem:[%s4511_s4 + $0x240] sm:$0xff] (!%p251_p2)  ;;  %v2299_v28 = vld [vmem:[%s4511_s4 + $0x248] sm:$0xff] (!%p251_p2)  ;;  %v3229_v30 = vpack.c.bf16 (!%p251_p2), %v2251_v25, %v2250_v24  ;;  %v2252_v32 = vld [vmem:[%s4511_s4 + $0xd0] sm:$0xff] (!%p251_p2) }
   0xc   : > { %v3357_v31 = vpack.c.bf16 (!%p251_p2), %v2299_v28, %v2298_v27  ;;  %v2253_v33 = vld [vmem:[%s4511_s4 + $0xd8] sm:$0xff] (!%p251_p2)  ;;  %v2300_v34 = vld [vmem:[%s4511_s4 + $0x250] sm:$0xff] (!%p251_p2)  ;;  %v2254_v38 = vld [vmem:[%s4511_s4 + $0xe0] sm:$0xff] (!%p251_p2) }
   0xd   : > { %s4515_s29 = smov (!%p300_p3, %s2232_s29), 3  ;;  %3220 = vmatpush3.bf16.msra.mxu1 %v3217_v8  ;;  %v2301_v35 = vld [vmem:[%s4511_s4 + $0x258] sm:$0xff]  ;;  %v3233_v36 = vpack.c.bf16 %v2253_v33, %v2252_v32  ;;  %v2255_v39 = vld [vmem:[%s4511_s4 + $0xe8] sm:$0xff]  ;;  %v2302_v40 = vld [vmem:[%s4511_s4 + $0x260] sm:$0xff] }
   0xe   : > { %s3743_s26 = smul.u32 144, %s4515_s29  ;;  %3348 = vmatpush3.bf16.msra.mxu0 %v3345_v12  ;;  %3222 = vmatprep.subr.bf16.mxu1 %v3221_v16  ;;  %v3361_v37 = vpack.c.bf16 %v2301_v35, %v2300_v34  ;;  %v2303_v41 = vld [vmem:[%s4511_s4 + $0x268] sm:$0xff]  ;;  %v3237_v42 = vpack.c.bf16 %v2255_v39, %v2254_v38  ;;  %v2256_v44 = vld [vmem:[%s4511_s4 + $0xf0] sm:$0xff]  ;;  %v2257_v45 = vld [vmem:[%s4511_s4 + $0xf8] sm:$0xff] }
   0xf   : > { %3350 = vmatprep.subr.bf16.mxu0 %v3349_v17  ;;  %v3365_v43 = vpack.c.bf16 %v2303_v41, %v2302_v40  ;;  %v2304_v46 = vld [vmem:[%s4511_s4 + $0x270] sm:$0xff]  ;;  %v2305_v47 = vld [vmem:[%s4511_s4 + $0x278] sm:$0xff]  ;;  %v3241_v48 = vpack.c.bf16 %v2257_v45, %v2256_v44  ;;  %v349_v50 = vld [vmem:[%s4511_s4] sm:$0xff] }
  0x10   : > { %s3761_s13 = scalar_lea.vmem %s4508_s1, %s3743_s26  ;;  %s3767_s16 = scalar_lea.vmem %s4510_s3, %s3743_s26  ;;  %v3369_v49 = vpack.c.bf16 %v2305_v47, %v2304_v46  ;;  %v350_v51 = vld [vmem:[%s4511_s4 + $0x8] sm:$0xff]  ;;  %v2306_v52 = vld [vmem:[%s4511_s4 + $0x280] sm:$0xff]  ;;  %v351_v56 = vld [vmem:[%s4511_s4 + $0x10] sm:$0xff] }
  0x11   : > { %v365_v26 = vld [vmem:[%s3761_s13] sm:$0xff]  ;;  %3224 = vmatpush3.bf16.msra.mxu1 %v3221_v16  ;;  %v2307_v53 = vld [vmem:[%s4511_s4 + $0x288] sm:$0xff]  ;;  %v3245_v54 = vpack.c.bf16 %v350_v51, %v349_v50  ;;  %v352_v57 = vld [vmem:[%s4511_s4 + $0x18] sm:$0xff]  ;;  %s3983_s20 = scalar_lea.vmem %s4507_s0, %s3743_s26  ;;  %s4000_s7 = scalar_lea.vmem %s4509_s2, %s3743_s26 }
  0x12   : > { %2741 = vmatprep.mubr.f32.mxu1 %v365_v26  ;;  %v1076_v29 = vld [vmem:[%s3767_s16] sm:$0xff]  ;;  %3352 = vmatpush3.bf16.msra.mxu0 %v3349_v17  ;;  %v3373_v55 = vpack.c.bf16 %v2307_v53, %v2306_v52  ;;  %v3838_v58 = vld [vmem:[%s3761_s13 + $0x10] sm:$0xff]  ;;  %v2309_v60 = vld [vmem:[%s4511_s4 + $0x298] sm:$0xff]  ;;  %v3249_v63 = vpack.c.bf16 %v352_v57, %v351_v56 }
  0x13   : > { %2965 = vmatprep.mubr.f32.mxu0 %v1076_v29  ;;  %3226 = vmatprep.subr.bf16.mxu1 %v3225_v22  ;;  %v2308_v59 = vld [vmem:[%s4511_s4 + $0x290] sm:$0xff]  ;;  %v3848_v62 = vld [vmem:[%s3761_s13 + $0x20] sm:$0xff]  ;;  %v354_v3 = vld [vmem:[%s4511_s4 + $0x28] sm:$0xff] }
  0x14   : > { %3354 = vmatprep.subr.bf16.mxu0 %v3353_v23  ;;  %v1077_v61 = vld [vmem:[%s3767_s16 + $0x10] sm:$0xff]  ;;  %v1078_v0 = vld [vmem:[%s3767_s16 + $0x20] sm:$0xff]  ;;  %v3377_v1 = vpack.c.bf16 %v2309_v60, %v2308_v59  ;;  %v2311_v6 = vld [vmem:[%s4511_s4 + $0x2a8] sm:$0xff] }
  0x15   : > { %3228 = vmatpush3.bf16.msra.mxu1 %v3225_v22  ;;  %v353_v2 = vld [vmem:[%s4511_s4 + $0x20] sm:$0xff]  ;;  %v3859_v4 = vld [vmem:[%s3761_s13 + $0x30] sm:$0xff]  ;;  %v356_v13 = vld [vmem:[%s4511_s4 + $0x38] sm:$0xff] }
  0x16   : > { %3356 = vmatpush3.bf16.msra.mxu0 %v3353_v23  ;;  %3230 = vmatprep.subr.bf16.mxu1 %v3229_v30  ;;  %v2310_v5 = vld [vmem:[%s4511_s4 + $0x2a0] sm:$0xff]  ;;  %v1079_v7 = vld [vmem:[%s3767_s16 + $0x30] sm:$0xff]  ;;  %v3253_v9 = vpack.c.bf16 %v354_v3, %v353_v2  ;;  %v2313_v16 = vld [vmem:[%s4511_s4 + $0x2b8] sm:$0xff] }
  0x17   : > { %3358 = vmatprep.subr.bf16.mxu0 %v3357_v31  ;;  %v3870_v8 = vld [vmem:[%s3761_s13 + $0x40] sm:$0xff]  ;;  %v3381_v11 = vpack.c.bf16 %v2311_v6, %v2310_v5  ;;  %v355_v12 = vld [vmem:[%s4511_s4 + $0x30] sm:$0xff]  ;;  %v358_v23 = vld [vmem:[%s4511_s4 + $0x48] sm:$0xff] }
  0x18   : > { %v1080_v10 = vld [vmem:[%s3767_s16 + $0x40] sm:$0xff]  ;;  %v3881_v14 = vld [vmem:[%s3761_s13 + $0x50] sm:$0xff]  ;;  %v3257_v19 = vpack.c.bf16 %v356_v13, %v355_v12  ;;  %v2315_v26 = vld [vmem:[%s4511_s4 + $0x2c8] sm:$0xff] }
  0x19   : > { %3232 = vmatpush3.bf16.msra.mxu1 %v3229_v30  ;;  %v2312_v15 = vld [vmem:[%s4511_s4 + $0x2b0] sm:$0xff]  ;;  %v3892_v18 = vld [vmem:[%s3761_s13 + $0x60] sm:$0xff]  ;;  %v360_v33 = vld [vmem:[%s4511_s4 + $0x58] sm:$0xff] }
  0x1a   : > { %3360 = vmatpush3.bf16.msra.mxu0 %v3357_v31  ;;  %3234 = vmatprep.subr.bf16.mxu1 %v3233_v36  ;;  %v1081_v17 = vld [vmem:[%s3767_s16 + $0x50] sm:$0xff]  ;;  %v1082_v20 = vld [vmem:[%s3767_s16 + $0x60] sm:$0xff]  ;;  %v3385_v21 = vpack.c.bf16 %v2313_v16, %v2312_v15  ;;  %v2319_v46 = vld [vmem:[%s4511_s4 + $0x2e8] sm:$0xff] }
  0x1b   : > { %3362 = vmatprep.subr.bf16.mxu0 %v3361_v37  ;;  %v357_v22 = vld [vmem:[%s4511_s4 + $0x40] sm:$0xff]  ;;  %v3903_v24 = vld [vmem:[%s3761_s13 + $0x70] sm:$0xff]  ;;  %v364_v53 = vld [vmem:[%s4511_s4 + $0x78] sm:$0xff] }
  0x1c   : > { %v2314_v25 = vld [vmem:[%s4511_s4 + $0x2c0] sm:$0xff]  ;;  %v1083_v27 = vld [vmem:[%s3767_s16 + $0x70] sm:$0xff]  ;;  %v3261_v29 = vpack.c.bf16 %v358_v23, %v357_v22  ;;  %v2321_v56 = vld [vmem:[%s4511_s4 + $0x2f8] sm:$0xff] }
  0x1d   : > { %3236 = vmatpush3.bf16.msra.mxu1 %v3233_v36  ;;  %v373_v28 = vld [vmem:[%s3761_s13 + $0x90] sm:$0xff]  ;;  %v3389_v31 = vpack.c.bf16 %v2315_v26, %v2314_v25  ;;  %v3923_v34 = vld [vmem:[%s3761_s13 + $0xa0] sm:$0xff]  ;;  %v2317_v36 = vld [vmem:[%s4511_s4 + $0x2d8] sm:$0xff] }
  0x1e   : > { %3364 = vmatpush3.bf16.msra.mxu0 %v3361_v37  ;;  %3238 = vmatprep.subr.bf16.mxu1 %v3237_v42  ;;  %v1084_v30 = vld [vmem:[%s3767_s16 + $0x90] sm:$0xff]  ;;  %v1085_v37 = vld [vmem:[%s3767_s16 + $0xa0] sm:$0xff]  ;;  %v2339_v5 = vld [vmem:[%s4511_s4 + $0x308] sm:$0xff] }
  0x1f   : > { %3366 = vmatprep.subr.bf16.mxu0 %v3365_v43  ;;  %v359_v32 = vld [vmem:[%s4511_s4 + $0x50] sm:$0xff]  ;;  %v3944_v44 = vld [vmem:[%s3761_s13 + $0xc0] sm:$0xff]  ;;  %v2261_v13 = vld [vmem:[%s4511_s4 + $0x118] sm:$0xff] }
  0x20   : > { %v2316_v35 = vld [vmem:[%s4511_s4 + $0x2d0] sm:$0xff]  ;;  %v3265_v39 = vpack.c.bf16 %v360_v33, %v359_v32  ;;  %v2318_v45 = vld [vmem:[%s4511_s4 + $0x2e0] sm:$0xff]  ;;  %v2263_v26 = vld [vmem:[%s4511_s4 + $0x128] sm:$0xff] }
  0x21   : > { %3240 = vmatpush3.bf16.msra.mxu1 %v3237_v42  ;;  %v3933_v38 = vld [vmem:[%s3761_s13 + $0xb0] sm:$0xff]  ;;  %v3393_v41 = vpack.c.bf16 %v2317_v36, %v2316_v35  ;;  %v361_v42 = vld [vmem:[%s4511_s4 + $0x60] sm:$0xff]  ;;  %v3397_v51 = vpack.c.bf16 %v2319_v46, %v2318_v45 }
  0x22   : > { %3368 = vmatpush3.bf16.msra.mxu0 %v3365_v43  ;;  %3242 = vmatprep.subr.bf16.mxu1 %v3241_v48  ;;  %v1086_v40 = vld [vmem:[%s3767_s16 + $0xb0] sm:$0xff]  ;;  %v362_v43 = vld [vmem:[%s4511_s4 + $0x68] sm:$0xff]  ;;  %v1087_v47 = vld [vmem:[%s3767_s16 + $0xc0] sm:$0xff] }
  0x23   : > { %3370 = vmatprep.subr.bf16.mxu0 %v3369_v49  ;;  %v1088_v50 = vld [vmem:[%s3767_s16 + $0xd0] sm:$0xff]  ;;  %v1089_v57 = vld [vmem:[%s3767_s16 + $0xe0] sm:$0xff] }
  0x24   : > { %v363_v52 = vld [vmem:[%s4511_s4 + $0x70] sm:$0xff]  ;;  %v3994_v2 = vld [vmem:[%s3761_s13 + $0x100] sm:$0xff] }
  0x25   : > { %3244 = vmatpush3.bf16.msra.mxu1 %v3241_v48  ;;  %v3955_v48 = vld [vmem:[%s3761_s13 + $0xd0] sm:$0xff]  ;;  %v3273_v60 = vpack.c.bf16 %v364_v53, %v363_v52  ;;  %v2338_v3 = vld [vmem:[%s4511_s4 + $0x300] sm:$0xff]  ;;  %v2347_v53 = vld [vmem:[%s4511_s4 + $0x348] sm:$0xff] }
  0x26   : > { %3372 = vmatpush3.bf16.msra.mxu0 %v3369_v49  ;;  %3246 = vmatprep.subr.bf16.mxu1 %v3245_v54  ;;  %v3269_v49 = vpack.c.bf16 %v362_v43, %v361_v42  ;;  %v3977_v59 = vld [vmem:[%s3761_s13 + $0xf0] sm:$0xff]  ;;  %v1091_v6 = vld [vmem:[%s3767_s16 + $0x100] sm:$0xff] }
  0x27   : > { %3374 = vmatprep.subr.bf16.mxu0 %v3373_v55  ;;  %v2260_v12 = vld [vmem:[%s4511_s4 + $0x110] sm:$0xff]  ;;  %v1272_v22 = vld [vmem:[%s4000_s7 + $0x21] sm:$0xff] }
  0x28   : > { %2742 = vmatmul.mubr.f32.vlgmr.msra.gmra.mrb[0].mxu1 %v3838_v58  ;;  %v4020_v15 = vld [vmem:[%s3983_s20 + $0x10] sm:$0xff]  ;;  %v2262_v25 = vld [vmem:[%s4511_s4 + $0x120] sm:$0xff] }
  0x29   : > { %2966 = vmatmul.mubr.f32.vlgmr.msra.gmra.mrb[0].mxu0 %v1077_v61  ;;  %3248 = vmatpush3.bf16.msra.mxu1 %v3245_v54  ;;  %v3966_v54 = vld [vmem:[%s3761_s13 + $0xe0] sm:$0xff]  ;;  %v1090_v61 = vld [vmem:[%s3767_s16 + $0xf0] sm:$0xff]  ;;  %v3285_v32 = vpack.c.bf16 %v2263_v26, %v2262_v25 }
  0x2a   : > { %3376 = vmatpush3.bf16.msra.mxu0 %v3373_v55  ;;  %2744 = vmatprep.mubr.f32.mxu1 %v3848_v62  ;;  %v2320_v55 = vld [vmem:[%s4511_s4 + $0x2f0] sm:$0xff]  ;;  %v1274_v33 = vld [vmem:[%s4000_s7 + $0x41] sm:$0xff] }
  0x2b   : > { %2968 = vmatprep.mubr.f32.mxu0 %v1078_v0  ;;  %3250 = vmatprep.subr.bf16.mxu1 %v3249_v63  ;;  %v2258_v0 = vld [vmem:[%s4511_s4 + $0x100] sm:$0xff]  ;;  %v2340_v16 = vld [vmem:[%s4511_s4 + $0x310] sm:$0xff] }
  0x2c   : > { %2745 = vmatmul.mubr.f32.gmra.mrb[2].mxu1 %v3859_v4  ;;  %3378 = vmatprep.subr.bf16.mxu0 %v3377_v1  ;;  %v2264_v36 = vld [vmem:[%s4511_s4 + $0x130] sm:$0xff]  ;;  %v4074_v43 = vld [vmem:[%s3983_s20 + $0x60] sm:$0xff] }
  0x2d   : > { %2969 = vmatmul.mubr.f32.gmra.mrb[2].mxu0 %v1079_v7  ;;  %3252 = vmatpush3.bf16.msra.mxu1 %v3249_v63  ;;  %v3401_v63 = vpack.c.bf16 %v2321_v56, %v2320_v55  ;;  %v333_v7 = vld [vmem:[%s3983_s20] sm:$0xff]  ;;  %v1275_v42 = vld [vmem:[%s4000_s7 + $0x51] sm:$0xff] }
  0x2e   : > { %3380 = vmatpush3.bf16.msra.mxu0 %v3377_v1  ;;  %2747 = vmatprep.mubr.f32.mxu1 %v3870_v8  ;;  %v2259_v1 = vld [vmem:[%s4511_s4 + $0x108] sm:$0xff]  ;;  %v2346_v52 = vld [vmem:[%s4511_s4 + $0x340] sm:$0xff]  ;;  %v1277_v55 = vld [vmem:[%s4000_s7 + $0x71] sm:$0xff] }
  0x2f   : > { %2971 = vmatprep.mubr.f32.mxu0 %v1080_v10  ;;  %3254 = vmatprep.subr.bf16.mxu1 %v3253_v9  ;;  %v1270_v10 = vld [vmem:[%s4000_s7 + $0x1] sm:$0xff]  ;;  %v341_v56 = vld [vmem:[%s3983_s20 + $0x90] sm:$0xff] }
  0x30   : > { %2748 = vmatmul.mubr.f32.gmra.mrb[4].mxu1 %v3881_v14  ;;  %3382 = vmatprep.subr.bf16.mxu0 %v3381_v11  ;;  %v1276_v46 = vld [vmem:[%s4000_s7 + $0x61] sm:$0xff]  ;;  %v1282_v25 = vld [vmem:[%s4000_s7 + $0xd1] sm:$0xff] }
  0x31   : > { %2972 = vmatmul.mubr.f32.gmra.mrb[4].mxu0 %v1081_v17  ;;  %3256 = vmatpush3.bf16.msra.mxu1 %v3253_v9  ;;  %v3277_v9 = vpack.c.bf16 %v2259_v1, %v2258_v0  ;;  %v2341_v17 = vld [vmem:[%s4511_s4 + $0x318] sm:$0xff]  ;;  %v4105_v1 = vld [vmem:[%s3983_s20 + $0xa0] sm:$0xff] }
  0x32   : > { %3384 = vmatpush3.bf16.msra.mxu0 %v3381_v11  ;;  %2750 = vmatprep.mubr.f32.mxu1 %v3892_v18  ;;  %v3405_v11 = vpack.c.bf16 %v2339_v5, %v2338_v3  ;;  %v3409_v23 = vpack.c.bf16 %v2341_v17, %v2340_v16  ;;  %v2269_v0 = vld [vmem:[%s4511_s4 + $0x158] sm:$0xff]  ;;  %v2348_v3 = vld [vmem:[%s4511_s4 + $0x350] sm:$0xff]  ;;  %v4126_v16 = vld [vmem:[%s3983_s20 + $0xc0] sm:$0xff] }
  0x33   : > { %2974 = vmatprep.mubr.f32.mxu0 %v1082_v20  ;;  %3258 = vmatprep.subr.bf16.mxu1 %v3257_v19  ;;  %v4030_v20 = vld [vmem:[%s3983_s20 + $0x20] sm:$0xff]  ;;  %v2349_v5 = vld [vmem:[%s4511_s4 + $0x358] sm:$0xff] }
  0x34   : > { %2751 = vmatmul.mubr.f32.gmra.mrb[6].mxu1 %v3903_v24  ;;  %3386 = vmatprep.subr.bf16.mxu0 %v3385_v21  ;;  %v2350_v17 = vld [vmem:[%s4511_s4 + $0x360] sm:$0xff] }
  0x35   : > { %2975 = vmatmul.mubr.f32.gmra.mrb[6].mxu0 %v1083_v27  ;;  %3260 = vmatpush3.bf16.msra.mxu1 %v3257_v19  ;;  %v1271_v19 = vld [vmem:[%s4000_s7 + $0x11] sm:$0xff] }
  0x36   : > { %3388 = vmatpush3.bf16.msra.mxu0 %v3385_v21  ;;  %2753 = vmatprep.mubr.f32.mxu1 %v373_v28  ;;  %v3281_v21 = vpack.c.bf16 %v2261_v13, %v2260_v12  ;;  %v4041_v27 = vld [vmem:[%s3983_s20 + $0x30] sm:$0xff]  ;;  %v2342_v28 = vld [vmem:[%s4511_s4 + $0x320] sm:$0xff]  ;;  %v2271_v13 = vld [vmem:[%s4511_s4 + $0x168] sm:$0xff] }
  0x37   : > { %2977 = vmatprep.mubr.f32.mxu0 %v1084_v30  ;;  %3262 = vmatprep.subr.bf16.mxu1 %v3261_v29  ;;  %v1273_v30 = vld [vmem:[%s4000_s7 + $0x31] sm:$0xff]  ;;  %v2270_v12 = vld [vmem:[%s4511_s4 + $0x160] sm:$0xff] }
  0x38   : > { %2754 = vmatmul.mubr.f32.gmra.mrb[8].mxu1 %v3923_v34  ;;  %3390 = vmatprep.subr.bf16.mxu0 %v3389_v31 }
  0x39   : > { %2978 = vmatmul.mubr.f32.gmra.mrb[8].mxu0 %v1085_v37  ;;  %3264 = vmatpush3.bf16.msra.mxu1 %v3261_v29  ;;  %v2343_v29 = vld [vmem:[%s4511_s4 + $0x328] sm:$0xff]  ;;  %v2265_v37 = vld [vmem:[%s4511_s4 + $0x138] sm:$0xff] }
  0x3a   : > { %3392 = vmatpush3.bf16.msra.mxu0 %v3389_v31  ;;  %2756 = vmatprep.mubr.f32.mxu1 %v3933_v38  ;;  %v4052_v31 = vld [vmem:[%s3983_s20 + $0x40] sm:$0xff]  ;;  %v3413_v35 = vpack.c.bf16 %v2343_v29, %v2342_v28  ;;  %v3289_v45 = vpack.c.bf16 %v2265_v37, %v2264_v36  ;;  %v2272_v28 = vld [vmem:[%s4511_s4 + $0x170] sm:$0xff]  ;;  %v2273_v29 = vld [vmem:[%s4511_s4 + $0x178] sm:$0xff] }
  0x3b   : > { %2980 = vmatprep.mubr.f32.mxu0 %v1086_v40  ;;  %3266 = vmatprep.subr.bf16.mxu1 %v3265_v39  ;;  %v2344_v40 = vld [vmem:[%s4511_s4 + $0x330] sm:$0xff]  ;;  %v3305_v37 = vpack.c.bf16 %v2273_v29, %v2272_v28  ;;  %v2282_v28 = vld [vmem:[%s4511_s4 + $0x1c0] sm:$0xff]  ;;  %v2283_v29 = vld [vmem:[%s4511_s4 + $0x1c8] sm:$0xff] }
  0x3c   : > { %2757 = vmatmul.mubr.f32.gmra.mrb[10].mxu1 %v3944_v44  ;;  %3394 = vmatprep.subr.bf16.mxu0 %v3393_v41  ;;  %v4159_v36 = vld [vmem:[%s3983_s20 + $0xf0] sm:$0xff] }
  0x3d   : > { %2981 = vmatmul.mubr.f32.gmra.mrb[10].mxu0 %v1087_v47  ;;  %3268 = vmatpush3.bf16.msra.mxu1 %v3265_v39  ;;  %v4063_v39 = vld [vmem:[%s3983_s20 + $0x50] sm:$0xff] }
  0x3e   : > { %3396 = vmatpush3.bf16.msra.mxu0 %v3393_v41  ;;  %2759 = vmatprep.mubr.f32.mxu1 %v3955_v48  ;;  %v2345_v41 = vld [vmem:[%s4511_s4 + $0x338] sm:$0xff] }
  0x3f   : > { %2983 = vmatprep.mubr.f32.mxu0 %v1088_v50  ;;  %3270 = vmatprep.subr.bf16.mxu1 %v3269_v49  ;;  %v3417_v47 = vpack.c.bf16 %v2345_v41, %v2344_v40  ;;  %v2267_v50 = vld [vmem:[%s4511_s4 + $0x148] sm:$0xff]  ;;  %v1284_v40 = vld [vmem:[%s4000_s7 + $0xf1] sm:$0xff] }
  0x40   : > { %2760 = vmatmul.mubr.f32.gmra.mrb[12].mxu1 %v3966_v54  ;;  %3398 = vmatprep.subr.bf16.mxu0 %v3397_v51 }
  0x41   : > { %2984 = vmatmul.mubr.f32.gmra.mrb[12].mxu0 %v1089_v57  ;;  %3272 = vmatpush3.bf16.msra.mxu1 %v3269_v49  ;;  %v2266_v49 = vld [vmem:[%s4511_s4 + $0x140] sm:$0xff] }
  0x42   : > { %3400 = vmatpush3.bf16.msra.mxu0 %v3397_v51  ;;  %2762 = vmatprep.mubr.f32.mxu1 %v3977_v59  ;;  %v4085_v51 = vld [vmem:[%s3983_s20 + $0x70] sm:$0xff]  ;;  %v3293_v57 = vpack.c.bf16 %v2267_v50, %v2266_v49  ;;  %v2371_v49 = vld [vmem:[%s4511_s4 + $0x388] sm:$0xff] }
  0x43   : > { %2986 = vmatprep.mubr.f32.mxu0 %v1090_v61  ;;  %3274 = vmatprep.subr.bf16.mxu1 %v3273_v60  ;;  %v3421_v61 = vpack.c.bf16 %v2347_v53, %v2346_v52  ;;  %v1285_v50 = vld [vmem:[%s4000_s7 + $0x101] sm:$0xff] }
  0x44   : > { %2763 = vmatmul.mubr.f32.gmra.mrb[14].mxu1 %v3994_v2  ;;  %3402 = vmatprep.subr.bf16.mxu0 %v3401_v63  ;;  %v688_v52 = vld [vmem:[%s3983_s20 + $0x1] sm:$0xff] }
  0x45   : > { %2987 = vmatmul.mubr.f32.gmra.mrb[14].mxu0 %v1091_v6  ;;  %3276 = vmatpush3.bf16.msra.mxu1 %v3273_v60  ;;  %v1278_v60 = vld [vmem:[%s4000_s7 + $0x91] sm:$0xff]  ;;  %v1279_v6 = vld [vmem:[%s4000_s7 + $0xa1] sm:$0xff] }
  0x46   : > { %3404 = vmatpush3.bf16.msra.mxu0 %v3401_v63  ;;  %2797 = vmatprep.mubr.f32.mxu1 %v333_v7  ;;  %v2268_v63 = vld [vmem:[%s4511_s4 + $0x150] sm:$0xff] }
  0x47   : > { %3021 = vmatprep.mubr.f32.mxu0 %v1270_v10  ;;  %3278 = vmatprep.subr.bf16.mxu1 %v3277_v9  ;;  %v4115_v7 = vld [vmem:[%s3983_s20 + $0xb0] sm:$0xff] }
  0x48   : > { %2798 = vmatmul.mubr.f32.vlgmr.msra.gmra.mrb[0].mxu1 %v4020_v15  ;;  %3406 = vmatprep.subr.bf16.mxu0 %v3405_v11  ;;  %v1280_v10 = vld [vmem:[%s4000_s7 + $0xb1] sm:$0xff] }
  0x49   : > { %3022 = vmatmul.mubr.f32.vlgmr.msra.gmra.mrb[0].mxu0 %v1271_v19  ;;  %3280 = vmatpush3.bf16.msra.mxu1 %v3277_v9  ;;  %v3297_v9 = vpack.c.bf16 %v2269_v0, %v2268_v63  ;;  %v2351_v19 = vld [vmem:[%s4511_s4 + $0x368] sm:$0xff]  ;;  %v2373_v63 = vld [vmem:[%s4511_s4 + $0x398] sm:$0xff] }
  0x4a   : > { %3408 = vmatpush3.bf16.msra.mxu0 %v3405_v11  ;;  %2800 = vmatprep.mubr.f32.mxu1 %v4030_v20  ;;  %v3425_v11 = vpack.c.bf16 %v2349_v5, %v2348_v3  ;;  %v3429_v26 = vpack.c.bf16 %v2351_v19, %v2350_v17  ;;  %v4199_v0 = vld [vmem:[%s3983_s20 + $0x21] sm:$0xff]  ;;  %v2280_v17 = vld [vmem:[%s4511_s4 + $0x1b0] sm:$0xff]  ;;  %v2281_v19 = vld [vmem:[%s4511_s4 + $0x1b8] sm:$0xff] }
  0x4b   : > { %3024 = vmatprep.mubr.f32.mxu0 %v1272_v22  ;;  %3282 = vmatprep.subr.bf16.mxu1 %v3281_v21  ;;  %v4137_v22 = vld [vmem:[%s3983_s20 + $0xd0] sm:$0xff] }
  0x4c   : > { %2801 = vmatmul.mubr.f32.gmra.mrb[2].mxu1 %v4041_v27  ;;  %3410 = vmatprep.subr.bf16.mxu0 %v3409_v23 }
  0x4d   : > { %3025 = vmatmul.mubr.f32.gmra.mrb[2].mxu0 %v1273_v30  ;;  %3284 = vmatpush3.bf16.msra.mxu1 %v3281_v21  ;;  %v1281_v21 = vld [vmem:[%s4000_s7 + $0xc1] sm:$0xff] }
  0x4e   : > { %3412 = vmatpush3.bf16.msra.mxu0 %v3409_v23  ;;  %2803 = vmatprep.mubr.f32.mxu1 %v4052_v31  ;;  %v3301_v23 = vpack.c.bf16 %v2271_v13, %v2270_v12  ;;  %v4148_v30 = vld [vmem:[%s3983_s20 + $0xe0] sm:$0xff] }
  0x4f   : > { %3027 = vmatprep.mubr.f32.mxu0 %v1274_v33  ;;  %3286 = vmatprep.subr.bf16.mxu1 %v3285_v32  ;;  %v2353_v33 = vld [vmem:[%s4511_s4 + $0x378] sm:$0xff]  ;;  %v4221_v12 = vld [vmem:[%s3983_s20 + $0x41] sm:$0xff] }
  0x50   : > { %2804 = vmatmul.mubr.f32.gmra.mrb[4].mxu1 %v4063_v39  ;;  %3414 = vmatprep.subr.bf16.mxu0 %v3413_v35 }
  0x51   : > { %3028 = vmatmul.mubr.f32.gmra.mrb[4].mxu0 %v1275_v42  ;;  %3288 = vmatpush3.bf16.msra.mxu1 %v3285_v32  ;;  %v2352_v32 = vld [vmem:[%s4511_s4 + $0x370] sm:$0xff]  ;;  %v2274_v42 = vld [vmem:[%s4511_s4 + $0x180] sm:$0xff] }
  0x52   : > { %3416 = vmatpush3.bf16.msra.mxu0 %v3413_v35  ;;  %2806 = vmatprep.mubr.f32.mxu1 %v4074_v43  ;;  %v1283_v35 = vld [vmem:[%s4000_s7 + $0xe1] sm:$0xff]  ;;  %v3433_v41 = vpack.c.bf16 %v2353_v33, %v2352_v32 }
  0x53   : > { %3030 = vmatprep.mubr.f32.mxu0 %v1276_v46  ;;  %3290 = vmatprep.subr.bf16.mxu1 %v3289_v45  ;;  %v4170_v46 = vld [vmem:[%s3983_s20 + $0x100] sm:$0xff]  ;;  %v2379_v33 = vld [vmem:[%s4511_s4 + $0x3c8] sm:$0xff] }
  0x54   : > { %2807 = vmatmul.mubr.f32.gmra.mrb[6].mxu1 %v4085_v51  ;;  %3418 = vmatprep.subr.bf16.mxu0 %v3417_v47  ;;  %v2378_v32 = vld [vmem:[%s4511_s4 + $0x3c0] sm:$0xff] }
  0x55   : > { %3031 = vmatmul.mubr.f32.gmra.mrb[6].mxu0 %v1277_v55  ;;  %3292 = vmatpush3.bf16.msra.mxu1 %v3289_v45  ;;  %v2275_v45 = vld [vmem:[%s4511_s4 + $0x188] sm:$0xff] }
  0x56   : > { %3420 = vmatpush3.bf16.msra.mxu0 %v3417_v47  ;;  %2809 = vmatprep.mubr.f32.mxu1 %v341_v56  ;;  %v2370_v47 = vld [vmem:[%s4511_s4 + $0x380] sm:$0xff]  ;;  %v3309_v53 = vpack.c.bf16 %v2275_v45, %v2274_v42  ;;  %v2276_v56 = vld [vmem:[%s4511_s4 + $0x190] sm:$0xff]  ;;  %v2285_v42 = vld [vmem:[%s4511_s4 + $0x1d8] sm:$0xff] }
  0x57   : > { %3033 = vmatprep.mubr.f32.mxu0 %v1278_v60  ;;  %3294 = vmatprep.subr.bf16.mxu1 %v3293_v57  ;;  %v3437_v55 = vpack.c.bf16 %v2371_v49, %v2370_v47  ;;  %v4189_v60 = vld [vmem:[%s3983_s20 + $0x11] sm:$0xff]  ;;  %v4274_v45 = vld [vmem:[%s3983_s20 + $0xa1] sm:$0xff] }
  0x58   : > { %2810 = vmatmul.mubr.f32.gmra.mrb[8].mxu1 %v4105_v1  ;;  %3422 = vmatprep.subr.bf16.mxu0 %v3421_v61  ;;  %v2381_v47 = vld [vmem:[%s4511_s4 + $0x3d8] sm:$0xff] }
  0x59   : > { %3034 = vmatmul.mubr.f32.gmra.mrb[8].mxu0 %v1279_v6  ;;  %3296 = vmatpush3.bf16.msra.mxu1 %v3293_v57  ;;  %v2277_v57 = vld [vmem:[%s4511_s4 + $0x198] sm:$0xff]  ;;  %v2278_v6 = vld [vmem:[%s4511_s4 + $0x1a0] sm:$0xff] }
  0x5a   : > { %3424 = vmatpush3.bf16.msra.mxu0 %v3421_v61  ;;  %2812 = vmatprep.mubr.f32.mxu1 %v4115_v7  ;;  %v2372_v61 = vld [vmem:[%s4511_s4 + $0x390] sm:$0xff]  ;;  %v3313_v3 = vpack.c.bf16 %v2277_v57, %v2276_v56  ;;  %v2382_v56 = vld [vmem:[%s4511_s4 + $0x3e0] sm:$0xff]  ;;  %v2383_v57 = vld [vmem:[%s4511_s4 + $0x3e8] sm:$0xff] }
  0x5b   : > { %3036 = vmatprep.mubr.f32.mxu0 %v1280_v10  ;;  %3298 = vmatprep.subr.bf16.mxu1 %v3297_v9  ;;  %v3441_v5 = vpack.c.bf16 %v2373_v63, %v2372_v61  ;;  %v2374_v10 = vld [vmem:[%s4511_s4 + $0x3a0] sm:$0xff]  ;;  %v4284_v49 = vld [vmem:[%s3983_s20 + $0xb1] sm:$0xff]  ;;  %v3461_v63 = vpack.c.bf16 %v2383_v57, %v2382_v56 }
  0x5c   : > { %2813 = vmatmul.mubr.f32.gmra.mrb[10].mxu1 %v4126_v16  ;;  %3426 = vmatprep.subr.bf16.mxu0 %v3425_v11  ;;  %v4306_v61 = vld [vmem:[%s3983_s20 + $0xd1] sm:$0xff]  ;;  %v893_v56 = vld [vmem:[%s4000_s7 + $0xc0] sm:$0xff] }
  0x5d   : > { %3037 = vmatmul.mubr.f32.gmra.mrb[10].mxu0 %v1281_v21  ;;  %3300 = vmatpush3.bf16.msra.mxu1 %v3297_v9  ;;  %v2279_v9 = vld [vmem:[%s4511_s4 + $0x1a8] sm:$0xff]  ;;  %v2376_v21 = vld [vmem:[%s4511_s4 + $0x3b0] sm:$0xff] }
  0x5e   : > { %3428 = vmatpush3.bf16.msra.mxu0 %v3425_v11  ;;  %2815 = vmatprep.mubr.f32.mxu1 %v4137_v22  ;;  %v2375_v11 = vld [vmem:[%s4511_s4 + $0x3a8] sm:$0xff] }
  0x5f   : > { %3039 = vmatprep.mubr.f32.mxu0 %v1282_v25  ;;  %3302 = vmatprep.subr.bf16.mxu1 %v3301_v23  ;;  %v3445_v13 = vpack.c.bf16 %v2375_v11, %v2374_v10  ;;  %v3321_v25 = vpack.c.bf16 %v2281_v19, %v2280_v17  ;;  %v2337_v17 = vld [vmem:[%s3983_s20 + $0x110] sm:$0xff]  ;;  %v882_v19 = vld [vmem:[%s4000_s7] sm:$0xff] }
  0x60   : > { %2816 = vmatmul.mubr.f32.gmra.mrb[12].mxu1 %v4148_v30  ;;  %3430 = vmatprep.subr.bf16.mxu0 %v3429_v26 }
  0x61   : > { %3040 = vmatmul.mubr.f32.gmra.mrb[12].mxu0 %v1283_v35  ;;  %3304 = vmatpush3.bf16.msra.mxu1 %v3301_v23  ;;  %v2377_v23 = vld [vmem:[%s4511_s4 + $0x3b8] sm:$0xff]  ;;  %v2329_v35 = vld [vmem:[%s3983_s20 + $0x80] sm:$0xff] }
  0x62   : > { %3432 = vmatpush3.bf16.msra.mxu0 %v3429_v26  ;;  %2818 = vmatprep.mubr.f32.mxu1 %v4159_v36  ;;  %v3449_v26 = vpack.c.bf16 %v2377_v23, %v2376_v21  ;;  %v2405_v23 = vld [vmem:[%s4511_s4 + $0x418] sm:$0xff] }
  0x63   : > { %3042 = vmatprep.mubr.f32.mxu0 %v1284_v40  ;;  %3306 = vmatprep.subr.bf16.mxu1 %v3305_v37  ;;  %v3453_v40 = vpack.c.bf16 %v2379_v33, %v2378_v32  ;;  %v885_v32 = vld [vmem:[%s4000_s7 + $0x30] sm:$0xff] }
  0x64   : > { %2819 = vmatmul.mubr.f32.gmra.mrb[14].mxu1 %v4170_v46  ;;  %3434 = vmatprep.subr.bf16.mxu0 %v3433_v41 }
  0x65   : > { %3043 = vmatmul.mubr.f32.gmra.mrb[14].mxu0 %v1285_v50  ;;  %3308 = vmatpush3.bf16.msra.mxu1 %v3305_v37  ;;  %v3325_v37 = vpack.c.bf16 %v2283_v29, %v2282_v28  ;;  %v2406_v28 = vld [vmem:[%s4511_s4 + $0x420] sm:$0xff]  ;;  %v2407_v29 = vld [vmem:[%s4511_s4 + $0x428] sm:$0xff] }
  0x66   : > { %3436 = vmatpush3.bf16.msra.mxu0 %v3433_v41  ;;  %2853 = vmatprep.mubr.f32.mxu1 %v688_v52  ;;  %v2284_v41 = vld [vmem:[%s4511_s4 + $0x1d0] sm:$0xff]  ;;  %v3477_v33 = vpack.c.bf16 %v2407_v29, %v2406_v28 }
  0x67   : > { %3077 = vmatprep.mubr.f32.mxu0 %v4020_v15  ;;  %3310 = vmatprep.subr.bf16.mxu1 %v3309_v53  ;;  %v4210_v15 = vld [vmem:[%s3983_s20 + $0x31] sm:$0xff]  ;;  %v3329_v50 = vpack.c.bf16 %v2285_v42, %v2284_v41 }
  0x68   : > { %2854 = vmatmul.mubr.f32.vlgmr.msra.gmra.mrb[0].mxu1 %v4189_v60  ;;  %3438 = vmatprep.subr.bf16.mxu0 %v3437_v55  ;;  %v889_v41 = vld [vmem:[%s4000_s7 + $0x70] sm:$0xff] }
  0x69   : > { %3078 = vmatmul.mubr.f32.vlgmr.msra.gmra.mrb[0].mxu0 %v4030_v20  ;;  %3312 = vmatpush3.bf16.msra.mxu1 %v3309_v53  ;;  %v3317_v20 = vpack.c.bf16 %v2279_v9, %v2278_v6  ;;  %v2286_v53 = vld [vmem:[%s4511_s4 + $0x1e0] sm:$0xff]  ;;  %v2384_v6 = vld [vmem:[%s4511_s4 + $0x3f0] sm:$0xff]  ;;  %v2385_v9 = vld [vmem:[%s4511_s4 + $0x3f8] sm:$0xff] }
  0x6a   : > { %3440 = vmatpush3.bf16.msra.mxu0 %v3437_v55  ;;  %2856 = vmatprep.mubr.f32.mxu1 %v4199_v0  ;;  %v2287_v55 = vld [vmem:[%s4511_s4 + $0x1e8] sm:$0xff]  ;;  %v3465_v11 = vpack.c.bf16 %v2385_v9, %v2384_v6  ;;  %v890_v42 = vld [vmem:[%s4000_s7 + $0x90] sm:$0xff] }
  0x6b   : > { %3080 = vmatprep.mubr.f32.mxu0 %v4041_v27  ;;  %3314 = vmatprep.subr.bf16.mxu1 %v3313_v3  ;;  %v4232_v27 = vld [vmem:[%s3983_s20 + $0x51] sm:$0xff] }
  0x6c   : > { %2857 = vmatmul.mubr.f32.gmra.mrb[2].mxu1 %v4210_v15  ;;  %3442 = vmatprep.subr.bf16.mxu0 %v3441_v5  ;;  %v2369_v6 = vld [vmem:[%s3761_s13 + $0x110] sm:$0xff] }
  0x6d   : > { %3081 = vmatmul.mubr.f32.gmra.mrb[2].mxu0 %v4052_v31  ;;  %3316 = vmatpush3.bf16.msra.mxu1 %v3313_v3  ;;  %v4243_v31 = vld [vmem:[%s3983_s20 + $0x61] sm:$0xff]  ;;  %v2288_v3 = vld [vmem:[%s4511_s4 + $0x1f0] sm:$0xff] }
  0x6e   : > { %3444 = vmatpush3.bf16.msra.mxu0 %v3441_v5  ;;  %2859 = vmatprep.mubr.f32.mxu1 %v4221_v12  ;;  %v2289_v5 = vld [vmem:[%s4511_s4 + $0x1f8] sm:$0xff] }
  0x6f   : > { %3083 = vmatprep.mubr.f32.mxu0 %v4063_v39  ;;  %3318 = vmatprep.subr.bf16.mxu1 %v3317_v20  ;;  %v4254_v39 = vld [vmem:[%s3983_s20 + $0x71] sm:$0xff]  ;;  %v3337_v10 = vpack.c.bf16 %v2289_v5, %v2288_v3  ;;  %v897_v5 = vld [vmem:[%s4000_s7 + $0x100] sm:$0xff] }
  0x70   : > { %2860 = vmatmul.mubr.f32.gmra.mrb[4].mxu1 %v4232_v27  ;;  %3446 = vmatprep.subr.bf16.mxu0 %v3445_v13 }
  0x71   : > { %3084 = vmatmul.mubr.f32.gmra.mrb[4].mxu0 %v4074_v43  ;;  %3320 = vmatpush3.bf16.msra.mxu1 %v3317_v20  ;;  %v696_v43 = vld [vmem:[%s3983_s20 + $0x91] sm:$0xff]  ;;  %v2402_v20 = vld [vmem:[%s4511_s4 + $0x400] sm:$0xff] }
  0x72   : > { %3448 = vmatpush3.bf16.msra.mxu0 %v3445_v13  ;;  %2862 = vmatprep.mubr.f32.mxu1 %v4243_v31  ;;  %v2403_v13 = vld [vmem:[%s4511_s4 + $0x408] sm:$0xff] }
  0x73   : > { %3086 = vmatprep.mubr.f32.mxu0 %v4085_v51  ;;  %3322 = vmatprep.subr.bf16.mxu1 %v3321_v25  ;;  %v2380_v51 = vld [vmem:[%s4511_s4 + $0x3d0] sm:$0xff]  ;;  %v3469_v21 = vpack.c.bf16 %v2403_v13, %v2402_v20 }
  0x74   : > { %2863 = vmatmul.mubr.f32.gmra.mrb[6].mxu1 %v4254_v39  ;;  %3450 = vmatprep.subr.bf16.mxu0 %v3449_v26  ;;  %v3457_v52 = vpack.c.bf16 %v2381_v47, %v2380_v51  ;;  %v2412_v47 = vld [vmem:[%s4511_s4 + $0x450] sm:$0xff] }
  0x75   : > { %3087 = vmatmul.mubr.f32.gmra.mrb[6].mxu0 %v2329_v35  ;;  %3324 = vmatpush3.bf16.msra.mxu1 %v3321_v25  ;;  %v883_v25 = vld [vmem:[%s4000_s7 + $0x10] sm:$0xff] }
  0x76   : > { %3452 = vmatpush3.bf16.msra.mxu0 %v3449_v26  ;;  %2865 = vmatprep.mubr.f32.mxu1 %v696_v43  ;;  %v2408_v35 = vld [vmem:[%s4511_s4 + $0x430] sm:$0xff] }
  0x77   : > { %3089 = vmatprep.mubr.f32.mxu0 %v4105_v1  ;;  %3326 = vmatprep.subr.bf16.mxu1 %v3325_v37  ;;  %v4295_v1 = vld [vmem:[%s3983_s20 + $0xc1] sm:$0xff]  ;;  %v887_v43 = vld [vmem:[%s4000_s7 + $0x50] sm:$0xff] }
  0x78   : > { %2866 = vmatmul.mubr.f32.gmra.mrb[8].mxu1 %v4274_v45  ;;  %3454 = vmatprep.subr.bf16.mxu0 %v3453_v40 }
  0x79   : > { %3090 = vmatmul.mubr.f32.gmra.mrb[8].mxu0 %v4115_v7  ;;  %3328 = vmatpush3.bf16.msra.mxu1 %v3325_v37  ;;  %v3333_v7 = vpack.c.bf16 %v2287_v55, %v2286_v53  ;;  %v2414_v53 = vld [vmem:[%s4511_s4 + $0x460] sm:$0xff]  ;;  %v2415_v55 = vld [vmem:[%s4511_s4 + $0x468] sm:$0xff] }
  0x7a   : > { %3456 = vmatpush3.bf16.msra.mxu0 %v3453_v40  ;;  %2868 = vmatprep.mubr.f32.mxu1 %v4284_v49  ;;  %v2410_v40 = vld [vmem:[%s4511_s4 + $0x440] sm:$0xff]  ;;  %v3493_v57 = vpack.c.bf16 %v2415_v55, %v2414_v53 }
  0x7b   : > { %3092 = vmatprep.mubr.f32.mxu0 %v4126_v16  ;;  %3330 = vmatprep.subr.bf16.mxu1 %v3329_v50  ;;  %v4317_v16 = vld [vmem:[%s3983_s20 + $0xe1] sm:$0xff] }
  0x7c   : > { %2869 = vmatmul.mubr.f32.gmra.mrb[10].mxu1 %v4295_v1  ;;  %3458 = vmatprep.subr.bf16.mxu0 %v3457_v52 }
  0x7d   : > { %3093 = vmatmul.mubr.f32.gmra.mrb[10].mxu0 %v4137_v22  ;;  %3332 = vmatpush3.bf16.msra.mxu1 %v3329_v50  ;;  %v4328_v22 = vld [vmem:[%s3983_s20 + $0xf1] sm:$0xff]  ;;  %v891_v50 = vld [vmem:[%s4000_s7 + $0xa0] sm:$0xff] }
  0x7e   : > { %3460 = vmatpush3.bf16.msra.mxu0 %v3457_v52  ;;  %2871 = vmatprep.mubr.f32.mxu1 %v4306_v61 }
  0x7f   : > { %3095 = vmatprep.mubr.f32.mxu0 %v4148_v30  ;;  %3334 = vmatprep.subr.bf16.mxu1 %v3333_v7  ;;  %v4339_v30 = vld [vmem:[%s3983_s20 + $0x101] sm:$0xff] }
  0x80   : > { %2872 = vmatmul.mubr.f32.gmra.mrb[12].mxu1 %v4317_v16  ;;  %3462 = vmatprep.subr.bf16.mxu0 %v3461_v63 }
  0x81   : > { %3096 = vmatmul.mubr.f32.gmra.mrb[12].mxu0 %v4159_v36  ;;  %3336 = vmatpush3.bf16.msra.mxu1 %v3333_v7  ;;  %v2404_v36 = vld [vmem:[%s4511_s4 + $0x410] sm:$0xff] }
  0x82   : > { %3464 = vmatpush3.bf16.msra.mxu0 %v3461_v63  ;;  %2874 = vmatprep.mubr.f32.mxu1 %v4328_v22  ;;  %v3473_v26 = vpack.c.bf16 %v2405_v23, %v2404_v36  ;;  %v2416_v7 = vld [vmem:[%s4511_s4 + $0x470] sm:$0xff]  ;;  %v895_v63 = vld [vmem:[%s4000_s7 + $0xe0] sm:$0xff] }
  0x83   : > { %3098 = vmatprep.mubr.f32.mxu0 %v4170_v46  ;;  %3338 = vmatprep.subr.bf16.mxu1 %v3337_v10  ;;  %v884_v46 = vld [vmem:[%s4000_s7 + $0x20] sm:$0xff] }
  0x84   : > { %2875 = vmatmul.mubr.f32.gmra.mrb[14].mxu1 %v4339_v30  ;;  %3466 = vmatprep.subr.bf16.mxu0 %v3465_v11 }
  0x85   : > { %3099 = vmatmul.mubr.f32.gmra.mrb[14].mxu0 %v2337_v17  ;;  %3340 = vmatpush3.bf16.msra.mxu1 %v3337_v10 }
  0x86   : > { %3468 = vmatpush3.bf16.msra.mxu0 %v3465_v11  ;;  %2909 = vmatprep.mubr.f32.mxu1 %v882_v19 }
  0x87   : > { %3133 = vmatprep.mubr.f32.mxu0 %v3838_v58  ;;  %3470 = vmatprep.subr.bf16.mxu0 %v3469_v21  ;;  %v886_v58 = vld [vmem:[%s4000_s7 + $0x40] sm:$0xff] }
  0x88   : > { %2910 = vmatmul.mubr.f32.vlgmr.msra.gmra.mrb[0].mxu1 %v883_v25  ;;  %3501 = vmatprep.subr.bf16.mxu1 %v3469_v21 }
  0x89   : > { %3134 = vmatmul.mubr.f32.vlgmr.msra.gmra.mrb[0].mxu0 %v3848_v62  ;;  %3509 = vmatpush3.bf16.msra.mxu1 %v3469_v21  ;;  %v2409_v62 = vld [vmem:[%s4511_s4 + $0x438] sm:$0xff] }
  0x8a   : > { %3472 = vmatpush3.bf16.msra.mxu0 %v3469_v21  ;;  %2912 = vmatprep.mubr.f32.mxu1 %v884_v46  ;;  %v3481_v37 = vpack.c.bf16 %v2409_v62, %v2408_v35 }
  0x8b   : > { %3136 = vmatprep.mubr.f32.mxu0 %v3859_v4  ;;  %3474 = vmatprep.subr.bf16.mxu0 %v3473_v26  ;;  %v888_v4 = vld [vmem:[%s4000_s7 + $0x60] sm:$0xff] }
  0x8c   : > { %2913 = vmatmul.mubr.f32.gmra.mrb[2].mxu1 %v885_v32  ;;  %3502 = vmatprep.subr.bf16.mxu1 %v3473_v26 }
  0x8d   : > { %3137 = vmatmul.mubr.f32.gmra.mrb[2].mxu0 %v3870_v8  ;;  %3510 = vmatpush3.bf16.msra.mxu1 %v3473_v26  ;;  %v2411_v8 = vld [vmem:[%s4511_s4 + $0x448] sm:$0xff] }
  0x8e   : > { %3476 = vmatpush3.bf16.msra.mxu0 %v3473_v26  ;;  %2915 = vmatprep.mubr.f32.mxu1 %v886_v58  ;;  %v3485_v51 = vpack.c.bf16 %v2411_v8, %v2410_v40  ;;  %v4456_v58 = vld [vmem:[%s4512_s5] ss:$0 sm:$0xff] }
  0x8f   : > { %3139 = vmatprep.mubr.f32.mxu0 %v3881_v14  ;;  %3478 = vmatprep.subr.bf16.mxu0 %v3477_v33  ;;  %v2361_v14 = vld [vmem:[%s3761_s13 + $0x80] sm:$0xff]  ;;  %s2240_s13 = sshll.u32 %s2227_s22, 4 }
  0x90   : > { %2916 = vmatmul.mubr.f32.gmra.mrb[4].mxu1 %v887_v43  ;;  %3503 = vmatprep.subr.bf16.mxu1 %v3477_v33  ;;  %p328_p4 = scmp.lt.s32.totalorder %s2240_s13, 31 }
  0x91   : > { %3140 = vmatmul.mubr.f32.gmra.mrb[4].mxu0 %v3892_v18  ;;  %3511 = vmatpush3.bf16.msra.mxu1 %v3477_v33  ;;  %v2413_v18 = vld [vmem:[%s4511_s4 + $0x458] sm:$0xff] }
  0x92   : > { %3480 = vmatpush3.bf16.msra.mxu0 %v3477_v33  ;;  %2918 = vmatprep.mubr.f32.mxu1 %v888_v4  ;;  %v3489_v52 = vpack.c.bf16 %v2413_v18, %v2412_v47  ;;  %s4517_s13 = smov (!%p328_p4, %s2240_s13), 31 }
  0x93   : > { %3142 = vmatprep.mubr.f32.mxu0 %v3903_v24  ;;  %3482 = vmatprep.subr.bf16.mxu0 %v3481_v37  ;;  %v892_v24 = vld [vmem:[%s4000_s7 + $0xb0] sm:$0xff]  ;;  %s2241_s22 = sshll.u32 %s4517_s13, 3 }
  0x94   : > { %2919 = vmatmul.mubr.f32.gmra.mrb[6].mxu1 %v889_v41  ;;  %3504 = vmatprep.subr.bf16.mxu1 %v3481_v37  ;;  %s4464_s12 = scalar_lea.vmem %s4513_s6, %s2241_s22 }
  0x95   : > { %3143 = vmatmul.mubr.f32.gmra.mrb[6].mxu0 %v2361_v14  ;;  %3512 = vmatpush3.bf16.msra.mxu1 %v3481_v37 }
  0x96   : > { %3484 = vmatpush3.bf16.msra.mxu0 %v3481_v37  ;;  %2921 = vmatprep.mubr.f32.mxu1 %v890_v42 }
  0x97   : > { %3145 = vmatprep.mubr.f32.mxu0 %v3923_v34  ;;  %3486 = vmatprep.subr.bf16.mxu0 %v3485_v51  ;;  %v894_v34 = vld [vmem:[%s4000_s7 + $0xd0] sm:$0xff] }
  0x98   : > { %2922 = vmatmul.mubr.f32.gmra.mrb[8].mxu1 %v891_v50  ;;  %3505 = vmatprep.subr.bf16.mxu1 %v3485_v51 }
  0x99   : > { %3146 = vmatmul.mubr.f32.gmra.mrb[8].mxu0 %v3933_v38  ;;  %3513 = vmatpush3.bf16.msra.mxu1 %v3485_v51  ;;  %v2417_v38 = vld [vmem:[%s4511_s4 + $0x478] sm:$0xff] }
  0x9a   : > { %3488 = vmatpush3.bf16.msra.mxu0 %v3485_v51  ;;  %2924 = vmatprep.mubr.f32.mxu1 %v892_v24  ;;  %v3497_v3 = vpack.c.bf16 %v2417_v38, %v2416_v7 }
  0x9b   : > { %3148 = vmatprep.mubr.f32.mxu0 %v3944_v44  ;;  %3490 = vmatprep.subr.bf16.mxu0 %v3489_v52  ;;  %v896_v44 = vld [vmem:[%s4000_s7 + $0xf0] sm:$0xff] }
  0x9c   : > { %2925 = vmatmul.mubr.f32.gmra.mrb[10].mxu1 %v893_v56  ;;  %3506 = vmatprep.subr.bf16.mxu1 %v3489_v52 }
  0x9d   : > { %3149 = vmatmul.mubr.f32.gmra.mrb[10].mxu0 %v3955_v48  ;;  %3514 = vmatpush3.bf16.msra.mxu1 %v3489_v52  ;;  %v2401_v48 = vld [vmem:[%s3983_s20 + $0x111] sm:$0xff] }
  0x9e   : > { %3492 = vmatpush3.bf16.msra.mxu0 %v3489_v52  ;;  %2927 = vmatprep.mubr.f32.mxu1 %v894_v34 }
  0x9f   : > { %3151 = vmatprep.mubr.f32.mxu0 %v3966_v54  ;;  %3494 = vmatprep.subr.bf16.mxu0 %v3493_v57  ;;  %v2393_v54 = vld [vmem:[%s3983_s20 + $0x81] sm:$0xff] }
  0xa0   : > { %2928 = vmatmul.mubr.f32.gmra.mrb[12].mxu1 %v895_v63  ;;  %3507 = vmatprep.subr.bf16.mxu1 %v3493_v57 }
  0xa1   : > { %3152 = vmatmul.mubr.f32.gmra.mrb[12].mxu0 %v3977_v59  ;;  %3515 = vmatpush3.bf16.msra.mxu1 %v3493_v57 }
  0xa2   : > { %3496 = vmatpush3.bf16.msra.mxu0 %v3493_v57  ;;  %2930 = vmatprep.mubr.f32.mxu1 %v896_v44 }
  0xa3   : > { %3154 = vmatprep.mubr.f32.mxu0 %v3994_v2  ;;  %3498 = vmatprep.subr.bf16.mxu0 %v3497_v3 }
  0xa4   : > { %2931 = vmatmul.mubr.f32.gmra.mrb[14].mxu1 %v897_v5  ;;  %3508 = vmatprep.subr.bf16.mxu1 %v3497_v3 }
  0xa5   : > { %3155 = vmatmul.mubr.f32.gmra.mrb[14].mxu0 %v2369_v6  ;;  %3516 = vmatpush3.bf16.msra.mxu1 %v3497_v3 }
  0xa6   : > { %3500 = vmatpush3.bf16.msra.mxu0 %v3497_v3  ;;  %3189 = vmatprep.mubr.f32.mxu0 %v4189_v60 }
  0xa7   : > { %3201 = vmatprep.mubr.f32.mxu1 %v4274_v45 }
  0xa8   : > { %3202 = vmatmul.mubr.f32.vlgmr.msra.gmra.mrb[16].mxu1 %v4284_v49 }
  0xa9   : > { %3190 = vmatmul.mubr.f32.vlgmr.msra.gmra.mrb[0].mxu0 %v4199_v0  ;;  %3204 = vmatprep.mubr.f32.mxu1 %v4295_v1 }
  0xaa   : > { %3192 = vmatprep.mubr.f32.mxu0 %v4210_v15 }
  0xac   : > { %3205 = vmatmul.mubr.f32.gmra.mrb[18].mxu1 %v4306_v61 }
  0xad   : > { %3193 = vmatmul.mubr.f32.gmra.mrb[2].mxu0 %v4221_v12  ;;  %3207 = vmatprep.mubr.f32.mxu1 %v4317_v16 }
  0xae   : > { %3195 = vmatprep.mubr.f32.mxu0 %v4232_v27 }
  0xb0   : > { %3208 = vmatmul.mubr.f32.gmra.mrb[20].mxu1 %v4328_v22 }
  0xb1   : > { %3196 = vmatmul.mubr.f32.gmra.mrb[4].mxu0 %v4243_v31  ;;  %3210 = vmatprep.mubr.f32.mxu1 %v4339_v30 }
  0xb2   : > { %3198 = vmatprep.mubr.f32.mxu0 %v4254_v39 }
  0xb4   : > { %3211 = vmatmul.mubr.f32.gmra.mrb[22].mxu1 %v2401_v48 }
  0xb5   : > { %3199 = vmatmul.mubr.f32.gmra.mrb[6].mxu0 %v2393_v54 }
 0x15b   : > { %v2911_v59 = vpop.f32.mrb[0].mxu1 }
 0x15c   : > { %v981_v2 = vpop.f32.mrb[1].mxu1 }
 0x15f   : > { %v2914_v60 = vpop.f32.mrb[2].mxu1 }
 0x160   : > { %v4435_v0 = vpop.f32.mrb[3].mxu1 }
 0x163   : > { %v4437_v15 = vpop.f32.mrb[4].mxu1 }
 0x164   : > { %v4439_v12 = vpop.f32.mrb[5].mxu1 }
 0x167   : > { %v4441_v27 = vpop.f32.mrb[6].mxu1 }
 0x168   : > { %v4443_v31 = vpop.f32.mrb[7].mxu1 }
 0x16b   : > { %v2923_v45 = vpop.f32.mrb[8].mxu1 }
 0x16c   : > { %v3147_v49 = vpop.f32.mrb[8].mxu0  ;;  %v1021_v39 = vpop.f32.mrb[9].mxu1 }
 0x16d   : > { %v3525_v1 = vadd.f32 %v3147_v49, %v2923_v45  ;;  %v1799_v61 = vpop.f32.mrb[9].mxu0 }
 0x16e   : > { %v3527_v16 = vadd.f32 %v1799_v61, %v1021_v39 }
 0x16f   : > { %v2926_v9 = vpop.f32.mrb[10].mxu1 }
 0x170   : > { %v3150_v22 = vpop.f32.mrb[10].mxu0  ;;  %v1031_v10 = vpop.f32.mrb[11].mxu1 }
 0x171   : > { %v3529_v11 = vadd.f32 %v3150_v22, %v2926_v9  ;;  %v1809_v20 = vpop.f32.mrb[11].mxu0 }
 0x172   : > { %v3531_v13 = vadd.f32 %v1809_v20, %v1031_v10 }
 0x173   : > { %v2929_v30 = vpop.f32.mrb[12].mxu1 }
 0x174   : > { %v3153_v17 = vpop.f32.mrb[12].mxu0  ;;  %v1041_v19 = vpop.f32.mrb[13].mxu1 }
 0x175   : > { %v3533_v21 = vadd.f32 %v3153_v17, %v2929_v30  ;;  %v1819_v36 = vpop.f32.mrb[13].mxu0 }
 0x176   : > { %v4447_v23 = vadd.f32 %v1819_v36, %v1041_v19 }
 0x177   : > { %v2932_v25 = vpop.f32.mrb[14].mxu1 }
 0x178   : > { %v3156_v46 = vpop.f32.mrb[14].mxu0  ;;  %v1051_v26 = vpop.f32.mrb[15].mxu1 }
 0x179   : > { %v4449_v28 = vadd.f32 %v3156_v46, %v2932_v25  ;;  %v1829_v29 = vpop.f32.mrb[15].mxu0 }
 0x17a   : > { %v4451_v32 = vadd.f32 %v1829_v29, %v1051_v26 }
 0x17b   : > { %v3203_v33 = vpop.f32.mrb[16].mxu1 }
 0x17c   : > { %v3191_v35 = vpop.f32.mrb[0].mxu0  ;;  %v3526_v62 = vadd.f32 %v3525_v1, %v3203_v33  ;;  %v1993_v43 = vpop.f32.mrb[17].mxu1 }
 0x17d   : > { %v3517_v4 = vadd.f32 %v3191_v35, %v2911_v59  ;;  %v1953_v37 = vpop.f32.mrb[1].mxu0  ;;  %v3528_v40 = vadd.f32 %v3527_v16, %v1993_v43 }
 0x17e   : > { %v2064_v8 = vadd.f32 %v3526_v62, %v4456_v58  ;;  %v3518_v41 = vadd.f32 %v1953_v37, %v981_v2 }
 0x17f   : > { %v2056_v14 = vadd.f32 %v3517_v4, %v4456_v58  ;;  %v2063_v42 = vadd.f32 %v3528_v40, %v4456_v58  ;;  %v3206_v51 = vpop.f32.mrb[18].mxu1 }
 0x180   : > { %vm2080_vm0 = vcmp.gt.f32.partialorder %v2064_v8, 0.0  ;;  %v2096_v47 = vmul.f32 0.2, %v2064_v8  ;;  %v2055_v18 = vadd.f32 %v3518_v41, %v4456_v58  ;;  %v3194_v50 = vpop.f32.mrb[2].mxu0  ;;  %v3530_v24 = vadd.f32 %v3529_v11, %v3206_v51  ;;  %v2003_v52 = vpop.f32.mrb[19].mxu1 }
 0x181   : > { %vm2072_vm1 = vcmp.gt.f32.partialorder %v2056_v14, 0.0  ;;  %v2088_v53 = vmul.f32 0.2, %v2056_v14  ;;  %vm2079_vm2 = vcmp.gt.f32.partialorder %v2063_v42, 0.0  ;;  %v2095_v55 = vmul.f32 0.2, %v2063_v42 }
 0x182   : > { %v2112_v56 = vsel %vm2080_vm0, %v2064_v8, %v2096_v47  ;;  %vm2071_vm3 = vcmp.gt.f32.partialorder %v2055_v18, 0.0  ;;  %v2087_v34 = vmul.f32 0.2, %v2055_v18  ;;  %v3519_v57 = vadd.f32 %v3194_v50, %v2914_v60  ;;  %v1963_v7 = vpop.f32.mrb[3].mxu0 }
 0x183   : > { %v2104_v38 = vsel %vm2072_vm1, %v2056_v14, %v2088_v53  ;;  %2128 = vst [vmem:[%s4464_s12 + $0x48] sm:$0xff] %v2112_v56  ;;  %v2111_v63 = vsel %vm2079_vm2, %v2063_v42, %v2095_v55  ;;  %v2066_v44 = vadd.f32 %v3530_v24, %v4456_v58  ;;  %v3520_v3 = vadd.f32 %v1963_v7, %v4435_v0  ;;  %v3209_v5 = vpop.f32.mrb[20].mxu1 }
 0x184   : > { %2120 = vst [vmem:[%s4464_s12 + $0x8] sm:$0xff] %v2104_v38  ;;  %v2103_v6 = vsel %vm2071_vm3, %v2055_v18, %v2087_v34  ;;  %2127 = vst [vmem:[%s4464_s12 + $0x40] sm:$0xff] %v2111_v63  ;;  %v2058_v48 = vadd.f32 %v3519_v57, %v4456_v58  ;;  %v3532_v54 = vadd.f32 %v3531_v13, %v2003_v52  ;;  %v3197_v59 = vpop.f32.mrb[4].mxu0  ;;  %v2013_v45 = vpop.f32.mrb[21].mxu1 }
 0x185   : > { %v3534_v2 = vadd.f32 %v3533_v21, %v3209_v5  ;;  %2119 = vst [vmem:[%s4464_s12] sm:$0xff] %v2103_v6  ;;  %vm2082_vm4 = vcmp.gt.f32.partialorder %v2066_v44, 0.0  ;;  %v2098_v60 = vmul.f32 0.2, %v2066_v44  ;;  %v2057_v49 = vadd.f32 %v3520_v3, %v4456_v58  ;;  %v1973_v1 = vpop.f32.mrb[5].mxu0 }
 0x186   : > { %v3521_v39 = vadd.f32 %v3197_v59, %v4437_v15  ;;  %vm2074_vm5 = vcmp.gt.f32.partialorder %v2058_v48, 0.0  ;;  %v2090_v0 = vmul.f32 0.2, %v2058_v48  ;;  %v2065_v61 = vadd.f32 %v3532_v54, %v4456_v58 }
 0x187   : > { %v2068_v16 = vadd.f32 %v3534_v2, %v4456_v58  ;;  %v2114_v9 = vsel %vm2082_vm4, %v2066_v44, %v2098_v60  ;;  %vm2073_vm6 = vcmp.gt.f32.partialorder %v2057_v49, 0.0  ;;  %v2089_v22 = vmul.f32 0.2, %v2057_v49  ;;  %v3212_v11 = vpop.f32.mrb[22].mxu1 }
 0x188   : > { %v2060_v10 = vadd.f32 %v3521_v39, %v4456_v58  ;;  %v2106_v20 = vsel %vm2074_vm5, %v2058_v48, %v2090_v0  ;;  %2130 = vst [vmem:[%s4464_s12 + $0x58] sm:$0xff] %v2114_v9  ;;  %vm2081_vm7 = vcmp.gt.f32.partialorder %v2065_v61, 0.0  ;;  %v2097_v15 = vmul.f32 0.2, %v2065_v61  ;;  %v3200_v13 = vpop.f32.mrb[6].mxu0  ;;  %v2023_v30 = vpop.f32.mrb[23].mxu1 }
 0x189   : > { %vm2084_vm8 = vcmp.gt.f32.partialorder %v2068_v16, 0.0  ;;  %2122 = vst [vmem:[%s4464_s12 + $0x18] sm:$0xff] %v2106_v20  ;;  %v2105_v17 = vsel %vm2073_vm6, %v2057_v49, %v2089_v22  ;;  %v2100_v21 = vmul.f32 0.2, %v2068_v16  ;;  %v1983_v36 = vpop.f32.mrb[7].mxu0  ;;  %v3522_v46 = vadd.f32 %v1973_v1, %v4439_v12 }
 0x18a   : > { %vm2076_vm9 = vcmp.gt.f32.partialorder %v2060_v10, 0.0  ;;  %v2092_v19 = vmul.f32 0.2, %v2060_v10  ;;  %2121 = vst [vmem:[%s4464_s12 + $0x10] sm:$0xff] %v2105_v17  ;;  %v2113_v25 = vsel %vm2081_vm7, %v2065_v61, %v2097_v15  ;;  %v3536_v26 = vadd.f32 %v4447_v23, %v2013_v45 }
 0x18b   : > { %v3523_v29 = vadd.f32 %v3200_v13, %v4441_v27  ;;  %2129 = vst [vmem:[%s4464_s12 + $0x50] sm:$0xff] %v2113_v25  ;;  %v2116_v35 = vsel %vm2084_vm8, %v2068_v16, %v2100_v21  ;;  %v3538_v62 = vadd.f32 %v4449_v28, %v3212_v11  ;;  %v3524_v43 = vadd.f32 %v1983_v36, %v4443_v31 }
 0x18c   : > { %v2108_v33 = vsel %vm2076_vm9, %v2060_v10, %v2092_v19  ;;  %2132 = vst [vmem:[%s4464_s12 + $0x68] sm:$0xff] %v2116_v35  ;;  %v2059_v4 = vadd.f32 %v3522_v46, %v4456_v58  ;;  %v2067_v37 = vadd.f32 %v3536_v26, %v4456_v58  ;;  %v3540_v23 = vadd.f32 %v4451_v32, %v2023_v30 }
 0x18d   : > { %2124 = vst [vmem:[%s4464_s12 + $0x28] sm:$0xff] %v2108_v33  ;;  %v2062_v12 = vadd.f32 %v3523_v29, %v4456_v58  ;;  %v2070_v27 = vadd.f32 %v3538_v62, %v4456_v58  ;;  %v2061_v40 = vadd.f32 %v3524_v43, %v4456_v58 }
 0x18e   : > { %vm2075_vm10 = vcmp.gt.f32.partialorder %v2059_v4, 0.0  ;;  %v2091_v28 = vmul.f32 0.2, %v2059_v4  ;;  %vm2083_vm11 = vcmp.gt.f32.partialorder %v2067_v37, 0.0  ;;  %v2099_v31 = vmul.f32 0.2, %v2067_v37 }
 0x18f   : > { %vm2078_vm12 = vcmp.gt.f32.partialorder %v2062_v12, 0.0  ;;  %v2094_v8 = vmul.f32 0.2, %v2062_v12  ;;  %vm2086_vm13 = vcmp.gt.f32.partialorder %v2070_v27, 0.0  ;;  %v2102_v41 = vmul.f32 0.2, %v2070_v27 }
 0x190   : > { %v2107_v14 = vsel %vm2075_vm10, %v2059_v4, %v2091_v28  ;;  %v2115_v42 = vsel %vm2083_vm11, %v2067_v37, %v2099_v31  ;;  %vm2077_vm14 = vcmp.gt.f32.partialorder %v2061_v40, 0.0  ;;  %v2093_v32 = vmul.f32 0.2, %v2061_v40 }
 0x191   : > { %2123 = vst [vmem:[%s4464_s12 + $0x20] sm:$0xff] %v2107_v14  ;;  %2131 = vst [vmem:[%s4464_s12 + $0x60] sm:$0xff] %v2115_v42  ;;  %v2110_v51 = vsel %vm2078_vm12, %v2062_v12, %v2094_v8  ;;  %v2118_v47 = vsel %vm2086_vm13, %v2070_v27, %v2102_v41  ;;  %v2069_v18 = vadd.f32 %v3540_v23, %v4456_v58 }
 0x192   : > { %2126 = vst [vmem:[%s4464_s12 + $0x38] sm:$0xff] %v2110_v51  ;;  %2134 = vst [vmem:[%s4464_s12 + $0x78] sm:$0xff] %v2118_v47  ;;  %v2109_v50 = vsel %vm2077_vm14, %v2061_v40, %v2093_v32 }
 0x193   : > { %2125 = vst [vmem:[%s4464_s12 + $0x30] sm:$0xff] %v2109_v50  ;;  %vm2085_vm15 = vcmp.gt.f32.partialorder %v2069_v18, 0.0  ;;  %v2101_v24 = vmul.f32 0.2, %v2069_v18 }
 0x195   : > { %v2117_v52 = vsel %vm2085_vm15, %v2069_v18, %v2101_v24 }
 0x196   : > { %2133 = vst [vmem:[%s4464_s12 + $0x70] sm:$0xff] %v2117_v52 }
 0x197 PF: > { %s16_s21 = sadd.s32 1, %s3660_s21  }
 0x198   : > { %p13_p5 = scmp.ge.s32.totalorder %s16_s21, 4  }
 0x19a   :  { %15 = sbr.rel (!%p13_p5) target bundleno = 1 (0x1), region = 93 }

// kernel: adversarial_forward.5
= control target key start
LH: loop header
LB: loop body
LE: loop exit
PB: predicated region body
PF: predicated region fallthrough
CT: control target
= control target key end

     0   :  { %s2391_s0 = inlined_call_operand.vmem [shape: f32[64,1152], index: 0, kind: input, shape index: {}]   ;;  %s2392_s1 = inlined_call_operand.vmem [shape: f32[1152,128], index: 1, kind: input, shape index: {}]   ;;  %s2393_s2 = inlined_call_operand.vmem [shape: f32[1,128], index: 2, kind: input, shape index: {}]   ;;  %s2394_s3 = inlined_call_operand.vmem [shape: f32[128,1], index: 3, kind: input, shape index: {}]   ;;  %s2395_s4 = inlined_call_operand.<no memory space> [shape: f32[1,1], index: 4, kind: input, shape index: {}]   ;;  %s2396_s5 = inlined_call_operand.hbm [shape: f32[1,1], index: 5, kind: output, shape index: {0}]   ;;  %s2397_s6 = inlined_call_operand.hbm [shape: f32[1,1], index: 6, kind: output, shape index: {1}]  }
   0x1   :  { %v12_v0 = vstv %s2395_s4 }
   0x2   :  { %13 = vst [vmem:[#allocation2] sm:$0x1] %v12_v0 }
   0x3   :  { %14 = vsyncpa [#allocation4], 0  ;;  %v114_v1 = vld [vmem:[%s2392_s1 + $0x80] sm:$0xff]  ;;  %v115_v2 = vld [vmem:[%s2392_s1 + $0x88] sm:$0xff] }
   0x4   :  { %v98_v3 = vld [vmem:[%s2392_s1] sm:$0xff]  ;;  %v1370_v4 = vpack.c.bf16 %v115_v2, %v114_v1  ;;  %v99_v5 = vld [vmem:[%s2392_s1 + $0x8] sm:$0xff]  ;;  %v116_v12 = vld [vmem:[%s2392_s1 + $0x90] sm:$0xff] }
   0x5   :  { %v146_v6 = vld [vmem:[%s2392_s1 + $0x180] sm:$0xff]  ;;  %v147_v7 = vld [vmem:[%s2392_s1 + $0x188] sm:$0xff]  ;;  %v1372_v8 = vpack.c.bf16 %v99_v5, %v98_v3  ;;  %v117_v14 = vld [vmem:[%s2392_s1 + $0x98] sm:$0xff] }
   0x6   :  { %v1402_v9 = vpack.c.bf16 %v147_v7, %v146_v6  ;;  %v130_v10 = vld [vmem:[%s2392_s1 + $0x100] sm:$0xff]  ;;  %v131_v11 = vld [vmem:[%s2392_s1 + $0x108] sm:$0xff]  ;;  %1371 = vmatprep.subr.bf16.mxu0 %v1370_v4  ;;  %v100_v15 = vld [vmem:[%s2392_s1 + $0x10] sm:$0xff]  ;;  %v1374_v17 = vpack.c.bf16 %v117_v14, %v116_v12 }
   0x7   :  { %v1404_v13 = vpack.c.bf16 %v131_v11, %v130_v10  ;;  %v101_v16 = vld [vmem:[%s2392_s1 + $0x18] sm:$0xff]  ;;  %1373 = vmatpush3.bf16.msra.mxu0 %v1372_v8  ;;  %v148_v19 = vld [vmem:[%s2392_s1 + $0x190] sm:$0xff]  ;;  %v118_v24 = vld [vmem:[%s2392_s1 + $0xa0] sm:$0xff] }
   0x8   :  { %1403 = vmatprep.subr.bf16.mxu1 %v1402_v9  ;;  %v1376_v18 = vpack.c.bf16 %v101_v16, %v100_v15  ;;  %v149_v20 = vld [vmem:[%s2392_s1 + $0x198] sm:$0xff]  ;;  %v132_v21 = vld [vmem:[%s2392_s1 + $0x110] sm:$0xff]  ;;  %v119_v25 = vld [vmem:[%s2392_s1 + $0xa8] sm:$0xff]  ;;  %1375 = vmatprep.subr.bf16.mxu0 %v1374_v17 }
   0x9   :  { %1405 = vmatpush3.bf16.msra.mxu1 %v1404_v13  ;;  %v1406_v22 = vpack.c.bf16 %v149_v20, %v148_v19  ;;  %v133_v23 = vld [vmem:[%s2392_s1 + $0x118] sm:$0xff]  ;;  %v1378_v27 = vpack.c.bf16 %v119_v25, %v118_v24  ;;  %v102_v28 = vld [vmem:[%s2392_s1 + $0x20] sm:$0xff]  ;;  %v103_v29 = vld [vmem:[%s2392_s1 + $0x28] sm:$0xff] }
   0xa   :  { %v1408_v26 = vpack.c.bf16 %v133_v23, %v132_v21  ;;  %v150_v30 = vld [vmem:[%s2392_s1 + $0x1a0] sm:$0xff]  ;;  %v151_v31 = vld [vmem:[%s2392_s1 + $0x1a8] sm:$0xff]  ;;  %v1380_v34 = vpack.c.bf16 %v103_v29, %v102_v28  ;;  %v120_v36 = vld [vmem:[%s2392_s1 + $0xb0] sm:$0xff] }
   0xb   :  { %1407 = vmatprep.subr.bf16.mxu1 %v1406_v22  ;;  %v134_v32 = vld [vmem:[%s2392_s1 + $0x120] sm:$0xff]  ;;  %v135_v33 = vld [vmem:[%s2392_s1 + $0x128] sm:$0xff]  ;;  %1377 = vmatpush3.bf16.msra.mxu0 %v1376_v18  ;;  %v1410_v35 = vpack.c.bf16 %v151_v31, %v150_v30  ;;  %v121_v37 = vld [vmem:[%s2392_s1 + $0xb8] sm:$0xff] }
   0xc   :  { %v104_v38 = vld [vmem:[%s2392_s1 + $0x30] sm:$0xff]  ;;  %1379 = vmatprep.subr.bf16.mxu0 %v1378_v27  ;;  %v1412_v39 = vpack.c.bf16 %v135_v33, %v134_v32  ;;  %v1382_v40 = vpack.c.bf16 %v121_v37, %v120_v36  ;;  %v105_v41 = vld [vmem:[%s2392_s1 + $0x38] sm:$0xff]  ;;  %v122_v47 = vld [vmem:[%s2392_s1 + $0xc0] sm:$0xff] }
   0xd   :  { %1409 = vmatpush3.bf16.msra.mxu1 %v1408_v26  ;;  %v152_v42 = vld [vmem:[%s2392_s1 + $0x1b0] sm:$0xff]  ;;  %v153_v43 = vld [vmem:[%s2392_s1 + $0x1b8] sm:$0xff]  ;;  %v123_v48 = vld [vmem:[%s2392_s1 + $0xc8] sm:$0xff]  ;;  %v1384_v49 = vpack.c.bf16 %v105_v41, %v104_v38 }
   0xe   :  { %1411 = vmatprep.subr.bf16.mxu1 %v1410_v35  ;;  %v1414_v44 = vpack.c.bf16 %v153_v43, %v152_v42  ;;  %v136_v45 = vld [vmem:[%s2392_s1 + $0x130] sm:$0xff]  ;;  %v137_v46 = vld [vmem:[%s2392_s1 + $0x138] sm:$0xff]  ;;  %v154_v50 = vld [vmem:[%s2392_s1 + $0x1c0] sm:$0xff]  ;;  %v1386_v53 = vpack.c.bf16 %v123_v48, %v122_v47 }
   0xf   :  { %1381 = vmatpush3.bf16.msra.mxu0 %v1380_v34  ;;  %v155_v51 = vld [vmem:[%s2392_s1 + $0x1c8] sm:$0xff]  ;;  %v1416_v52 = vpack.c.bf16 %v137_v46, %v136_v45  ;;  %v106_v54 = vld [vmem:[%s2392_s1 + $0x40] sm:$0xff]  ;;  %v124_v59 = vld [vmem:[%s2392_s1 + $0xd0] sm:$0xff] }
  0x10   :  { %1383 = vmatprep.subr.bf16.mxu0 %v1382_v40  ;;  %v107_v55 = vld [vmem:[%s2392_s1 + $0x48] sm:$0xff]  ;;  %v138_v56 = vld [vmem:[%s2392_s1 + $0x140] sm:$0xff]  ;;  %v1418_v57 = vpack.c.bf16 %v155_v51, %v154_v50  ;;  %v125_v60 = vld [vmem:[%s2392_s1 + $0xd8] sm:$0xff] }
  0x11   :  { %1413 = vmatpush3.bf16.msra.mxu1 %v1412_v39  ;;  %v139_v58 = vld [vmem:[%s2392_s1 + $0x148] sm:$0xff]  ;;  %v156_v61 = vld [vmem:[%s2392_s1 + $0x1d0] sm:$0xff]  ;;  %v157_v62 = vld [vmem:[%s2392_s1 + $0x1d8] sm:$0xff]  ;;  %v1388_v63 = vpack.c.bf16 %v107_v55, %v106_v54  ;;  %v1390_v1 = vpack.c.bf16 %v125_v60, %v124_v59 }
  0x12   :  { %1415 = vmatprep.subr.bf16.mxu1 %v1414_v44  ;;  %v1420_v0 = vpack.c.bf16 %v139_v58, %v138_v56  ;;  %v108_v2 = vld [vmem:[%s2392_s1 + $0x50] sm:$0xff]  ;;  %v109_v3 = vld [vmem:[%s2392_s1 + $0x58] sm:$0xff]  ;;  %v1422_v5 = vpack.c.bf16 %v157_v62, %v156_v61  ;;  %v126_v7 = vld [vmem:[%s2392_s1 + $0xe0] sm:$0xff] }
  0x13   :  { %1385 = vmatpush3.bf16.msra.mxu0 %v1384_v49  ;;  %v140_v4 = vld [vmem:[%s2392_s1 + $0x150] sm:$0xff]  ;;  %v141_v6 = vld [vmem:[%s2392_s1 + $0x158] sm:$0xff]  ;;  %v127_v8 = vld [vmem:[%s2392_s1 + $0xe8] sm:$0xff]  ;;  %v1392_v11 = vpack.c.bf16 %v109_v3, %v108_v2 }
  0x14   :  { %1387 = vmatprep.subr.bf16.mxu0 %v1386_v53  ;;  %v158_v9 = vld [vmem:[%s2392_s1 + $0x1e0] sm:$0xff]  ;;  %v159_v10 = vld [vmem:[%s2392_s1 + $0x1e8] sm:$0xff]  ;;  %v1424_v14 = vpack.c.bf16 %v141_v6, %v140_v4  ;;  %v1394_v15 = vpack.c.bf16 %v127_v8, %v126_v7  ;;  %v128_v20 = vld [vmem:[%s2392_s1 + $0xf0] sm:$0xff] }
  0x15   :  { %1417 = vmatpush3.bf16.msra.mxu1 %v1416_v52  ;;  %v110_v12 = vld [vmem:[%s2392_s1 + $0x60] sm:$0xff]  ;;  %v27_v13 = vld [vmem:[%s2391_s0 + $0x8] sm:$0xff]  ;;  %v1426_v19 = vpack.c.bf16 %v159_v10, %v158_v9  ;;  %v129_v21 = vld [vmem:[%s2392_s1 + $0xf8] sm:$0xff] }
  0x16   :  { %1419 = vmatprep.subr.bf16.mxu1 %v1418_v57  ;;  %v111_v16 = vld [vmem:[%s2392_s1 + $0x68] sm:$0xff]  ;;  %v142_v17 = vld [vmem:[%s2392_s1 + $0x160] sm:$0xff]  ;;  %313 = vmatprep.mubr.f32.mxu0 %v27_v13  ;;  %v29_v22 = vld [vmem:[%s2391_s0 + $0x18] sm:$0xff]  ;;  %v1398_v27 = vpack.c.bf16 %v129_v21, %v128_v20 }
  0x17   :  { %1389 = vmatpush3.bf16.msra.mxu0 %v1388_v63  ;;  %v143_v18 = vld [vmem:[%s2392_s1 + $0x168] sm:$0xff]  ;;  %v160_v23 = vld [vmem:[%s2392_s1 + $0x1f0] sm:$0xff]  ;;  %v161_v24 = vld [vmem:[%s2392_s1 + $0x1f8] sm:$0xff]  ;;  %418 = vmatprep.mubr.f32.mxu1 %v29_v22  ;;  %v1396_v25 = vpack.c.bf16 %v111_v16, %v110_v12 }
  0x18   :  { %1391 = vmatprep.subr.bf16.mxu0 %v1390_v1  ;;  %v1428_v26 = vpack.c.bf16 %v143_v18, %v142_v17  ;;  %v112_v28 = vld [vmem:[%s2392_s1 + $0x70] sm:$0xff]  ;;  %v113_v29 = vld [vmem:[%s2392_s1 + $0x78] sm:$0xff]  ;;  %v1430_v31 = vpack.c.bf16 %v161_v24, %v160_v23  ;;  %v178_v33 = vld [vmem:[%s2392_s1 + $0x280] sm:$0xff] }
  0x19   :  { %1421 = vmatpush3.bf16.msra.mxu1 %v1420_v0  ;;  %v144_v30 = vld [vmem:[%s2392_s1 + $0x170] sm:$0xff]  ;;  %v145_v32 = vld [vmem:[%s2392_s1 + $0x178] sm:$0xff]  ;;  %v179_v34 = vld [vmem:[%s2392_s1 + $0x288] sm:$0xff]  ;;  %v1400_v37 = vpack.c.bf16 %v113_v29, %v112_v28 }
  0x1a   :  { %1423 = vmatprep.subr.bf16.mxu1 %v1422_v5  ;;  %v210_v35 = vld [vmem:[%s2392_s1 + $0x380] sm:$0xff]  ;;  %v211_v36 = vld [vmem:[%s2392_s1 + $0x388] sm:$0xff]  ;;  %v1432_v38 = vpack.c.bf16 %v145_v32, %v144_v30  ;;  %v1434_v39 = vpack.c.bf16 %v179_v34, %v178_v33  ;;  %v180_v45 = vld [vmem:[%s2392_s1 + $0x290] sm:$0xff] }
  0x1b   :  { %1393 = vmatpush3.bf16.msra.mxu0 %v1392_v11  ;;  %v162_v40 = vld [vmem:[%s2392_s1 + $0x200] sm:$0xff]  ;;  %v163_v41 = vld [vmem:[%s2392_s1 + $0x208] sm:$0xff]  ;;  %v1466_v42 = vpack.c.bf16 %v211_v36, %v210_v35  ;;  %v181_v46 = vld [vmem:[%s2392_s1 + $0x298] sm:$0xff] }
  0x1c   :  { %1395 = vmatprep.subr.bf16.mxu0 %v1394_v15  ;;  %v194_v43 = vld [vmem:[%s2392_s1 + $0x300] sm:$0xff]  ;;  %v195_v44 = vld [vmem:[%s2392_s1 + $0x308] sm:$0xff]  ;;  %v1436_v48 = vpack.c.bf16 %v163_v41, %v162_v40  ;;  %v212_v49 = vld [vmem:[%s2392_s1 + $0x390] sm:$0xff]  ;;  %v1438_v56 = vpack.c.bf16 %v181_v46, %v180_v45 }
  0x1d   :  { %1425 = vmatpush3.bf16.msra.mxu1 %v1424_v14  ;;  %v26_v47 = vld [vmem:[%s2391_s0] sm:$0xff]  ;;  %v213_v50 = vld [vmem:[%s2392_s1 + $0x398] sm:$0xff]  ;;  %v28_v51 = vld [vmem:[%s2391_s0 + $0x10] sm:$0xff]  ;;  %v1468_v52 = vpack.c.bf16 %v195_v44, %v194_v43 }
  0x1e   :  { %1427 = vmatprep.subr.bf16.mxu1 %v1426_v19  ;;  %v164_v53 = vld [vmem:[%s2392_s1 + $0x210] sm:$0xff]  ;;  %v165_v54 = vld [vmem:[%s2392_s1 + $0x218] sm:$0xff]  ;;  %v38_v59 = vld [vmem:[%s2391_s0 + $0x60] sm:$0xff]  ;;  %v1470_v60 = vpack.c.bf16 %v213_v50, %v212_v49 }
  0x1f   :  { %1397 = vmatpush3.bf16.msra.mxu0 %v1396_v25  ;;  %v36_v55 = vld [vmem:[%s2391_s0 + $0x50] sm:$0xff]  ;;  %v197_v58 = vld [vmem:[%s2392_s1 + $0x318] sm:$0xff]  ;;  %v182_v61 = vld [vmem:[%s2392_s1 + $0x2a0] sm:$0xff]  ;;  %v1440_v0 = vpack.c.bf16 %v165_v54, %v164_v53 }
  0x20   :  { %1399 = vmatprep.subr.bf16.mxu0 %v1398_v27  ;;  %v196_v57 = vld [vmem:[%s2392_s1 + $0x310] sm:$0xff]  ;;  %v183_v62 = vld [vmem:[%s2392_s1 + $0x2a8] sm:$0xff]  ;;  %v214_v1 = vld [vmem:[%s2392_s1 + $0x3a0] sm:$0xff] }
  0x21   :  { %1429 = vmatpush3.bf16.msra.mxu1 %v1428_v26  ;;  %v35_v63 = vld [vmem:[%s2391_s0 + $0x48] sm:$0xff]  ;;  %v37_v3 = vld [vmem:[%s2391_s0 + $0x58] sm:$0xff]  ;;  %v1472_v4 = vpack.c.bf16 %v197_v58, %v196_v57  ;;  %v166_v5 = vld [vmem:[%s2392_s1 + $0x220] sm:$0xff]  ;;  %v1442_v8 = vpack.c.bf16 %v183_v62, %v182_v61 }
  0x22   :  { %1431 = vmatprep.subr.bf16.mxu1 %v1430_v31  ;;  %v215_v2 = vld [vmem:[%s2392_s1 + $0x3a8] sm:$0xff]  ;;  %v45_v7 = vld [vmem:[%s2391_s0 + $0x98] sm:$0xff]  ;;  %v198_v9 = vld [vmem:[%s2392_s1 + $0x320] sm:$0xff] }
  0x23   :  { %1401 = vmatpush3.bf16.msra.mxu0 %v1400_v37  ;;  %v167_v6 = vld [vmem:[%s2392_s1 + $0x228] sm:$0xff]  ;;  %v1474_v12 = vpack.c.bf16 %v215_v2, %v214_v1  ;;  %v184_v13 = vld [vmem:[%s2392_s1 + $0x2b0] sm:$0xff]  ;;  %v185_v14 = vld [vmem:[%s2392_s1 + $0x2b8] sm:$0xff] }
  0x24   :  { %1435 = vmatprep.subr.bf16.mxu0 %v1434_v39  ;;  %v199_v10 = vld [vmem:[%s2392_s1 + $0x328] sm:$0xff]  ;;  %v44_v15 = vld [vmem:[%s2391_s0 + $0x90] sm:$0xff]  ;;  %v1444_v16 = vpack.c.bf16 %v167_v6, %v166_v5  ;;  %v217_v18 = vld [vmem:[%s2392_s1 + $0x3b8] sm:$0xff]  ;;  %v1446_v24 = vpack.c.bf16 %v185_v14, %v184_v13 }
  0x25   :  { %1433 = vmatpush3.bf16.msra.mxu1 %v1432_v38  ;;  %v47_v11 = vld [vmem:[%s2391_s0 + $0xa8] sm:$0xff]  ;;  %v216_v17 = vld [vmem:[%s2392_s1 + $0x3b0] sm:$0xff]  ;;  %v46_v19 = vld [vmem:[%s2391_s0 + $0xa0] sm:$0xff]  ;;  %v1476_v20 = vpack.c.bf16 %v199_v10, %v198_v9 }
  0x26   :  { %1467 = vmatprep.subr.bf16.mxu1 %v1466_v42  ;;  %314 = vmatmul.mubr.f32.vlgmr.msra.gmra.mrb[0].mxu0 %v26_v47  ;;  %v168_v21 = vld [vmem:[%s2392_s1 + $0x230] sm:$0xff]  ;;  %v169_v22 = vld [vmem:[%s2392_s1 + $0x238] sm:$0xff]  ;;  %v54_v23 = vld [vmem:[%s2391_s0 + $0xe0] sm:$0xff]  ;;  %v1478_v28 = vpack.c.bf16 %v217_v18, %v216_v17 }
  0x27   :  { %1437 = vmatpush3.bf16.msra.mxu0 %v1436_v48  ;;  %318 = vmatprep.mubr.f32.mxu0 %v36_v55  ;;  %v200_v25 = vld [vmem:[%s2392_s1 + $0x330] sm:$0xff]  ;;  %v201_v26 = vld [vmem:[%s2392_s1 + $0x338] sm:$0xff]  ;;  %v186_v29 = vld [vmem:[%s2392_s1 + $0x2c0] sm:$0xff]  ;;  %v1448_v32 = vpack.c.bf16 %v169_v22, %v168_v21 }
  0x28   :  { %419 = vmatmul.mubr.f32.vlgmr.msra.gmra.mrb[0].mxu1 %v28_v51  ;;  %1439 = vmatprep.subr.bf16.mxu0 %v1438_v56  ;;  %v56_v27 = vld [vmem:[%s2391_s0 + $0xf0] sm:$0xff]  ;;  %v187_v30 = vld [vmem:[%s2392_s1 + $0x2c8] sm:$0xff]  ;;  %v53_v31 = vld [vmem:[%s2391_s0 + $0xd8] sm:$0xff]  ;;  %v1480_v36 = vpack.c.bf16 %v201_v26, %v200_v25 }
  0x29   :  { %1469 = vmatpush3.bf16.msra.mxu1 %v1468_v52  ;;  %423 = vmatprep.mubr.f32.mxu1 %v38_v59  ;;  %v218_v33 = vld [vmem:[%s2392_s1 + $0x3c0] sm:$0xff]  ;;  %v219_v34 = vld [vmem:[%s2392_s1 + $0x3c8] sm:$0xff]  ;;  %v1450_v40 = vpack.c.bf16 %v187_v30, %v186_v29  ;;  %v65_v43 = vld [vmem:[%s2391_s0 + $0x138] sm:$0xff] }
  0x2a   :  { %319 = vmatmul.mubr.f32.gmra.mrb[2].mxu0 %v35_v63  ;;  %1471 = vmatprep.subr.bf16.mxu1 %v1470_v60  ;;  %v55_v35 = vld [vmem:[%s2391_s0 + $0xe8] sm:$0xff]  ;;  %v170_v37 = vld [vmem:[%s2392_s1 + $0x240] sm:$0xff]  ;;  %v1482_v44 = vpack.c.bf16 %v219_v34, %v218_v33  ;;  %v188_v45 = vld [vmem:[%s2392_s1 + $0x2d0] sm:$0xff] }
  0x2b   :  { %1441 = vmatpush3.bf16.msra.mxu0 %v1440_v0  ;;  %323 = vmatprep.mubr.f32.mxu0 %v45_v7  ;;  %v171_v38 = vld [vmem:[%s2392_s1 + $0x248] sm:$0xff]  ;;  %v202_v41 = vld [vmem:[%s2392_s1 + $0x340] sm:$0xff]  ;;  %v189_v46 = vld [vmem:[%s2392_s1 + $0x2d8] sm:$0xff] }
  0x2c   :  { %424 = vmatmul.mubr.f32.gmra.mrb[2].mxu1 %v37_v3  ;;  %1443 = vmatprep.subr.bf16.mxu0 %v1442_v8  ;;  %v63_v39 = vld [vmem:[%s2391_s0 + $0x128] sm:$0xff]  ;;  %v62_v47 = vld [vmem:[%s2391_s0 + $0x120] sm:$0xff]  ;;  %v1452_v48 = vpack.c.bf16 %v171_v38, %v170_v37  ;;  %v220_v49 = vld [vmem:[%s2392_s1 + $0x3d0] sm:$0xff]  ;;  %v1454_v56 = vpack.c.bf16 %v189_v46, %v188_v45 }
  0x2d   :  { %1473 = vmatpush3.bf16.msra.mxu1 %v1472_v4  ;;  %428 = vmatprep.mubr.f32.mxu1 %v47_v11  ;;  %v203_v42 = vld [vmem:[%s2392_s1 + $0x348] sm:$0xff]  ;;  %v221_v50 = vld [vmem:[%s2392_s1 + $0x3d8] sm:$0xff]  ;;  %v64_v51 = vld [vmem:[%s2391_s0 + $0x130] sm:$0xff] }
  0x2e   :  { %324 = vmatmul.mubr.f32.gmra.mrb[4].mxu0 %v44_v15  ;;  %1475 = vmatprep.subr.bf16.mxu1 %v1474_v12  ;;  %v1484_v52 = vpack.c.bf16 %v203_v42, %v202_v41  ;;  %v172_v53 = vld [vmem:[%s2392_s1 + $0x250] sm:$0xff]  ;;  %v173_v54 = vld [vmem:[%s2392_s1 + $0x258] sm:$0xff]  ;;  %v74_v59 = vld [vmem:[%s2391_s0 + $0x180] sm:$0xff]  ;;  %v1486_v60 = vpack.c.bf16 %v221_v50, %v220_v49 }
  0x2f   :  { %1445 = vmatpush3.bf16.msra.mxu0 %v1444_v16  ;;  %328 = vmatprep.mubr.f32.mxu0 %v54_v23  ;;  %v72_v55 = vld [vmem:[%s2391_s0 + $0x170] sm:$0xff]  ;;  %v205_v58 = vld [vmem:[%s2392_s1 + $0x358] sm:$0xff]  ;;  %v190_v61 = vld [vmem:[%s2392_s1 + $0x2e0] sm:$0xff]  ;;  %v1456_v0 = vpack.c.bf16 %v173_v54, %v172_v53 }
  0x30   :  { %429 = vmatmul.mubr.f32.gmra.mrb[4].mxu1 %v46_v19  ;;  %1447 = vmatprep.subr.bf16.mxu0 %v1446_v24  ;;  %v204_v57 = vld [vmem:[%s2392_s1 + $0x350] sm:$0xff]  ;;  %v191_v62 = vld [vmem:[%s2392_s1 + $0x2e8] sm:$0xff]  ;;  %v222_v1 = vld [vmem:[%s2392_s1 + $0x3e0] sm:$0xff] }
  0x31   :  { %1477 = vmatpush3.bf16.msra.mxu1 %v1476_v20  ;;  %433 = vmatprep.mubr.f32.mxu1 %v56_v27  ;;  %v71_v63 = vld [vmem:[%s2391_s0 + $0x168] sm:$0xff]  ;;  %v73_v3 = vld [vmem:[%s2391_s0 + $0x178] sm:$0xff]  ;;  %v1488_v4 = vpack.c.bf16 %v205_v58, %v204_v57  ;;  %v174_v5 = vld [vmem:[%s2392_s1 + $0x260] sm:$0xff]  ;;  %v1458_v8 = vpack.c.bf16 %v191_v62, %v190_v61 }
  0x32   :  { %329 = vmatmul.mubr.f32.gmra.mrb[6].mxu0 %v53_v31  ;;  %1479 = vmatprep.subr.bf16.mxu1 %v1478_v28  ;;  %v223_v2 = vld [vmem:[%s2392_s1 + $0x3e8] sm:$0xff]  ;;  %v81_v7 = vld [vmem:[%s2391_s0 + $0x1b8] sm:$0xff]  ;;  %v206_v9 = vld [vmem:[%s2392_s1 + $0x360] sm:$0xff] }
  0x33   :  { %1449 = vmatpush3.bf16.msra.mxu0 %v1448_v32  ;;  %333 = vmatprep.mubr.f32.mxu0 %v63_v39  ;;  %v175_v6 = vld [vmem:[%s2392_s1 + $0x268] sm:$0xff]  ;;  %v1490_v12 = vpack.c.bf16 %v223_v2, %v222_v1  ;;  %v192_v13 = vld [vmem:[%s2392_s1 + $0x2f0] sm:$0xff]  ;;  %v193_v14 = vld [vmem:[%s2392_s1 + $0x2f8] sm:$0xff] }
  0x34   :  { %434 = vmatmul.mubr.f32.gmra.mrb[6].mxu1 %v55_v35  ;;  %1451 = vmatprep.subr.bf16.mxu0 %v1450_v40  ;;  %v207_v10 = vld [vmem:[%s2392_s1 + $0x368] sm:$0xff]  ;;  %v80_v15 = vld [vmem:[%s2391_s0 + $0x1b0] sm:$0xff]  ;;  %v1460_v16 = vpack.c.bf16 %v175_v6, %v174_v5  ;;  %v225_v18 = vld [vmem:[%s2392_s1 + $0x3f8] sm:$0xff]  ;;  %v1462_v24 = vpack.c.bf16 %v193_v14, %v192_v13 }
  0x35   :  { %1481 = vmatpush3.bf16.msra.mxu1 %v1480_v36  ;;  %438 = vmatprep.mubr.f32.mxu1 %v65_v43  ;;  %v83_v11 = vld [vmem:[%s2391_s0 + $0x1c8] sm:$0xff]  ;;  %v224_v17 = vld [vmem:[%s2392_s1 + $0x3f0] sm:$0xff]  ;;  %v82_v19 = vld [vmem:[%s2391_s0 + $0x1c0] sm:$0xff]  ;;  %v1492_v20 = vpack.c.bf16 %v207_v10, %v206_v9 }
  0x36   :  { %334 = vmatmul.mubr.f32.gmra.mrb[8].mxu0 %v62_v47  ;;  %1483 = vmatprep.subr.bf16.mxu1 %v1482_v44  ;;  %v176_v21 = vld [vmem:[%s2392_s1 + $0x270] sm:$0xff]  ;;  %v177_v22 = vld [vmem:[%s2392_s1 + $0x278] sm:$0xff]  ;;  %v90_v23 = vld [vmem:[%s2391_s0 + $0x200] sm:$0xff]  ;;  %v1494_v28 = vpack.c.bf16 %v225_v18, %v224_v17 }
  0x37   :  { %1453 = vmatpush3.bf16.msra.mxu0 %v1452_v48  ;;  %338 = vmatprep.mubr.f32.mxu0 %v72_v55  ;;  %v208_v25 = vld [vmem:[%s2392_s1 + $0x370] sm:$0xff]  ;;  %v209_v26 = vld [vmem:[%s2392_s1 + $0x378] sm:$0xff]  ;;  %v226_v29 = vld [vmem:[%s2392_s1 + $0x400] sm:$0xff]  ;;  %v1464_v32 = vpack.c.bf16 %v177_v22, %v176_v21 }
  0x38   :  { %439 = vmatmul.mubr.f32.gmra.mrb[8].mxu1 %v64_v51  ;;  %1455 = vmatprep.subr.bf16.mxu0 %v1454_v56  ;;  %v92_v27 = vld [vmem:[%s2391_s0 + $0x210] sm:$0xff]  ;;  %v227_v30 = vld [vmem:[%s2392_s1 + $0x408] sm:$0xff]  ;;  %v89_v31 = vld [vmem:[%s2391_s0 + $0x1f8] sm:$0xff]  ;;  %v1496_v34 = vpack.c.bf16 %v209_v26, %v208_v25 }
  0x39   :  { %1485 = vmatpush3.bf16.msra.mxu1 %v1484_v52  ;;  %443 = vmatprep.mubr.f32.mxu1 %v74_v59  ;;  %v91_v33 = vld [vmem:[%s2391_s0 + $0x208] sm:$0xff]  ;;  %v1498_v36 = vpack.c.bf16 %v227_v30, %v226_v29  ;;  %v228_v37 = vld [vmem:[%s2392_s1 + $0x410] sm:$0xff]  ;;  %v229_v38 = vld [vmem:[%s2392_s1 + $0x418] sm:$0xff] }
  0x3a   :  { %339 = vmatmul.mubr.f32.gmra.mrb[10].mxu0 %v71_v63  ;;  %1487 = vmatprep.subr.bf16.mxu1 %v1486_v60  ;;  %v31_v35 = vld [vmem:[%s2391_s0 + $0x28] sm:$0xff]  ;;  %v33_v39 = vld [vmem:[%s2391_s0 + $0x38] sm:$0xff]  ;;  %v30_v40 = vld [vmem:[%s2391_s0 + $0x20] sm:$0xff]  ;;  %v1502_v42 = vpack.c.bf16 %v229_v38, %v228_v37 }
  0x3b   :  { %1457 = vmatpush3.bf16.msra.mxu0 %v1456_v0  ;;  %343 = vmatprep.mubr.f32.mxu0 %v81_v7  ;;  %v32_v41 = vld [vmem:[%s2391_s0 + $0x30] sm:$0xff]  ;;  %v230_v44 = vld [vmem:[%s2392_s1 + $0x420] sm:$0xff]  ;;  %v231_v45 = vld [vmem:[%s2392_s1 + $0x428] sm:$0xff] }
  0x3c   :  { %444 = vmatmul.mubr.f32.gmra.mrb[10].mxu1 %v73_v3  ;;  %1459 = vmatprep.subr.bf16.mxu0 %v1458_v8  ;;  %v40_v43 = vld [vmem:[%s2391_s0 + $0x70] sm:$0xff]  ;;  %v42_v46 = vld [vmem:[%s2391_s0 + $0x80] sm:$0xff]  ;;  %v39_v47 = vld [vmem:[%s2391_s0 + $0x68] sm:$0xff]  ;;  %v1506_v49 = vpack.c.bf16 %v231_v45, %v230_v44 }
  0x3d   :  { %1489 = vmatpush3.bf16.msra.mxu1 %v1488_v4  ;;  %448 = vmatprep.mubr.f32.mxu1 %v83_v11  ;;  %v41_v48 = vld [vmem:[%s2391_s0 + $0x78] sm:$0xff]  ;;  %v232_v51 = vld [vmem:[%s2392_s1 + $0x430] sm:$0xff]  ;;  %v51_v53 = vld [vmem:[%s2391_s0 + $0xc8] sm:$0xff] }
  0x3e   :  { %344 = vmatmul.mubr.f32.gmra.mrb[12].mxu0 %v80_v15  ;;  %1491 = vmatprep.subr.bf16.mxu1 %v1490_v12  ;;  %v49_v50 = vld [vmem:[%s2391_s0 + $0xb8] sm:$0xff]  ;;  %v48_v54 = vld [vmem:[%s2391_s0 + $0xb0] sm:$0xff] }
  0x3f   :  { %1461 = vmatpush3.bf16.msra.mxu0 %v1460_v16  ;;  %348 = vmatprep.mubr.f32.mxu0 %v90_v23  ;;  %v233_v52 = vld [vmem:[%s2392_s1 + $0x438] sm:$0xff] }
  0x40   :  { %449 = vmatmul.mubr.f32.gmra.mrb[12].mxu1 %v82_v19  ;;  %1463 = vmatprep.subr.bf16.mxu0 %v1462_v24 }
  0x41   :  { %1493 = vmatpush3.bf16.msra.mxu1 %v1492_v20  ;;  %453 = vmatprep.mubr.f32.mxu1 %v92_v27 }
  0x42   :  { %349 = vmatmul.mubr.f32.gmra.mrb[14].mxu0 %v89_v31  ;;  %1495 = vmatprep.subr.bf16.mxu1 %v1494_v28 }
  0x43   :  { %1465 = vmatpush3.bf16.msra.mxu0 %v1464_v32  ;;  %523 = vmatprep.mubr.f32.mxu0 %v31_v35 }
  0x44   :  { %454 = vmatmul.mubr.f32.gmra.mrb[14].mxu1 %v91_v33  ;;  %1499 = vmatprep.subr.bf16.mxu0 %v1498_v36 }
  0x45   :  { %1497 = vmatpush3.bf16.msra.mxu1 %v1496_v34  ;;  %628 = vmatprep.mubr.f32.mxu1 %v33_v39 }
  0x46   :  { %524 = vmatmul.mubr.f32.vlgmr.msra.gmra.mrb[16].mxu0 %v30_v40 }
  0x47   :  { %1501 = vmatpush3.bf16.msra.mxu0 %v1498_v36  ;;  %528 = vmatprep.mubr.f32.mxu0 %v40_v43 }
  0x48   :  { %629 = vmatmul.mubr.f32.vlgmr.msra.gmra.mrb[16].mxu1 %v32_v41  ;;  %1503 = vmatprep.subr.bf16.mxu0 %v1502_v42 }
  0x49   :  { %633 = vmatprep.mubr.f32.mxu1 %v42_v46 }
  0x4a   :  { %529 = vmatmul.mubr.f32.gmra.mrb[18].mxu0 %v39_v47 }
  0x4b   :  { %1505 = vmatpush3.bf16.msra.mxu0 %v1502_v42 }
  0x4c   :  { %634 = vmatmul.mubr.f32.gmra.mrb[18].mxu1 %v41_v48 }
  0x4d   :  { %15 = vsyncpa [#allocation6], 0  ;;  %533 = vmatprep.mubr.f32.mxu0 %v49_v50  ;;  %1507 = vmatprep.subr.bf16.mxu0 %v1506_v49  ;;  %v50_v55 = vld [vmem:[%s2391_s0 + $0xc0] sm:$0xff]  ;;  %v1510_v56 = vpack.c.bf16 %v233_v52, %v232_v51  ;;  %v235_v59 = vld [vmem:[%s2392_s1 + $0x448] sm:$0xff]  ;;  %v1617_v36 = vmov 0.0|0.0   ;;  %vm1618_vm0 = vmmov 0  }
  0x4e   :  { %638 = vmatprep.mubr.f32.mxu1 %v51_v53  ;;  %v58_v57 = vld [vmem:[%s2391_s0 + $0x100] sm:$0xff]  ;;  %534 = vmatmul.mubr.f32.gmra.mrb[20].mxu0 %v48_v54  ;;  %v60_v60 = vld [vmem:[%s2391_s0 + $0x110] sm:$0xff]  ;;  %v57_v61 = vld [vmem:[%s2391_s0 + $0xf8] sm:$0xff]  ;;  %vm857_vm9 = vcmask 1041409   ;;  %vm859_vm10 = vcmask 1042434   ;;  %vm861_vm11 = vcmask 1043459  }
  0x4f   :  { %v234_v58 = vld [vmem:[%s2392_s1 + $0x440] sm:$0xff]  ;;  %1509 = vmatpush3.bf16.msra.mxu0 %v1506_v49  ;;  %538 = vmatprep.mubr.f32.mxu0 %v58_v57  ;;  %v59_v62 = vld [vmem:[%s2391_s0 + $0x108] sm:$0xff]  ;;  %v236_v1 = vld [vmem:[%s2392_s1 + $0x450] sm:$0xff]  ;;  %vm953_vm13 = vcmask 1024   ;;  %s1621_s12 = smov [#allocation3]   ;;  %vm981_vm14 = vcmask 0  }
  0x50   :  { %639 = vmatmul.mubr.f32.gmra.mrb[20].mxu1 %v50_v55  ;;  %1511 = vmatprep.subr.bf16.mxu0 %v1510_v56  ;;  %v1514_v63 = vpack.c.bf16 %v235_v59, %v234_v58  ;;  %v67_v0 = vld [vmem:[%s2391_s0 + $0x148] sm:$0xff]  ;;  %v237_v2 = vld [vmem:[%s2392_s1 + $0x458] sm:$0xff]  ;;  %v66_v4 = vld [vmem:[%s2391_s0 + $0x140] sm:$0xff]  ;;  %v1619_v58 = vmov 0.0   ;;  %s1002_s13 = sshll.u32 %s1621_s12, 4  ;;  %s2359_s13 = int_to_ptr.vmem [resolvable:$true] %s1002_s13 }
  0x51   :  { %643 = vmatprep.mubr.f32.mxu1 %v60_v60  ;;  %v69_v3 = vld [vmem:[%s2391_s0 + $0x158] sm:$0xff]  ;;  %v68_v5 = vld [vmem:[%s2391_s0 + $0x150] sm:$0xff]  ;;  %v1518_v6 = vpack.c.bf16 %v237_v2, %v236_v1  ;;  %v238_v8 = vld [vmem:[%s2392_s1 + $0x460] sm:$0xff]  ;;  %1530 = vmatprep.subr.bf16.mxu1 %v1617_v36 }
  0x52   :  { %539 = vmatmul.mubr.f32.gmra.mrb[22].mxu0 %v57_v61  ;;  %v76_v7 = vld [vmem:[%s2391_s0 + $0x190] sm:$0xff]  ;;  %v239_v9 = vld [vmem:[%s2392_s1 + $0x468] sm:$0xff]  ;;  %v78_v10 = vld [vmem:[%s2391_s0 + $0x1a0] sm:$0xff] }
  0x53   :  { %1513 = vmatpush3.bf16.msra.mxu0 %v1510_v56  ;;  %543 = vmatprep.mubr.f32.mxu0 %v67_v0  ;;  %v75_v11 = vld [vmem:[%s2391_s0 + $0x188] sm:$0xff]  ;;  %v77_v12 = vld [vmem:[%s2391_s0 + $0x198] sm:$0xff]  ;;  %v1522_v13 = vpack.c.bf16 %v239_v9, %v238_v8  ;;  %v240_v15 = vld [vmem:[%s2392_s1 + $0x470] sm:$0xff] }
  0x54   :  { %644 = vmatmul.mubr.f32.gmra.mrb[22].mxu1 %v59_v62  ;;  %1515 = vmatprep.subr.bf16.mxu0 %v1514_v63  ;;  %v85_v14 = vld [vmem:[%s2391_s0 + $0x1d8] sm:$0xff]  ;;  %v87_v17 = vld [vmem:[%s2391_s0 + $0x1e8] sm:$0xff]  ;;  %v84_v18 = vld [vmem:[%s2391_s0 + $0x1d0] sm:$0xff] }
  0x55   :  { %648 = vmatprep.mubr.f32.mxu1 %v69_v3  ;;  %v241_v16 = vld [vmem:[%s2392_s1 + $0x478] sm:$0xff]  ;;  %v86_v19 = vld [vmem:[%s2391_s0 + $0x1e0] sm:$0xff]  ;;  %v96_v22 = vld [vmem:[%s2391_s0 + $0x230] sm:$0xff] }
  0x56   :  { %544 = vmatmul.mubr.f32.gmra.mrb[24].mxu0 %v66_v4  ;;  %v1526_v20 = vpack.c.bf16 %v241_v16, %v240_v15  ;;  %v94_v21 = vld [vmem:[%s2391_s0 + $0x220] sm:$0xff]  ;;  %v93_v23 = vld [vmem:[%s2391_s0 + $0x218] sm:$0xff]  ;;  %v95_v24 = vld [vmem:[%s2391_s0 + $0x228] sm:$0xff] }
  0x57   :  { %1517 = vmatpush3.bf16.msra.mxu0 %v1514_v63  ;;  %548 = vmatprep.mubr.f32.mxu0 %v76_v7  ;;  %v34_v25 = vld [vmem:[%s2391_s0 + $0x40] sm:$0xff]  ;;  %v43_v26 = vld [vmem:[%s2391_s0 + $0x88] sm:$0xff]  ;;  %v52_v27 = vld [vmem:[%s2391_s0 + $0xd0] sm:$0xff] }
  0x58   :  { %649 = vmatmul.mubr.f32.gmra.mrb[24].mxu1 %v68_v5  ;;  %1519 = vmatprep.subr.bf16.mxu0 %v1518_v6  ;;  %v61_v28 = vld [vmem:[%s2391_s0 + $0x118] sm:$0xff]  ;;  %v70_v29 = vld [vmem:[%s2391_s0 + $0x160] sm:$0xff]  ;;  %v79_v30 = vld [vmem:[%s2391_s0 + $0x1a8] sm:$0xff] }
  0x59   :  { %653 = vmatprep.mubr.f32.mxu1 %v78_v10  ;;  %v88_v31 = vld [vmem:[%s2391_s0 + $0x1f0] sm:$0xff]  ;;  %v97_v32 = vld [vmem:[%s2391_s0 + $0x238] sm:$0xff]  ;;  %v830_v33 = vld [vmem:[%s2394_s3] sm:$0xff]  ;;  %s1620_s0 = smov [#allocation5]  }
  0x5a   :  { %549 = vmatmul.mubr.f32.gmra.mrb[26].mxu0 %v75_v11  ;;  %v831_v34 = vld [vmem:[%s2394_s3 + $0x8] sm:$0xff]  ;;  %v832_v37 = vld [vmem:[%s2394_s3 + $0x10] sm:$0xff]  ;;  %v833_v38 = vld [vmem:[%s2394_s3 + $0x18] sm:$0xff]  ;;  %s1012_s10 = sshll.u32 %s1620_s0, 4  ;;  %s1013_s10 = int_to_ptr.vmem [resolvable:$true] %s1012_s10 }
  0x5b   :  { %1521 = vmatpush3.bf16.msra.mxu0 %v1518_v6  ;;  %553 = vmatprep.mubr.f32.mxu0 %v85_v14  ;;  %v1531_v35 = vpack.c.bf16 %v831_v34, %v830_v33  ;;  %v1534_v39 = vpack.c.bf16 %v833_v38, %v832_v37  ;;  %v834_v40 = vld [vmem:[%s2394_s3 + $0x20] sm:$0xff]  ;;  %v835_v41 = vld [vmem:[%s2394_s3 + $0x28] sm:$0xff]  ;;  %v836_v43 = vld [vmem:[%s2394_s3 + $0x30] sm:$0xff]  ;;  %s1569_s14 = scalar_lea.vmem %s1013_s10, 16  ;;  %s1573_s15 = scalar_lea.vmem %s1013_s10, 32 }
  0x5c   :  { %654 = vmatmul.mubr.f32.gmra.mrb[26].mxu1 %v77_v12  ;;  %1523 = vmatprep.subr.bf16.mxu0 %v1522_v13  ;;  %v1537_v42 = vpack.c.bf16 %v835_v41, %v834_v40  ;;  %v837_v44 = vld [vmem:[%s2394_s3 + $0x38] sm:$0xff]  ;;  %v838_v46 = vld [vmem:[%s2394_s3 + $0x40] sm:$0xff]  ;;  %v839_v47 = vld [vmem:[%s2394_s3 + $0x48] sm:$0xff]  ;;  %p1570_p0 = scmp.ne.s32.totalorder %s1013_s10, %s1569_s14  ;;  %p1574_p1 = scmp.lt.s32.totalorder %s1013_s10, %s1013_s10 }
  0x5d   :  { %658 = vmatprep.mubr.f32.mxu1 %v87_v17  ;;  %1532 = vmatpush3.bf16.msra.mxu1 %v1531_v35  ;;  %v1540_v45 = vpack.c.bf16 %v837_v44, %v836_v43  ;;  %v1543_v48 = vpack.c.bf16 %v839_v47, %v838_v46  ;;  %v840_v49 = vld [vmem:[%s2394_s3 + $0x50] sm:$0xff]  ;;  %v841_v50 = vld [vmem:[%s2394_s3 + $0x58] sm:$0xff]  ;;  %v842_v52 = vld [vmem:[%s2394_s3 + $0x60] sm:$0xff]  ;;  %p1575_p2 = scmp.lt.s32.totalorder %s1573_s15, %s1569_s14 }
  0x5e   :  { %554 = vmatmul.mubr.f32.gmra.mrb[28].mxu0 %v84_v18  ;;  %1533 = vmatprep.subr.bf16.mxu1 %v1617_v36  ;;  %v1546_v51 = vpack.c.bf16 %v841_v50, %v840_v49  ;;  %v843_v53 = vld [vmem:[%s2394_s3 + $0x68] sm:$0xff]  ;;  %v844_v55 = vld [vmem:[%s2394_s3 + $0x70] sm:$0xff]  ;;  %v845_v56 = vld [vmem:[%s2394_s3 + $0x78] sm:$0xff] }
  0x5f   :  { %1525 = vmatpush3.bf16.msra.mxu0 %v1522_v13  ;;  %558 = vmatprep.mubr.f32.mxu0 %v94_v21  ;;  %v1549_v54 = vpack.c.bf16 %v843_v53, %v842_v52  ;;  %v1552_v57 = vpack.c.bf16 %v845_v56, %v844_v55  ;;  %v1024_v60 = vld [vmem:[%s2393_s2] ss:$0 sm:$0xff]  ;;  %p1576_p3 = por %p1575_p2, %p1574_p1 }
  0x60   :  { %659 = vmatmul.mubr.f32.gmra.mrb[28].mxu1 %v86_v19  ;;  %1527 = vmatprep.subr.bf16.mxu0 %v1526_v20 }
  0x61   :  { %663 = vmatprep.mubr.f32.mxu1 %v96_v22  ;;  %1535 = vmatpush3.bf16.msra.mxu1 %v1534_v39  ;;  %p1577_p4 = pnand %p1576_p3, %p1570_p0 }
  0x62   :  { %559 = vmatmul.mubr.f32.gmra.mrb[30].mxu0 %v93_v23  ;;  %1536 = vmatprep.subr.bf16.mxu1 %v1617_v36 }
  0x63   :  { %1529 = vmatpush3.bf16.msra.mxu0 %v1526_v20  ;;  %1323 = vmatprep.mubr.f32.mxu0 %v34_v25 }
  0x64   :  { %664 = vmatmul.mubr.f32.gmra.mrb[30].mxu1 %v95_v24 }
  0x65   :  { %1538 = vmatpush3.bf16.msra.mxu1 %v1537_v42  ;;  %1367 = vmatprep.mubr.msk.f32.mxu1 %vm1618_vm0, %v1619_v58 }
  0x66   :  { %1324 = vmatmul.mubr.f32.vlgmr.msra.gmra.mrb[32].mxu0 %v43_v26  ;;  %1539 = vmatprep.subr.bf16.mxu1 %v1617_v36 }
  0x67   :  { %1326 = vmatprep.mubr.f32.mxu0 %v52_v27 }
  0x69   :  { %1541 = vmatpush3.bf16.msra.mxu1 %v1540_v45 }
  0x6a   :  { %1327 = vmatmul.mubr.f32.gmra.mrb[34].mxu0 %v61_v28  ;;  %1542 = vmatprep.subr.bf16.mxu1 %v1617_v36 }
  0x6b   :  { %1329 = vmatprep.mubr.f32.mxu0 %v70_v29 }
  0x6d   :  { %1544 = vmatpush3.bf16.msra.mxu1 %v1543_v48 }
  0x6e   :  { %1330 = vmatmul.mubr.f32.gmra.mrb[36].mxu0 %v79_v30  ;;  %1545 = vmatprep.subr.bf16.mxu1 %v1617_v36 }
  0x6f   :  { %1332 = vmatprep.mubr.f32.mxu0 %v88_v31 }
  0x71   :  { %1547 = vmatpush3.bf16.msra.mxu1 %v1546_v51 }
  0x72   :  { %1333 = vmatmul.mubr.f32.gmra.mrb[38].mxu0 %v97_v32  ;;  %1548 = vmatprep.subr.bf16.mxu1 %v1617_v36 }
  0x75   :  { %1550 = vmatpush3.bf16.msra.mxu1 %v1549_v54 }
  0x76   :  { %1551 = vmatprep.subr.bf16.mxu1 %v1617_v36 }
  0x79   :  { %1553 = vmatpush3.bf16.msra.mxu1 %v1552_v57 }
  0xf9   :  { %v1058_v59 = vpop.f32.mrb[0].mxu0 }
  0xfa   :  { %v1059_v61 = vpop.f32.mrb[1].mxu0 }
  0xfb   :  { %v1114_v62 = vpop.f32.mrb[0].mxu1  ;;  %v1060_v63 = vadd.f32 %v1059_v61, %v1058_v59 }
  0xfc   :  { %v1115_v0 = vpop.f32.mrb[1].mxu1 }
  0xfd   :  { %v1116_v1 = vadd.f32 %v1115_v0, %v1114_v62  ;;  %v316_v2 = vadd.f32 %v1060_v63, %v1024_v60  ;;  %v1061_v3 = vpop.f32.mrb[2].mxu0 }
  0xfe   :  { %v1062_v4 = vpop.f32.mrb[3].mxu0 }
  0xff   :  { %v1117_v5 = vpop.f32.mrb[2].mxu1  ;;  %v421_v6 = vadd.f32 %v1116_v1, %v316_v2  ;;  %v1063_v7 = vadd.f32 %v1062_v4, %v1061_v3 }
 0x100   :  { %v1118_v8 = vpop.f32.mrb[3].mxu1 }
 0x101   :  { %v1119_v9 = vadd.f32 %v1118_v8, %v1117_v5  ;;  %v321_v10 = vadd.f32 %v1063_v7, %v1024_v60  ;;  %v1064_v11 = vpop.f32.mrb[4].mxu0 }
 0x102   :  { %v1065_v12 = vpop.f32.mrb[5].mxu0 }
 0x103   :  { %v1120_v13 = vpop.f32.mrb[4].mxu1  ;;  %v426_v14 = vadd.f32 %v1119_v9, %v321_v10  ;;  %v1066_v15 = vadd.f32 %v1065_v12, %v1064_v11 }
 0x104   :  { %v1121_v16 = vpop.f32.mrb[5].mxu1 }
 0x105   :  { %v1122_v17 = vadd.f32 %v1121_v16, %v1120_v13  ;;  %v326_v18 = vadd.f32 %v1066_v15, %v1024_v60  ;;  %v1067_v19 = vpop.f32.mrb[6].mxu0 }
 0x106   :  { %v1068_v20 = vpop.f32.mrb[7].mxu0 }
 0x107   :  { %v1123_v21 = vpop.f32.mrb[6].mxu1  ;;  %v431_v22 = vadd.f32 %v1122_v17, %v326_v18  ;;  %v1069_v23 = vadd.f32 %v1068_v20, %v1067_v19 }
 0x108   :  { %v1124_v24 = vpop.f32.mrb[7].mxu1 }
 0x109   :  { %v1125_v25 = vadd.f32 %v1124_v24, %v1123_v21  ;;  %v331_v26 = vadd.f32 %v1069_v23, %v1024_v60  ;;  %v1070_v27 = vpop.f32.mrb[8].mxu0 }
 0x10a   :  { %v1071_v28 = vpop.f32.mrb[9].mxu0 }
 0x10b   :  { %v1126_v29 = vpop.f32.mrb[8].mxu1  ;;  %v436_v30 = vadd.f32 %v1125_v25, %v331_v26  ;;  %v1072_v31 = vadd.f32 %v1071_v28, %v1070_v27 }
 0x10c   :  { %v1127_v32 = vpop.f32.mrb[9].mxu1 }
 0x10d   :  { %v1128_v33 = vadd.f32 %v1127_v32, %v1126_v29  ;;  %v336_v34 = vadd.f32 %v1072_v31, %v1024_v60  ;;  %v1073_v35 = vpop.f32.mrb[10].mxu0 }
 0x10e   :  { %v1074_v36 = vpop.f32.mrb[11].mxu0 }
 0x10f   :  { %v1129_v37 = vpop.f32.mrb[10].mxu1  ;;  %v441_v38 = vadd.f32 %v1128_v33, %v336_v34  ;;  %v1075_v39 = vadd.f32 %v1074_v36, %v1073_v35 }
 0x110   :  { %v1130_v40 = vpop.f32.mrb[11].mxu1 }
 0x111   :  { %v1131_v41 = vadd.f32 %v1130_v40, %v1129_v37  ;;  %v341_v42 = vadd.f32 %v1075_v39, %v1024_v60  ;;  %v1076_v43 = vpop.f32.mrb[12].mxu0 }
 0x112   :  { %v1077_v44 = vpop.f32.mrb[13].mxu0 }
 0x113   :  { %v1132_v45 = vpop.f32.mrb[12].mxu1  ;;  %v446_v46 = vadd.f32 %v1131_v41, %v341_v42  ;;  %v1078_v47 = vadd.f32 %v1077_v44, %v1076_v43 }
 0x114   :  { %v1133_v48 = vpop.f32.mrb[13].mxu1 }
 0x115   :  { %v1134_v49 = vadd.f32 %v1133_v48, %v1132_v45  ;;  %v346_v50 = vadd.f32 %v1078_v47, %v1024_v60  ;;  %v1079_v51 = vpop.f32.mrb[14].mxu0 }
 0x116   :  { %v1080_v52 = vpop.f32.mrb[15].mxu0 }
 0x117   :  { %v1135_v53 = vpop.f32.mrb[14].mxu1  ;;  %v451_v54 = vadd.f32 %v1134_v49, %v346_v50  ;;  %v1081_v55 = vadd.f32 %v1080_v52, %v1079_v51 }
 0x118   :  { %v1136_v56 = vpop.f32.mrb[15].mxu1 }
 0x119   :  { %v1137_v57 = vadd.f32 %v1136_v56, %v1135_v53  ;;  %v351_v58 = vadd.f32 %v1081_v55, %v1024_v60  ;;  %v1170_v59 = vpop.f32.mrb[16].mxu0 }
 0x11a   :  { %v1171_v61 = vpop.f32.mrb[17].mxu0 }
 0x11b   :  { %v1226_v62 = vpop.f32.mrb[16].mxu1  ;;  %v456_v63 = vadd.f32 %v1137_v57, %v351_v58  ;;  %v1172_v0 = vadd.f32 %v1171_v61, %v1170_v59 }
 0x11c   :  { %v1227_v1 = vpop.f32.mrb[17].mxu1 }
 0x11d   :  { %v1228_v2 = vadd.f32 %v1227_v1, %v1226_v62  ;;  %v526_v3 = vadd.f32 %v1172_v0, %v421_v6  ;;  %v1173_v4 = vpop.f32.mrb[18].mxu0 }
 0x11e   :  { %v1174_v5 = vpop.f32.mrb[19].mxu0 }
 0x11f   :  { %v1229_v7 = vpop.f32.mrb[18].mxu1  ;;  %v1175_v8 = vadd.f32 %v1174_v5, %v1173_v4  ;;  %v631_v10 = vadd.f32 %v1228_v2, %v526_v3 }
 0x120   :  { %v1230_v9 = vpop.f32.mrb[19].mxu1 }
 0x121   :  { %v1231_v11 = vadd.f32 %v1230_v9, %v1229_v7  ;;  %v531_v12 = vadd.f32 %v1175_v8, %v426_v14  ;;  %v1176_v13 = vpop.f32.mrb[20].mxu0 }
 0x122   :  { %v1177_v15 = vpop.f32.mrb[21].mxu0 }
 0x123   :  { %v1232_v16 = vpop.f32.mrb[20].mxu1  ;;  %v1178_v60 = vadd.f32 %v1177_v15, %v1176_v13  ;;  %v636_v18 = vadd.f32 %v1231_v11, %v531_v12 }
 0x124   :  { %v1233_v17 = vpop.f32.mrb[21].mxu1 }
 0x125   :  { %v1234_v19 = vadd.f32 %v1233_v17, %v1232_v16  ;;  %v536_v20 = vadd.f32 %v1178_v60, %v431_v22  ;;  %v1179_v21 = vpop.f32.mrb[22].mxu0 }
 0x126   :  { %v1180_v23 = vpop.f32.mrb[23].mxu0 }
 0x127   :  { %v1235_v24 = vpop.f32.mrb[22].mxu1  ;;  %v1181_v6 = vadd.f32 %v1180_v23, %v1179_v21  ;;  %v641_v26 = vadd.f32 %v1234_v19, %v536_v20 }
 0x128   :  { %v1236_v25 = vpop.f32.mrb[23].mxu1 }
 0x129   :  { %v1237_v27 = vadd.f32 %v1236_v25, %v1235_v24  ;;  %v541_v28 = vadd.f32 %v1181_v6, %v436_v30  ;;  %v1182_v29 = vpop.f32.mrb[24].mxu0 }
 0x12a   :  { %v1183_v31 = vpop.f32.mrb[25].mxu0 }
 0x12b   :  { %v1238_v32 = vpop.f32.mrb[24].mxu1  ;;  %v1184_v14 = vadd.f32 %v1183_v31, %v1182_v29  ;;  %v646_v34 = vadd.f32 %v1237_v27, %v541_v28 }
 0x12c   :  { %v1239_v33 = vpop.f32.mrb[25].mxu1 }
 0x12d   :  { %v1240_v35 = vadd.f32 %v1239_v33, %v1238_v32  ;;  %v546_v36 = vadd.f32 %v1184_v14, %v441_v38  ;;  %v1185_v37 = vpop.f32.mrb[26].mxu0 }
 0x12e   :  { %v1186_v39 = vpop.f32.mrb[27].mxu0 }
 0x12f   :  { %v1241_v40 = vpop.f32.mrb[26].mxu1  ;;  %v1187_v22 = vadd.f32 %v1186_v39, %v1185_v37  ;;  %v651_v42 = vadd.f32 %v1240_v35, %v546_v36 }
 0x130   :  { %v1242_v41 = vpop.f32.mrb[27].mxu1 }
 0x131   :  { %v1243_v43 = vadd.f32 %v1242_v41, %v1241_v40  ;;  %v551_v44 = vadd.f32 %v1187_v22, %v446_v46  ;;  %v1188_v45 = vpop.f32.mrb[28].mxu0 }
 0x132   :  { %v1189_v47 = vpop.f32.mrb[29].mxu0 }
 0x133   :  { %v1244_v48 = vpop.f32.mrb[28].mxu1  ;;  %v1190_v30 = vadd.f32 %v1189_v47, %v1188_v45  ;;  %v656_v50 = vadd.f32 %v1243_v43, %v551_v44 }
 0x134   :  { %v1245_v49 = vpop.f32.mrb[29].mxu1 }
 0x135   :  { %v1246_v51 = vadd.f32 %v1245_v49, %v1244_v48  ;;  %v556_v52 = vadd.f32 %v1190_v30, %v451_v54  ;;  %v1191_v53 = vpop.f32.mrb[30].mxu0 }
 0x136   :  { %v1192_v55 = vpop.f32.mrb[31].mxu0 }
 0x137   :  { %v1247_v56 = vpop.f32.mrb[30].mxu1  ;;  %v1193_v38 = vadd.f32 %v1192_v55, %v1191_v53  ;;  %v661_v58 = vadd.f32 %v1246_v51, %v556_v52 }
 0x138   :  { %v1248_v57 = vpop.f32.mrb[31].mxu1 }
 0x139   :  { %v1249_v59 = vadd.f32 %v1248_v57, %v1247_v56  ;;  %v561_v61 = vadd.f32 %v1193_v38, %v456_v63  ;;  %v1325_v62 = vpop.f32.mrb[32].mxu0 }
 0x13a   :  { %v741_v0 = vadd.f32 %v1325_v62, %v636_v18  ;;  %v735_v1 = vpop.f32.mrb[33].mxu0 }
 0x13b   :  { %v736_v46 = vadd.f32 %v735_v1, %v631_v10  ;;  %v666_v2 = vadd.f32 %v1249_v59, %v561_v61 }
 0x13c   :  { %vm775_vm1 = vcmp.gt.f32.partialorder %v741_v0, 0.0  ;;  %v783_v3 = vmul.f32 0.2, %v741_v0 }
 0x13d   :  { %vm774_vm2 = vcmp.gt.f32.partialorder %v736_v46, 0.0  ;;  %v782_v4 = vmul.f32 0.2, %v736_v46  ;;  %v1328_v5 = vpop.f32.mrb[34].mxu0 }
 0x13e   :  { %v791_v7 = vsel %vm775_vm1, %v741_v0, %v783_v3  ;;  %v751_v54 = vadd.f32 %v1328_v5, %v646_v34  ;;  %v745_v8 = vpop.f32.mrb[35].mxu0 }
 0x13f   :  { %v790_v9 = vsel %vm774_vm2, %v736_v46, %v782_v4  ;;  %v746_v11 = vadd.f32 %v745_v8, %v641_v26 }
 0x140   :  { %v798_v12 = vadd.f32 %v791_v7, %v790_v9  ;;  %vm777_vm3 = vcmp.gt.f32.partialorder %v751_v54, 0.0  ;;  %v785_v13 = vmul.f32 0.2, %v751_v54 }
 0x141   :  { %vm776_vm4 = vcmp.gt.f32.partialorder %v746_v11, 0.0  ;;  %v784_v63 = vmul.f32 0.2, %v746_v11  ;;  %v1331_v15 = vpop.f32.mrb[36].mxu0 }
 0x142   :  { %v799_v16 = vrot.slane %v798_v12, 4  ;;  %v793_v60 = vsel %vm777_vm3, %v751_v54, %v785_v13  ;;  %v761_v10 = vadd.f32 %v1331_v15, %v656_v50  ;;  %v755_v17 = vpop.f32.mrb[37].mxu0 }
 0x143   :  { %v792_v18 = vsel %vm776_vm4, %v746_v11, %v784_v63  ;;  %v756_v19 = vadd.f32 %v755_v17, %v651_v42 }
 0x144   :  { %v800_v20 = vadd.f32 %v799_v16, %v798_v12  ;;  %v805_v21 = vadd.f32 %v793_v60, %v792_v18  ;;  %vm779_vm5 = vcmp.gt.f32.partialorder %v761_v10, 0.0  ;;  %v787_v23 = vmul.f32 0.2, %v761_v10 }
 0x145   :  { %vm778_vm6 = vcmp.gt.f32.partialorder %v756_v19, 0.0  ;;  %v786_v24 = vmul.f32 0.2, %v756_v19  ;;  %v1334_v6 = vpop.f32.mrb[38].mxu0 }
 0x146   :  { %v801_v25 = vrot.slane %v800_v20, 2  ;;  %v806_v26 = vrot.slane %v805_v21, 4  ;;  %v795_v27 = vsel %vm779_vm5, %v761_v10, %v787_v23  ;;  %v771_v28 = vadd.f32 %v1334_v6, %v666_v2  ;;  %v765_v29 = vpop.f32.mrb[39].mxu0  ;;  %v1025_v2 = vld [vmem:[#allocation2] ss:$0 sm:$0xff] }
 0x147   :  { %v794_v31 = vsel %vm778_vm6, %v756_v19, %v786_v24  ;;  %v766_v32 = vadd.f32 %v765_v29, %v661_v58 }
 0x148   :  { %v802_v14 = vadd.f32 %v801_v25, %v800_v20  ;;  %v807_v33 = vadd.f32 %v806_v26, %v805_v21  ;;  %v812_v34 = vadd.f32 %v795_v27, %v794_v31  ;;  %vm781_vm7 = vcmp.gt.f32.partialorder %v771_v28, 0.0 }
 0x149   :  { %v789_v35 = vmul.f32 0.2, %v771_v28  ;;  %vm780_vm8 = vcmp.gt.f32.partialorder %v766_v32, 0.0  ;;  %v788_v36 = vmul.f32 0.2, %v766_v32 }
 0x14a   :  { %v803_v37 = vrot.slane %v802_v14, 1  ;;  %v808_v39 = vrot.slane %v807_v33, 2  ;;  %v813_v40 = vrot.slane %v812_v34, 4 }
 0x14b   :  { %v797_v22 = vsel %vm781_vm7, %v771_v28, %v789_v35  ;;  %v796_v41 = vsel %vm780_vm8, %v766_v32, %v788_v36 }
 0x14c   :  { %v809_v42 = vadd.f32 %v808_v39, %v807_v33  ;;  %v814_v43 = vadd.f32 %v813_v40, %v812_v34  ;;  %v819_v44 = vadd.f32 %v797_v22, %v796_v41  ;;  %v804_v45 = vadd.f32 %v803_v37, %v802_v14 }
 0x14e   :  { %v810_v47 = vrot.slane %v809_v42, 1  ;;  %v815_v48 = vrot.slane %v814_v43, 2  ;;  %v820_v30 = vrot.slane %v819_v44, 4  ;;  %v826_v52 = vmul.f32 0.0625, %v804_v45 }
 0x150   :  { %v811_v49 = vadd.f32 %v810_v47, %v809_v42  ;;  %v816_v50 = vadd.f32 %v815_v48, %v814_v43  ;;  %v821_v51 = vadd.f32 %v820_v30, %v819_v44 }
 0x152   :  { %v827_v53 = vmul.f32 0.0625, %v811_v49  ;;  %v817_v55 = vrot.slane %v816_v50, 1  ;;  %v822_v56 = vrot.slane %v821_v51, 2 }
 0x154   :  { %v818_v38 = vadd.f32 %v817_v55, %v816_v50  ;;  %v823_v57 = vadd.f32 %v822_v56, %v821_v51  ;;  %v858_v58 = vsel %vm857_vm9, %v827_v53, %v826_v52 }
 0x156   :  { %v824_v59 = vrot.slane %v823_v57, 1  ;;  %v828_v61 = vmul.f32 0.0625, %v818_v38 }
 0x158   :  { %v825_v62 = vadd.f32 %v824_v59, %v823_v57  ;;  %v860_v0 = vsel %vm859_vm10, %v828_v61, %v858_v58 }
 0x15a   :  { %v829_v1 = vmul.f32 0.0625, %v825_v62 }
 0x15c   :  { %v862_v46 = vsel %vm861_vm11, %v829_v1, %v860_v0 }
 0x15d   :  { %1368 = vmatmul.mubr.f32.vlgmr.msra.gmra.mrb[32].mxu1 %v862_v46 }
 0x230   :  { %v930_v3 = vpop.f32.mrb[32].mxu1 }
 0x231   :  { %v931_v4 = vadd.f32 %v1025_v2, %v930_v3  ;;  %v1369_v5 = vpop.f32.mrb[33].mxu1 }
 0x233   :  { %v936_v7 = vand.u32 2147483647, %v931_v4  ;;  %v934_v63 = vmax.f32 %v931_v4, 0.0  ;;  %v965_v18 = vmul.f32 0.0, %v931_v4 }
 0x235   :  { %v937_v54 = vsub.f32 0.0, %v936_v7  ;;  %v935_v17 = vsub.f32 %v934_v63, %v931_v4  ;;  %v966_v24 = vsub.f32 %v934_v63, %v965_v18 }
 0x237   :  { %v938_v8 = vmul.f32 1.442695, %v937_v54 }
 0x239   :  { %1565 = vpow2.f32 %v938_v8 }
 0x243   :  { %v1566_v9 = vpop.eup %1565 }
 0x244   :  { %v940_v11 = vadd.f32 1.0, %v1566_v9  ;;  %v943_v12 = vmul.f32 -0.5, %v1566_v9  ;;  %v946_v15 = vand.u32 2147483647, %v1566_v9 }
 0x246   :  { %1567 = vlog2.f32 %v940_v11  ;;  %v944_v13 = vadd.f32 1.0, %v943_v12  ;;  %vm947_vm12 = vcmp.lt.f32.partialorder %v946_v15, 0.0004427343 }
 0x248   :  { %v945_v10 = vmul.f32 %v1566_v9, %v944_v13 }
 0x250   :  { %v1568_v16 = vpop.eup %1567 }
 0x251   :  { %v942_v60 = vmul.f32 0.6931472, %v1568_v16 }
 0x253   :  { %v948_v19 = vsel %vm947_vm12, %v945_v10, %v942_v60 }
 0x254   :  { %v949_v20 = vadd.f32 %v948_v19, %v935_v17  ;;  %v967_v25 = vadd.f32 %v966_v24, %v948_v19 }
 0x256   :  { %v983_v21 = vsel %vm953_vm13, %v949_v20, 0.0  ;;  %v951_v23 = vrot.slane %v949_v20, 2  ;;  %v968_v26 = vsel %vm953_vm13, %v967_v25, 0.0 }
 0x257   :  { %984 = vadd.xlane.f32.xlu1 %v983_v21 }
 0x258   :  { %v954_v6 = vsel %vm953_vm13, %v951_v23, 0.0 }
 0x259   :  { %955 = vadd.xlane.f32.xlu0 %v954_v6 }
 0x25d   :  { %969 = vadd.xlane.f32.xlu0 %v968_v26 }
 0x2e4   :  { %v985_v27 = vpop.xlane.xlu1 %984 }
 0x2e5   :  { %v986_v28 = vrot.slane %v985_v27, 4 }
 0x2e6   :  { %v956_v29 = vpop.xlane.xlu0 %955 }
 0x2e7   :  { %v987_v31 = vadd.f32 %v986_v28, %v985_v27  ;;  %v957_v32 = vrot.slane %v956_v29, 4 }
 0x2e9   :  { %v958_v14 = vadd.f32 %v957_v32, %v956_v29  ;;  %v988_v33 = vrot.slane %v987_v31, 2 }
 0x2ea   :  { %v970_v34 = vpop.xlane.xlu0 %969 }
 0x2eb   :  { %v959_v35 = vrot.slane %v958_v14, 2  ;;  %v971_v36 = vrot.slane %v970_v34, 4  ;;  %v989_v40 = vadd.f32 %v988_v33, %v987_v31 }
 0x2ed   :  { %v972_v37 = vadd.f32 %v971_v36, %v970_v34  ;;  %v960_v39 = vadd.f32 %v959_v35, %v958_v14  ;;  %v990_v44 = vrot.slane %v989_v40, 1 }
 0x2ef   :  { %v973_v22 = vrot.slane %v972_v37, 2  ;;  %v961_v41 = vrot.slane %v960_v39, 1  ;;  %v991_v48 = vadd.f32 %v990_v44, %v989_v40 }
 0x2f1   :  { %v974_v42 = vadd.f32 %v973_v22, %v972_v37  ;;  %v962_v43 = vadd.f32 %v961_v41, %v960_v39 }
 0x2f3   :  { %1554 = vpush %v962_v43  ;;  %v975_v45 = vrot.slane %v974_v42, 1 }
 0x2f5   :  { %v976_v47 = vadd.f32 %v975_v45, %v974_v42 }
 0x2f7   :  { %1556 = vpush %v976_v47 }
 0x2f8   :  { %1558 = vpush %v991_v48 }
 0x324   :  { %s1555_s2 = spop %1554 }
 0x325   :  { %v964_v30 = vstv %s1555_s2 }
 0x328   :  { %s1557_s3 = spop %1556 }
 0x329   :  { %v978_v49 = vstv %s1557_s3  ;;  %s1559_s11 = spop %1558 }
 0x32a   :  { %v979_v50 = vadd.f32 %v978_v49, %v964_v30  ;;  %v993_v51 = vstv %s1559_s11 }
 0x32b   :  { %v994_v52 = vmul.f32 0.5, %v993_v51 }
 0x32c   :  { %v980_v53 = vmul.f32 0.5, %v979_v50 }
 0x32d   :  { %995 = vst.msk [vmem:[#allocation5] sm:$0x1] %vm981_vm14, %v994_v52 }
 0x32e   :  { %982 = vst.msk [vmem:[#allocation3] sm:$0x1] %vm981_vm14, %v980_v53 }
 0x32f   :  { %1580 = shalt.err (!%p1577_p4)
}
 0x330   :  { %s1581_s18 = scalar_lea.hbm %s2397_s6, 16 }
 0x331   :  { %p1582_p5 = scmp.ne.s32.totalorder %s2397_s6, %s1581_s18  ;;  %p1585_p6 = scmp.lt.u32.totalorder %s1581_s18, %s2397_s6 }
 0x333   :  { %p1587_p7 = pnand %p1585_p6, %p1582_p5 }
 0x335   :  { %1590 = shalt.err (!%p1587_p7)
}
 0x336   :  { %1015 = dma.vmem_to_hbm [thread:$0]  %s1013_s10, 16, %s2397_s6, [#allocation6]  }
 0x337   :  { %s1591_s25 = scalar_lea.vmem %s2359_s13, 16  ;;  %s1595_s26 = scalar_lea.vmem %s2359_s13, 32 }
 0x338   :  { %p1592_p8 = scmp.ne.s32.totalorder %s2359_s13, %s1591_s25  ;;  %p1596_p9 = scmp.lt.s32.totalorder %s2359_s13, %s2359_s13 }
 0x339   :  { %p1597_p10 = scmp.lt.s32.totalorder %s1595_s26, %s1591_s25 }
 0x33b   :  { %p1598_p11 = por %p1597_p10, %p1596_p9 }
 0x33d   :  { %p1599_p12 = pnand %p1598_p11, %p1592_p8 }
 0x33f   :  { %1602 = shalt.err (!%p1599_p12)
}
 0x340   :  { %s1603_s29 = scalar_lea.hbm %s2396_s5, 16 }
 0x341   :  { %p1604_p13 = scmp.ne.s32.totalorder %s2396_s5, %s1603_s29  ;;  %p1607_p0 = scmp.lt.u32.totalorder %s1603_s29, %s2396_s5 }
 0x343   :  { %p1609_p1 = pnand %p1607_p0, %p1604_p13 }
 0x345   :  { %1612 = shalt.err (!%p1609_p1)
}
 0x346   :  { %1005 = dma.vmem_to_hbm [thread:$0]  %s2359_s13, 16, %s2396_s5, [#allocation4]  }
 0x347   :  { %1613 = dma.done.wait [#allocation4], 16  }
 0x348   :  { %1614 = vsyncadd [#allocation4], 4294967280 }
 0x349   :  { %1615 = dma.done.wait [#allocation6], 16  }
 0x34a   :  { %1616 = vsyncadd [#allocation6], 4294967280 }
 0x34b   :  { %1022 = vsyncpa [#allocation4], 1 }
 0x34c   :  { %1023 = vsyncpa [#allocation6], 1 }

// kernel: adversarial_forward.3
= control target key start
LH: loop header
LB: loop body
LE: loop exit
PB: predicated region body
PF: predicated region fallthrough
CT: control target
= control target key end

     0   :  { %s9833_s12 = smov 0   ;;  %s11722_s0 = inlined_call_operand.vmem [shape: f32[4,18,18,3], index: 0, kind: input, shape index: {}]   ;;  %s11723_s1 = inlined_call_operand.vmem [shape: f32[9,3,128], index: 1, kind: input, shape index: {}]   ;;  %s11724_s2 = inlined_call_operand.vmem [shape: f32[1,128], index: 2, kind: input, shape index: {}]   ;;  %s11725_s3 = inlined_call_operand.vmem [shape: f32[1024,128], index: 3, kind: output, shape index: {}]  }
   0x1 LB: > { %s6825_s13 = sadd.s32 4294967295, %s9811_s12   ;;  %p6829_p0 = scmp.ge.s32.totalorder %s9811_s12, 1  ;;  %s9811_s12 = sphi %s9833_s12, %s13_s12  }
   0x2   : > { %p139_p1 = scmp.lt.s32.totalorder %s9811_s12, 3 }
   0x4   : > { %p140_p2 = pnand %p6829_p0, %p139_p1 }
   0x6   : > { %143 = sbr.rel (%p140_p2) target bundleno = 815 (0x32f), region = 32 }
   0xd   : > { %v6834_v0 = vld [vmem:[%s11723_s1 + $0x4] sm:$0x7]  ;;  %vm501_vm0 = vcmask 1042432   ;;  %v9847_v1 = vld [vmem:[%s11723_s1 + $0x10] sm:$0x7]  ;;  %s6830_s18 = sshll.u32 %s6825_s13, 1 }
   0xe   : > { %8399 = vmatprep.subr.msk.mxu1 %vm501_vm0, %v6834_v0  ;;  %8791 = vmatprep.subr.msk.mxu0 %vm501_vm0, %v9847_v1  ;;  %p165_p3 = scmp.lt.s32.totalorder %s6830_s18, 3  ;;  %v241_v2 = vld [vmem:[%s11723_s1] sm:$0x7]  ;;  %v7355_v3 = vld [vmem:[%s11723_s1 + $0x14] sm:$0x7]  ;;  %vm308_vm1 = vcmask 23552  }
   0xf   : > { %8400 = vmatpush3.msk.msra.mxu1 %vm501_vm0, %v6834_v0  ;;  %8792 = vmatpush3.msk.msra.mxu0 %vm501_vm0, %v9847_v1  ;;  %v9882_v9 = vld [vmem:[%s11723_s1 + $0x18] sm:$0x7]  ;;  %v9887_v10 = vld [vmem:[%s11723_s1 + $0x8] sm:$0x7]  ;;  %v10002_v46 = vld [vmem:[%s11723_s1 + $0x1c] sm:$0x7] }
  0x10   : > { %s11847_s18 = smov (!%p165_p3, %s6830_s18), 3  ;;  %8497 = vmatprep.subr.msk.mxu1 %vm501_vm0, %v241_v2  ;;  %8889 = vmatprep.subr.msk.mxu0 %vm501_vm0, %v7355_v3  ;;  %s6832_s14 = sshll.u32 %s6825_s13, 6 }
  0x11   : > { %s9795_s23 = smul.u32 432, %s11847_s18  ;;  %p172_p4 = scmp.lt.s32.totalorder %s6832_s14, 127 }
  0x13   : > { %s9868_s26 = scalar_lea.vmem %s11722_s0, %s9795_s23  ;;  %s11849_s14 = smov (!%p172_p4, %s6832_s14), 127 }
  0x14   : > { %v242_v4 = vld [vmem:[%s9868_s26 + $0x1] sm:$0xff]  ;;  %v7161_v5 = vld [vmem:[%s9868_s26 + $0x19] sm:$0xff]  ;;  %v243_v6 = vld [vmem:[%s9868_s26 + $0x9] sm:$0xff]  ;;  %s6833_s17 = sshll.u32 %s11849_s14, 3 }
  0x15   : > { %8401 = vmatprep.mubr.msk.f32.mxu1 %vm308_vm1, %v242_v4  ;;  %8793 = vmatprep.mubr.msk.f32.mxu0 %vm308_vm1, %v7161_v5  ;;  %v7162_v7 = vld [vmem:[%s9868_s26 + $0x21] sm:$0xff]  ;;  %v7163_v8 = vld [vmem:[%s9868_s26 + $0x31] sm:$0xff]  ;;  %v7164_v11 = vld [vmem:[%s9868_s26 + $0x39] sm:$0xff]  ;;  %s11565_s19 = scalar_lea.vmem %s11725_s3, %s6833_s17 }
  0x16   : > { %8402 = vmatmul.mubr.msk.f32.vlgmr.msra.gmra.mrb[0].mxu1 %vm308_vm1, %v243_v6  ;;  %8794 = vmatmul.mubr.msk.f32.vlgmr.msra.gmra.mrb[0].mxu0 %vm308_vm1, %v7162_v7  ;;  %v7165_v12 = vld [vmem:[%s9868_s26 + $0x49] sm:$0xff]  ;;  %v7166_v13 = vld [vmem:[%s9868_s26 + $0x51] sm:$0xff]  ;;  %v7167_v14 = vld [vmem:[%s9868_s26 + $0x61] sm:$0xff] }
  0x17   : > { %8498 = vmatpush3.msk.msra.mxu1 %vm501_vm0, %v241_v2  ;;  %8890 = vmatpush3.msk.msra.mxu0 %vm501_vm0, %v7355_v3  ;;  %v7168_v15 = vld [vmem:[%s9868_s26 + $0x69] sm:$0xff]  ;;  %v7169_v16 = vld [vmem:[%s9868_s26 + $0x79] sm:$0xff]  ;;  %v7170_v17 = vld [vmem:[%s9868_s26 + $0x81] sm:$0xff] }
  0x18   : > { %8404 = vmatprep.mubr.msk.f32.mxu1 %vm308_vm1, %v7161_v5  ;;  %8796 = vmatprep.mubr.msk.f32.mxu0 %vm308_vm1, %v7163_v8  ;;  %v7171_v18 = vld [vmem:[%s9868_s26 + $0x91] sm:$0xff]  ;;  %v7172_v19 = vld [vmem:[%s9868_s26 + $0x99] sm:$0xff]  ;;  %v7173_v20 = vld [vmem:[%s9868_s26 + $0xa9] sm:$0xff] }
  0x19   : > { %8987 = vmatprep.subr.msk.mxu0 %vm501_vm0, %v9882_v9  ;;  %8595 = vmatprep.subr.msk.mxu1 %vm501_vm0, %v9887_v10  ;;  %v7174_v21 = vld [vmem:[%s9868_s26 + $0xb1] sm:$0xff]  ;;  %v7175_v22 = vld [vmem:[%s9868_s26 + $0xc1] sm:$0xff]  ;;  %v7176_v23 = vld [vmem:[%s9868_s26 + $0xc9] sm:$0xff] }
  0x1a   : > { %8405 = vmatmul.mubr.msk.f32.gmra.mrb[2].mxu1 %vm308_vm1, %v7162_v7  ;;  %8797 = vmatmul.mubr.msk.f32.gmra.mrb[2].mxu0 %vm308_vm1, %v7164_v11  ;;  %v7177_v24 = vld [vmem:[%s9868_s26 + $0xd9] sm:$0xff]  ;;  %v7178_v25 = vld [vmem:[%s9868_s26 + $0xe1] sm:$0xff]  ;;  %v7179_v26 = vld [vmem:[%s9868_s26 + $0xf1] sm:$0xff] }
  0x1b   : > { %8407 = vmatprep.mubr.msk.f32.mxu1 %vm308_vm1, %v7163_v8  ;;  %8799 = vmatprep.mubr.msk.f32.mxu0 %vm308_vm1, %v7165_v12  ;;  %v7180_v27 = vld [vmem:[%s9868_s26 + $0xf9] sm:$0xff]  ;;  %v7181_v28 = vld [vmem:[%s9868_s26 + $0x109] sm:$0xff]  ;;  %v7182_v29 = vld [vmem:[%s9868_s26 + $0x111] sm:$0xff] }
  0x1c   : > { %v7183_v30 = vld [vmem:[%s9868_s26 + $0x121] sm:$0xff]  ;;  %v7184_v31 = vld [vmem:[%s9868_s26 + $0x129] sm:$0xff]  ;;  %v7185_v32 = vld [vmem:[%s9868_s26 + $0x139] sm:$0xff] }
  0x1d   : > { %v7186_v33 = vld [vmem:[%s9868_s26 + $0x141] sm:$0xff]  ;;  %v7187_v34 = vld [vmem:[%s9868_s26 + $0x151] sm:$0xff]  ;;  %v7188_v35 = vld [vmem:[%s9868_s26 + $0x159] sm:$0xff] }
  0x1e   : > { %8408 = vmatmul.mubr.msk.f32.gmra.mrb[4].mxu1 %vm308_vm1, %v7164_v11  ;;  %8800 = vmatmul.mubr.msk.f32.gmra.mrb[4].mxu0 %vm308_vm1, %v7166_v13  ;;  %v7189_v36 = vld [vmem:[%s9868_s26 + $0x169] sm:$0xff]  ;;  %v7190_v37 = vld [vmem:[%s9868_s26 + $0x171] sm:$0xff]  ;;  %v7191_v38 = vld [vmem:[%s9868_s26 + $0x181] sm:$0xff] }
  0x1f   : > { %8410 = vmatprep.mubr.msk.f32.mxu1 %vm308_vm1, %v7165_v12  ;;  %8802 = vmatprep.mubr.msk.f32.mxu0 %vm308_vm1, %v7167_v14  ;;  %v7192_v39 = vld [vmem:[%s9868_s26 + $0x189] sm:$0xff]  ;;  %v274_v40 = vld [vmem:[%s9868_s26 + $0x1b1] sm:$0xff]  ;;  %v9984_v41 = vld [vmem:[%s9868_s26 + $0x1a] sm:$0xff] }
  0x20   : > { %v275_v42 = vld [vmem:[%s9868_s26 + $0x1b9] sm:$0xff]  ;;  %v9993_v43 = vld [vmem:[%s9868_s26 + $0x22] sm:$0xff]  ;;  %v277_v47 = vld [vmem:[%s9868_s26 + $0x1d1] sm:$0xff] }
  0x21   : > { %v276_v44 = vld [vmem:[%s9868_s26 + $0x1c9] sm:$0xff]  ;;  %v9997_v45 = vld [vmem:[%s9868_s26 + $0x32] sm:$0xff]  ;;  %v10012_v48 = vld [vmem:[%s9868_s26 + $0x3a] sm:$0xff] }
  0x22   : > { %8411 = vmatmul.mubr.msk.f32.gmra.mrb[6].mxu1 %vm308_vm1, %v7166_v13  ;;  %8803 = vmatmul.mubr.msk.f32.gmra.mrb[6].mxu0 %vm308_vm1, %v7168_v15  ;;  %v278_v49 = vld [vmem:[%s9868_s26 + $0x1e1] sm:$0xff]  ;;  %v10018_v50 = vld [vmem:[%s9868_s26 + $0x4a] sm:$0xff]  ;;  %v10030_v52 = vld [vmem:[%s9868_s26 + $0x52] sm:$0xff] }
  0x23   : > { %8413 = vmatprep.mubr.msk.f32.mxu1 %vm308_vm1, %v7167_v14  ;;  %8805 = vmatprep.mubr.msk.f32.mxu0 %vm308_vm1, %v7169_v16  ;;  %v279_v51 = vld [vmem:[%s9868_s26 + $0x1e9] sm:$0xff]  ;;  %v280_v53 = vld [vmem:[%s9868_s26 + $0x1f9] sm:$0xff]  ;;  %v281_v55 = vld [vmem:[%s9868_s26 + $0x201] sm:$0xff] }
  0x24   : > { %v10034_v54 = vld [vmem:[%s9868_s26 + $0x62] sm:$0xff]  ;;  %v10044_v56 = vld [vmem:[%s9868_s26 + $0x6a] sm:$0xff]  ;;  %v10048_v58 = vld [vmem:[%s9868_s26 + $0x7a] sm:$0xff] }
  0x25   : > { %v282_v57 = vld [vmem:[%s9868_s26 + $0x211] sm:$0xff]  ;;  %v283_v59 = vld [vmem:[%s9868_s26 + $0x219] sm:$0xff]  ;;  %v10058_v60 = vld [vmem:[%s9868_s26 + $0x82] sm:$0xff] }
  0x26   : > { %8414 = vmatmul.mubr.msk.f32.gmra.mrb[8].mxu1 %vm308_vm1, %v7168_v15  ;;  %8806 = vmatmul.mubr.msk.f32.gmra.mrb[8].mxu0 %vm308_vm1, %v7170_v17  ;;  %v284_v61 = vld [vmem:[%s9868_s26 + $0x229] sm:$0xff]  ;;  %v10062_v62 = vld [vmem:[%s9868_s26 + $0x92] sm:$0xff]  ;;  %v10072_v0 = vld [vmem:[%s9868_s26 + $0x9a] sm:$0xff] }
  0x27   : > { %8416 = vmatprep.mubr.msk.f32.mxu1 %vm308_vm1, %v7169_v16  ;;  %8808 = vmatprep.mubr.msk.f32.mxu0 %vm308_vm1, %v7171_v18  ;;  %v285_v63 = vld [vmem:[%s9868_s26 + $0x231] sm:$0xff]  ;;  %v286_v2 = vld [vmem:[%s9868_s26 + $0x241] sm:$0xff]  ;;  %v287_v4 = vld [vmem:[%s9868_s26 + $0x249] sm:$0xff] }
  0x28   : > { %v10076_v3 = vld [vmem:[%s9868_s26 + $0xaa] sm:$0xff]  ;;  %v10086_v5 = vld [vmem:[%s9868_s26 + $0xb2] sm:$0xff]  ;;  %v10090_v7 = vld [vmem:[%s9868_s26 + $0xc2] sm:$0xff] }
  0x29   : > { %v288_v6 = vld [vmem:[%s9868_s26 + $0x259] sm:$0xff]  ;;  %v289_v8 = vld [vmem:[%s9868_s26 + $0x261] sm:$0xff]  ;;  %v290_v11 = vld [vmem:[%s9868_s26 + $0x271] sm:$0xff] }
  0x2a   : > { %8417 = vmatmul.mubr.msk.f32.gmra.mrb[10].mxu1 %vm308_vm1, %v7170_v17  ;;  %8809 = vmatmul.mubr.msk.f32.gmra.mrb[10].mxu0 %vm308_vm1, %v7172_v19  ;;  %v10104_v12 = vld [vmem:[%s9868_s26 + $0xda] sm:$0xff]  ;;  %v10114_v14 = vld [vmem:[%s9868_s26 + $0xe2] sm:$0xff]  ;;  %v10118_v16 = vld [vmem:[%s9868_s26 + $0xf2] sm:$0xff] }
  0x2b   : > { %8419 = vmatprep.mubr.msk.f32.mxu1 %vm308_vm1, %v7171_v18  ;;  %8811 = vmatprep.mubr.msk.f32.mxu0 %vm308_vm1, %v7173_v20  ;;  %v291_v13 = vld [vmem:[%s9868_s26 + $0x279] sm:$0xff]  ;;  %v292_v15 = vld [vmem:[%s9868_s26 + $0x289] sm:$0xff]  ;;  %v293_v17 = vld [vmem:[%s9868_s26 + $0x291] sm:$0xff] }
  0x2c   : > { %v10128_v18 = vld [vmem:[%s9868_s26 + $0xfa] sm:$0xff] }
  0x2e   : > { %8420 = vmatmul.mubr.msk.f32.gmra.mrb[12].mxu1 %vm308_vm1, %v7172_v19  ;;  %8812 = vmatmul.mubr.msk.f32.gmra.mrb[12].mxu0 %vm308_vm1, %v7174_v21  ;;  %v294_v19 = vld [vmem:[%s9868_s26 + $0x2a1] sm:$0xff] }
  0x2f   : > { %8422 = vmatprep.mubr.msk.f32.mxu1 %vm308_vm1, %v7173_v20  ;;  %8814 = vmatprep.mubr.msk.f32.mxu0 %vm308_vm1, %v7175_v22  ;;  %v10132_v20 = vld [vmem:[%s9868_s26 + $0x10a] sm:$0xff] }
  0x32   : > { %8423 = vmatmul.mubr.msk.f32.gmra.mrb[14].mxu1 %vm308_vm1, %v7174_v21  ;;  %8815 = vmatmul.mubr.msk.f32.gmra.mrb[14].mxu0 %vm308_vm1, %v7176_v23  ;;  %v295_v21 = vld [vmem:[%s9868_s26 + $0x2a9] sm:$0xff] }
  0x33   : > { %8425 = vmatprep.mubr.msk.f32.mxu1 %vm308_vm1, %v7175_v22  ;;  %8817 = vmatprep.mubr.msk.f32.mxu0 %vm308_vm1, %v7177_v24  ;;  %v10142_v22 = vld [vmem:[%s9868_s26 + $0x112] sm:$0xff] }
  0x36   : > { %8426 = vmatmul.mubr.msk.f32.gmra.mrb[16].mxu1 %vm308_vm1, %v7176_v23  ;;  %8818 = vmatmul.mubr.msk.f32.gmra.mrb[16].mxu0 %vm308_vm1, %v7178_v25  ;;  %v296_v23 = vld [vmem:[%s9868_s26 + $0x2b9] sm:$0xff] }
  0x37   : > { %8428 = vmatprep.mubr.msk.f32.mxu1 %vm308_vm1, %v7177_v24  ;;  %8820 = vmatprep.mubr.msk.f32.mxu0 %vm308_vm1, %v7179_v26  ;;  %v10146_v24 = vld [vmem:[%s9868_s26 + $0x122] sm:$0xff] }
  0x3a   : > { %8429 = vmatmul.mubr.msk.f32.gmra.mrb[18].mxu1 %vm308_vm1, %v7178_v25  ;;  %8821 = vmatmul.mubr.msk.f32.gmra.mrb[18].mxu0 %vm308_vm1, %v7180_v27  ;;  %v297_v25 = vld [vmem:[%s9868_s26 + $0x2c1] sm:$0xff] }
  0x3b   : > { %8431 = vmatprep.mubr.msk.f32.mxu1 %vm308_vm1, %v7179_v26  ;;  %8823 = vmatprep.mubr.msk.f32.mxu0 %vm308_vm1, %v7181_v28  ;;  %v10156_v26 = vld [vmem:[%s9868_s26 + $0x12a] sm:$0xff] }
  0x3e   : > { %8432 = vmatmul.mubr.msk.f32.gmra.mrb[20].mxu1 %vm308_vm1, %v7180_v27  ;;  %8824 = vmatmul.mubr.msk.f32.gmra.mrb[20].mxu0 %vm308_vm1, %v7182_v29  ;;  %v298_v27 = vld [vmem:[%s9868_s26 + $0x2d1] sm:$0xff] }
  0x3f   : > { %8434 = vmatprep.mubr.msk.f32.mxu1 %vm308_vm1, %v7181_v28  ;;  %8826 = vmatprep.mubr.msk.f32.mxu0 %vm308_vm1, %v7183_v30  ;;  %v10160_v28 = vld [vmem:[%s9868_s26 + $0x13a] sm:$0xff] }
  0x42   : > { %8435 = vmatmul.mubr.msk.f32.gmra.mrb[22].mxu1 %vm308_vm1, %v7182_v29  ;;  %8827 = vmatmul.mubr.msk.f32.gmra.mrb[22].mxu0 %vm308_vm1, %v7184_v31  ;;  %v299_v29 = vld [vmem:[%s9868_s26 + $0x2d9] sm:$0xff] }
  0x43   : > { %8437 = vmatprep.mubr.msk.f32.mxu1 %vm308_vm1, %v7183_v30  ;;  %8829 = vmatprep.mubr.msk.f32.mxu0 %vm308_vm1, %v7185_v32  ;;  %v10170_v30 = vld [vmem:[%s9868_s26 + $0x142] sm:$0xff] }
  0x46   : > { %8438 = vmatmul.mubr.msk.f32.gmra.mrb[24].mxu1 %vm308_vm1, %v7184_v31  ;;  %8830 = vmatmul.mubr.msk.f32.gmra.mrb[24].mxu0 %vm308_vm1, %v7186_v33  ;;  %v300_v31 = vld [vmem:[%s9868_s26 + $0x2e9] sm:$0xff] }
  0x47   : > { %8440 = vmatprep.mubr.msk.f32.mxu1 %vm308_vm1, %v7185_v32  ;;  %8832 = vmatprep.mubr.msk.f32.mxu0 %vm308_vm1, %v7187_v34  ;;  %v10174_v32 = vld [vmem:[%s9868_s26 + $0x152] sm:$0xff] }
  0x4a   : > { %8441 = vmatmul.mubr.msk.f32.gmra.mrb[26].mxu1 %vm308_vm1, %v7186_v33  ;;  %8833 = vmatmul.mubr.msk.f32.gmra.mrb[26].mxu0 %vm308_vm1, %v7188_v35  ;;  %v301_v33 = vld [vmem:[%s9868_s26 + $0x2f1] sm:$0xff] }
  0x4b   : > { %8443 = vmatprep.mubr.msk.f32.mxu1 %vm308_vm1, %v7187_v34  ;;  %8835 = vmatprep.mubr.msk.f32.mxu0 %vm308_vm1, %v7189_v36  ;;  %v10184_v34 = vld [vmem:[%s9868_s26 + $0x15a] sm:$0xff] }
  0x4e   : > { %8444 = vmatmul.mubr.msk.f32.gmra.mrb[28].mxu1 %vm308_vm1, %v7188_v35  ;;  %8836 = vmatmul.mubr.msk.f32.gmra.mrb[28].mxu0 %vm308_vm1, %v7190_v37  ;;  %v302_v35 = vld [vmem:[%s9868_s26 + $0x301] sm:$0xff] }
  0x4f   : > { %8446 = vmatprep.mubr.msk.f32.mxu1 %vm308_vm1, %v7189_v36  ;;  %8838 = vmatprep.mubr.msk.f32.mxu0 %vm308_vm1, %v7191_v38  ;;  %v10188_v36 = vld [vmem:[%s9868_s26 + $0x16a] sm:$0xff]  ;;  %v10198_v38 = vld [vmem:[%s9868_s26 + $0x172] sm:$0xff] }
  0x50   : > { %11766 = vst [vmem:[#allocation2_spill] sm:$0xff] %v10188_v36  ;;  %11767 = vst [vmem:[#allocation3_spill] sm:$0xff] %v10198_v38 }
  0x52   : > { %8447 = vmatmul.mubr.msk.f32.gmra.mrb[30].mxu1 %vm308_vm1, %v7190_v37  ;;  %8839 = vmatmul.mubr.msk.f32.gmra.mrb[30].mxu0 %vm308_vm1, %v7192_v39  ;;  %v303_v37 = vld [vmem:[%s9868_s26 + $0x309] sm:$0xff]  ;;  %v304_v39 = vld [vmem:[%s9868_s26 + $0x319] sm:$0xff] }
  0x53   : > { %8449 = vmatprep.mubr.msk.f32.mxu1 %vm308_vm1, %v274_v40  ;;  %8891 = vmatprep.mubr.msk.f32.mxu0 %vm308_vm1, %v9984_v41  ;;  %v7321_v40 = vld [vmem:[%s9868_s26 + $0x182] sm:$0xff] }
  0x56   : > { %8450 = vmatmul.mubr.msk.f32.gmra.mrb[32].mxu1 %vm308_vm1, %v275_v42  ;;  %8892 = vmatmul.mubr.msk.f32.vlgmr.msra.gmra.mrb[0].mxu0 %vm308_vm1, %v9993_v43  ;;  %v305_v42 = vld [vmem:[%s9868_s26 + $0x321] sm:$0xff] }
  0x57   : > { %8988 = vmatpush3.msk.msra.mxu0 %vm501_vm0, %v9882_v9  ;;  %8452 = vmatprep.mubr.msk.f32.mxu1 %vm308_vm1, %v276_v44  ;;  %v10100_v9 = vld [vmem:[%s9868_s26 + $0xca] sm:$0xff] }
  0x58   : > { %8894 = vmatprep.mubr.msk.f32.mxu0 %vm308_vm1, %v9997_v45  ;;  %9085 = vmatprep.subr.msk.mxu0 %vm501_vm0, %v10002_v46  ;;  %v7322_v44 = vld [vmem:[%s9868_s26 + $0x18a] sm:$0xff] }
  0x5a   : > { %8453 = vmatmul.mubr.msk.f32.gmra.mrb[34].mxu1 %vm308_vm1, %v277_v47  ;;  %8895 = vmatmul.mubr.msk.f32.gmra.mrb[2].mxu0 %vm308_vm1, %v10012_v48  ;;  %v177_v47 = vld [vmem:[%s9868_s26] sm:$0xff] }
  0x5b   : > { %8455 = vmatprep.mubr.msk.f32.mxu1 %vm308_vm1, %v278_v49  ;;  %8897 = vmatprep.mubr.msk.f32.mxu0 %vm308_vm1, %v10018_v50  ;;  %v10211_v49 = vld [vmem:[%s9868_s26 + $0x1ca] sm:$0xff] }
  0x5c   : > { %11768 = vst [vmem:[#allocation4_spill] sm:$0xff] %v10211_v49 }
  0x5e   : > { %8456 = vmatmul.mubr.msk.f32.gmra.mrb[36].mxu1 %vm308_vm1, %v279_v51  ;;  %8898 = vmatmul.mubr.msk.f32.gmra.mrb[4].mxu0 %vm308_vm1, %v10030_v52  ;;  %v178_v51 = vld [vmem:[%s9868_s26 + $0x8] sm:$0xff] }
  0x5f   : > { %8458 = vmatprep.mubr.msk.f32.mxu1 %vm308_vm1, %v280_v53  ;;  %8900 = vmatprep.mubr.msk.f32.mxu0 %vm308_vm1, %v10034_v54  ;;  %v10220_v53 = vld [vmem:[%s9868_s26 + $0x1d2] sm:$0xff] }
  0x60   : > { %11769 = vst [vmem:[#allocation5_spill] sm:$0xff] %v10220_v53 }
  0x62   : > { %8459 = vmatmul.mubr.msk.f32.gmra.mrb[38].mxu1 %vm308_vm1, %v281_v55  ;;  %8901 = vmatmul.mubr.msk.f32.gmra.mrb[6].mxu0 %vm308_vm1, %v10044_v56  ;;  %v179_v55 = vld [vmem:[%s9868_s26 + $0x18] sm:$0xff] }
  0x63   : > { %8461 = vmatprep.mubr.msk.f32.mxu1 %vm308_vm1, %v282_v57  ;;  %8903 = vmatprep.mubr.msk.f32.mxu0 %vm308_vm1, %v10048_v58  ;;  %v10224_v57 = vld [vmem:[%s9868_s26 + $0x1e2] sm:$0xff] }
  0x64   : > { %11770 = vst [vmem:[#allocation6_spill] sm:$0xff] %v10224_v57 }
  0x66   : > { %8462 = vmatmul.mubr.msk.f32.gmra.mrb[40].mxu1 %vm308_vm1, %v283_v59  ;;  %8904 = vmatmul.mubr.msk.f32.gmra.mrb[8].mxu0 %vm308_vm1, %v10058_v60  ;;  %v10229_v59 = vld [vmem:[%s11723_s1 + $0xc] sm:$0x7] }
  0x67   : > { %8464 = vmatprep.mubr.msk.f32.mxu1 %vm308_vm1, %v284_v61  ;;  %8906 = vmatprep.mubr.msk.f32.mxu0 %vm308_vm1, %v10062_v62  ;;  %v180_v61 = vld [vmem:[%s9868_s26 + $0x20] sm:$0xff] }
  0x6a   : > { %8465 = vmatmul.mubr.msk.f32.gmra.mrb[42].mxu1 %vm308_vm1, %v285_v63  ;;  %8907 = vmatmul.mubr.msk.f32.gmra.mrb[10].mxu0 %vm308_vm1, %v10072_v0  ;;  %v10239_v63 = vld [vmem:[%s9868_s26 + $0x1ea] sm:$0xff] }
  0x6b   : > { %8467 = vmatprep.mubr.msk.f32.mxu1 %vm308_vm1, %v286_v2  ;;  %8909 = vmatprep.mubr.msk.f32.mxu0 %vm308_vm1, %v10076_v3  ;;  %11771 = vst [vmem:[#allocation7_spill] sm:$0xff] %v10239_v63  ;;  %v10244_v2 = vld [vmem:[%s9868_s26 + $0x30] sm:$0xff] }
  0x6e   : > { %8468 = vmatmul.mubr.msk.f32.gmra.mrb[44].mxu1 %vm308_vm1, %v287_v4  ;;  %8910 = vmatmul.mubr.msk.f32.gmra.mrb[12].mxu0 %vm308_vm1, %v10086_v5  ;;  %v10247_v4 = vld [vmem:[%s9868_s26 + $0x1fa] sm:$0xff] }
  0x6f   : > { %8470 = vmatprep.mubr.msk.f32.mxu1 %vm308_vm1, %v288_v6  ;;  %8912 = vmatprep.mubr.msk.f32.mxu0 %vm308_vm1, %v10090_v7  ;;  %11772 = vst [vmem:[#allocation8_spill] sm:$0xff] %v10247_v4  ;;  %v10262_v6 = vld [vmem:[%s9868_s26 + $0x202] sm:$0xff] }
  0x70   : > { %11773 = vst [vmem:[#allocation9_spill] sm:$0xff] %v10262_v6 }
  0x72   : > { %8471 = vmatmul.mubr.msk.f32.gmra.mrb[46].mxu1 %vm308_vm1, %v289_v8  ;;  %8913 = vmatmul.mubr.msk.f32.gmra.mrb[14].mxu0 %vm308_vm1, %v10100_v9  ;;  %v10265_v8 = vld [vmem:[%s9868_s26 + $0x48] sm:$0xff] }
  0x73   : > { %8473 = vmatprep.mubr.msk.f32.mxu1 %vm308_vm1, %v290_v11  ;;  %8915 = vmatprep.mubr.msk.f32.mxu0 %vm308_vm1, %v10104_v12  ;;  %v10268_v11 = vld [vmem:[%s9868_s26 + $0x212] sm:$0xff] }
  0x74   : > { %11774 = vst [vmem:[#allocation10_spill] sm:$0xff] %v10268_v11 }
  0x76   : > { %8474 = vmatmul.mubr.msk.f32.gmra.mrb[48].mxu1 %vm308_vm1, %v291_v13  ;;  %8916 = vmatmul.mubr.msk.f32.gmra.mrb[16].mxu0 %vm308_vm1, %v10114_v14  ;;  %v10279_v13 = vld [vmem:[%s9868_s26 + $0x50] sm:$0xff] }
  0x77   : > { %8476 = vmatprep.mubr.msk.f32.mxu1 %vm308_vm1, %v292_v15  ;;  %8918 = vmatprep.mubr.msk.f32.mxu0 %vm308_vm1, %v10118_v16  ;;  %v10282_v15 = vld [vmem:[%s9868_s26 + $0x21a] sm:$0xff] }
  0x78   : > { %11775 = vst [vmem:[#allocation11_spill] sm:$0xff] %v10282_v15 }
  0x7a   : > { %8477 = vmatmul.mubr.msk.f32.gmra.mrb[50].mxu1 %vm308_vm1, %v293_v17  ;;  %8919 = vmatmul.mubr.msk.f32.gmra.mrb[18].mxu0 %vm308_vm1, %v10128_v18  ;;  %v10285_v17 = vld [vmem:[%s9868_s26 + $0x60] sm:$0xff] }
  0x7b   : > { %8479 = vmatprep.mubr.msk.f32.mxu1 %vm308_vm1, %v294_v19  ;;  %8921 = vmatprep.mubr.msk.f32.mxu0 %vm308_vm1, %v10132_v20  ;;  %v10288_v19 = vld [vmem:[%s9868_s26 + $0x22a] sm:$0xff] }
  0x7c   : > { %11776 = vst [vmem:[#allocation12_spill] sm:$0xff] %v10288_v19 }
  0x7e   : > { %8480 = vmatmul.mubr.msk.f32.gmra.mrb[52].mxu1 %vm308_vm1, %v295_v21  ;;  %8922 = vmatmul.mubr.msk.f32.gmra.mrb[20].mxu0 %vm308_vm1, %v10142_v22  ;;  %v10299_v21 = vld [vmem:[%s9868_s26 + $0x68] sm:$0xff] }
  0x7f   : > { %8482 = vmatprep.mubr.msk.f32.mxu1 %vm308_vm1, %v296_v23  ;;  %8924 = vmatprep.mubr.msk.f32.mxu0 %vm308_vm1, %v10146_v24  ;;  %v10302_v23 = vld [vmem:[%s9868_s26 + $0x232] sm:$0xff] }
  0x80   : > { %11777 = vst [vmem:[#allocation13_spill] sm:$0xff] %v10302_v23 }
  0x82   : > { %8483 = vmatmul.mubr.msk.f32.gmra.mrb[54].mxu1 %vm308_vm1, %v297_v25  ;;  %8925 = vmatmul.mubr.msk.f32.gmra.mrb[22].mxu0 %vm308_vm1, %v10156_v26  ;;  %v10305_v25 = vld [vmem:[%s9868_s26 + $0x78] sm:$0xff] }
  0x83   : > { %8485 = vmatprep.mubr.msk.f32.mxu1 %vm308_vm1, %v298_v27  ;;  %8927 = vmatprep.mubr.msk.f32.mxu0 %vm308_vm1, %v10160_v28  ;;  %v10308_v27 = vld [vmem:[%s9868_s26 + $0x242] sm:$0xff] }
  0x84   : > { %11778 = vst [vmem:[#allocation14_spill] sm:$0xff] %v10308_v27 }
  0x86   : > { %8486 = vmatmul.mubr.msk.f32.gmra.mrb[56].mxu1 %vm308_vm1, %v299_v29  ;;  %8928 = vmatmul.mubr.msk.f32.gmra.mrb[24].mxu0 %vm308_vm1, %v10170_v30  ;;  %v10319_v29 = vld [vmem:[%s9868_s26 + $0x80] sm:$0xff] }
  0x87   : > { %8488 = vmatprep.mubr.msk.f32.mxu1 %vm308_vm1, %v300_v31  ;;  %8930 = vmatprep.mubr.msk.f32.mxu0 %vm308_vm1, %v10174_v32  ;;  %v10322_v31 = vld [vmem:[%s9868_s26 + $0x24a] sm:$0xff] }
  0x88   : > { %11779 = vst [vmem:[#allocation15_spill] sm:$0xff] %v10322_v31 }
  0x8a   : > { %8489 = vmatmul.mubr.msk.f32.gmra.mrb[58].mxu1 %vm308_vm1, %v301_v33  ;;  %8931 = vmatmul.mubr.msk.f32.gmra.mrb[26].mxu0 %vm308_vm1, %v10184_v34  ;;  %v10325_v33 = vld [vmem:[%s9868_s26 + $0x90] sm:$0xff] }
  0x8b   : > { %8491 = vmatprep.mubr.msk.f32.mxu1 %vm308_vm1, %v302_v35  ;;  %8933 = vmatprep.mubr.msk.f32.mxu0 %vm308_vm1, %v10188_v36  ;;  %v10328_v35 = vld [vmem:[%s9868_s26 + $0x25a] sm:$0xff]  ;;  %v10528_v36 = vld [vmem:[%s9868_s26 + $0x1c8] sm:$0xff] }
  0x8c   : > { %11780 = vst [vmem:[#allocation16_spill] sm:$0xff] %v10328_v35  ;;  %11798 = vst [vmem:[#allocation34_spill] sm:$0xff] %v10528_v36 }
  0x8e   : > { %8492 = vmatmul.mubr.msk.f32.gmra.mrb[60].mxu1 %vm308_vm1, %v303_v37  ;;  %8934 = vmatmul.mubr.msk.f32.gmra.mrb[28].mxu0 %vm308_vm1, %v10198_v38  ;;  %v10339_v37 = vld [vmem:[%s9868_s26 + $0x98] sm:$0xff]  ;;  %v209_v38 = vld [vmem:[%s9868_s26 + $0x1b0] sm:$0xff] }
  0x8f   : > { %8494 = vmatprep.mubr.msk.f32.mxu1 %vm308_vm1, %v304_v39  ;;  %8936 = vmatprep.mubr.msk.f32.mxu0 %vm308_vm1, %v7321_v40  ;;  %v10342_v39 = vld [vmem:[%s9868_s26 + $0x262] sm:$0xff] }
  0x90   : > { %11781 = vst [vmem:[#allocation17_spill] sm:$0xff] %v10342_v39  ;;  %v10345_v40 = vld [vmem:[%s9868_s26 + $0xa8] sm:$0xff] }
  0x92   : > { %8495 = vmatmul.mubr.msk.f32.gmra.mrb[62].mxu1 %vm308_vm1, %v305_v42  ;;  %8937 = vmatmul.mubr.msk.f32.gmra.mrb[30].mxu0 %vm308_vm1, %v7322_v44  ;;  %v10348_v42 = vld [vmem:[%s9868_s26 + $0x272] sm:$0xff] }
  0x93   : > { %8499 = vmatprep.mubr.msk.f32.mxu1 %vm308_vm1, %v177_v47  ;;  %8939 = vmatprep.mubr.msk.f32.mxu0 %vm308_vm1, %v10211_v49  ;;  %11782 = vst [vmem:[#allocation18_spill] sm:$0xff] %v10348_v42  ;;  %v10359_v44 = vld [vmem:[%s9868_s26 + $0xb0] sm:$0xff]  ;;  %v10362_v47 = vld [vmem:[%s9868_s26 + $0x27a] sm:$0xff] }
  0x94   : > { %11783 = vst [vmem:[#allocation19_spill] sm:$0xff] %v10362_v47  ;;  %v7353_v49 = vld [vmem:[%s9868_s26 + $0x332] sm:$0xff] }
  0x96   : > { %8500 = vmatmul.mubr.msk.f32.vlgmr.msra.gmra.mrb[0].mxu1 %vm308_vm1, %v178_v51  ;;  %8940 = vmatmul.mubr.msk.f32.gmra.mrb[32].mxu0 %vm308_vm1, %v10220_v53  ;;  %v10365_v51 = vld [vmem:[%s9868_s26 + $0xc0] sm:$0xff]  ;;  %v10505_v53 = vld [vmem:[%s9868_s26 + $0x168] sm:$0xff] }
  0x97   : > { %8596 = vmatpush3.msk.msra.mxu1 %vm501_vm0, %v9887_v10  ;;  %8502 = vmatprep.mubr.msk.f32.mxu1 %vm308_vm1, %v179_v55  ;;  %v10259_v10 = vld [vmem:[%s9868_s26 + $0x38] sm:$0xff]  ;;  %v10368_v55 = vld [vmem:[%s9868_s26 + $0x28a] sm:$0xff] }
  0x98   : > { %8942 = vmatprep.mubr.msk.f32.mxu0 %vm308_vm1, %v10224_v57  ;;  %8693 = vmatprep.subr.msk.mxu1 %vm501_vm0, %v10229_v59  ;;  %11784 = vst [vmem:[#allocation20_spill] sm:$0xff] %v10368_v55  ;;  %v10488_v57 = vld [vmem:[%s9868_s26 + $0x31a] sm:$0xff] }
  0x99   : > { %11796 = vst [vmem:[#allocation32_spill] sm:$0xff] %v10488_v57 }
  0x9a   : > { %8503 = vmatmul.mubr.msk.f32.gmra.mrb[2].mxu1 %vm308_vm1, %v180_v61  ;;  %8943 = vmatmul.mubr.msk.f32.gmra.mrb[34].mxu0 %vm308_vm1, %v10239_v63  ;;  %v10379_v61 = vld [vmem:[%s9868_s26 + $0xc8] sm:$0xff]  ;;  %v10485_v63 = vld [vmem:[%s9868_s26 + $0x150] sm:$0xff] }
  0x9b   : > { %8505 = vmatprep.mubr.msk.f32.mxu1 %vm308_vm1, %v10244_v2  ;;  %8945 = vmatprep.mubr.msk.f32.mxu0 %vm308_vm1, %v10247_v4  ;;  %v10468_v4 = vld [vmem:[%s9868_s26 + $0x302] sm:$0xff] }
  0x9c   : > { %11794 = vst [vmem:[#allocation30_spill] sm:$0xff] %v10468_v4 }
  0x9e   : > { %8506 = vmatmul.mubr.msk.f32.gmra.mrb[4].mxu1 %vm308_vm1, %v10259_v10  ;;  %8946 = vmatmul.mubr.msk.f32.gmra.mrb[36].mxu0 %vm308_vm1, %v10262_v6  ;;  %v10465_v6 = vld [vmem:[%s9868_s26 + $0x138] sm:$0xff] }
  0x9f   : > { %8508 = vmatprep.mubr.msk.f32.mxu1 %vm308_vm1, %v10265_v8  ;;  %8948 = vmatprep.mubr.msk.f32.mxu0 %vm308_vm1, %v10268_v11  ;;  %v10448_v11 = vld [vmem:[%s9868_s26 + $0x2ea] sm:$0xff] }
  0xa0   : > { %11792 = vst [vmem:[#allocation28_spill] sm:$0xff] %v10448_v11 }
  0xa2   : > { %8509 = vmatmul.mubr.msk.f32.gmra.mrb[6].mxu1 %vm308_vm1, %v10279_v13  ;;  %8949 = vmatmul.mubr.msk.f32.gmra.mrb[38].mxu0 %vm308_vm1, %v10282_v15  ;;  %v10445_v15 = vld [vmem:[%s9868_s26 + $0x120] sm:$0xff] }
  0xa3   : > { %8511 = vmatprep.mubr.msk.f32.mxu1 %vm308_vm1, %v10285_v17  ;;  %8951 = vmatprep.mubr.msk.f32.mxu0 %vm308_vm1, %v10288_v19  ;;  %v10428_v19 = vld [vmem:[%s9868_s26 + $0x2d2] sm:$0xff] }
  0xa4   : > { %11790 = vst [vmem:[#allocation26_spill] sm:$0xff] %v10428_v19 }
  0xa6   : > { %8512 = vmatmul.mubr.msk.f32.gmra.mrb[8].mxu1 %vm308_vm1, %v10299_v21  ;;  %8952 = vmatmul.mubr.msk.f32.gmra.mrb[40].mxu0 %vm308_vm1, %v10302_v23  ;;  %v10425_v23 = vld [vmem:[%s9868_s26 + $0x108] sm:$0xff] }
  0xa7   : > { %8514 = vmatprep.mubr.msk.f32.mxu1 %vm308_vm1, %v10305_v25  ;;  %8954 = vmatprep.mubr.msk.f32.mxu0 %vm308_vm1, %v10308_v27  ;;  %v10408_v27 = vld [vmem:[%s9868_s26 + $0x2ba] sm:$0xff] }
  0xa8   : > { %11788 = vst [vmem:[#allocation24_spill] sm:$0xff] %v10408_v27 }
  0xaa   : > { %8515 = vmatmul.mubr.msk.f32.gmra.mrb[10].mxu1 %vm308_vm1, %v10319_v29  ;;  %8955 = vmatmul.mubr.msk.f32.gmra.mrb[42].mxu0 %vm308_vm1, %v10322_v31  ;;  %v10405_v31 = vld [vmem:[%s9868_s26 + $0xf0] sm:$0xff] }
  0xab   : > { %8517 = vmatprep.mubr.msk.f32.mxu1 %vm308_vm1, %v10325_v33  ;;  %8957 = vmatprep.mubr.msk.f32.mxu0 %vm308_vm1, %v10328_v35  ;;  %v10388_v35 = vld [vmem:[%s9868_s26 + $0x2a2] sm:$0xff] }
  0xac   : > { %11786 = vst [vmem:[#allocation22_spill] sm:$0xff] %v10388_v35 }
  0xae   : > { %8518 = vmatmul.mubr.msk.f32.gmra.mrb[12].mxu1 %vm308_vm1, %v10339_v37  ;;  %8958 = vmatmul.mubr.msk.f32.gmra.mrb[44].mxu0 %vm308_vm1, %v10342_v39  ;;  %v10385_v39 = vld [vmem:[%s9868_s26 + $0xd8] sm:$0xff] }
  0xaf   : > { %8520 = vmatprep.mubr.msk.f32.mxu1 %vm308_vm1, %v10345_v40  ;;  %8960 = vmatprep.mubr.msk.f32.mxu0 %vm308_vm1, %v10348_v42  ;;  %v10382_v42 = vld [vmem:[%s9868_s26 + $0x292] sm:$0xff] }
  0xb0   : > { %11785 = vst [vmem:[#allocation21_spill] sm:$0xff] %v10382_v42 }
  0xb2   : > { %8521 = vmatmul.mubr.msk.f32.gmra.mrb[14].mxu1 %vm308_vm1, %v10359_v44  ;;  %8961 = vmatmul.mubr.msk.f32.gmra.mrb[46].mxu0 %vm308_vm1, %v10362_v47  ;;  %v10402_v47 = vld [vmem:[%s9868_s26 + $0x2aa] sm:$0xff] }
  0xb3   : > { %8523 = vmatprep.mubr.msk.f32.mxu1 %vm308_vm1, %v10365_v51  ;;  %8963 = vmatprep.mubr.msk.f32.mxu0 %vm308_vm1, %v10368_v55  ;;  %v10399_v55 = vld [vmem:[%s9868_s26 + $0xe0] sm:$0xff]  ;;  %11787 = vst [vmem:[#allocation23_spill] sm:$0xff] %v10402_v47 }
  0xb6   : > { %8524 = vmatmul.mubr.msk.f32.gmra.mrb[16].mxu1 %vm308_vm1, %v10379_v61  ;;  %8964 = vmatmul.mubr.msk.f32.gmra.mrb[48].mxu0 %vm308_vm1, %v10382_v42  ;;  %v10422_v42 = vld [vmem:[%s9868_s26 + $0x2c2] sm:$0xff] }
  0xb7   : > { %8526 = vmatprep.mubr.msk.f32.mxu1 %vm308_vm1, %v10385_v39  ;;  %8966 = vmatprep.mubr.msk.f32.mxu0 %vm308_vm1, %v10388_v35  ;;  %v10419_v35 = vld [vmem:[%s9868_s26 + $0xf8] sm:$0xff]  ;;  %11789 = vst [vmem:[#allocation25_spill] sm:$0xff] %v10422_v42 }
  0xba   : > { %8527 = vmatmul.mubr.msk.f32.gmra.mrb[18].mxu1 %vm308_vm1, %v10399_v55  ;;  %8967 = vmatmul.mubr.msk.f32.gmra.mrb[50].mxu0 %vm308_vm1, %v10402_v47  ;;  %v10442_v47 = vld [vmem:[%s9868_s26 + $0x2da] sm:$0xff] }
  0xbb   : > { %8529 = vmatprep.mubr.msk.f32.mxu1 %vm308_vm1, %v10405_v31  ;;  %8969 = vmatprep.mubr.msk.f32.mxu0 %vm308_vm1, %v10408_v27  ;;  %v10439_v27 = vld [vmem:[%s9868_s26 + $0x110] sm:$0xff]  ;;  %11791 = vst [vmem:[#allocation27_spill] sm:$0xff] %v10442_v47 }
  0xbe   : > { %8530 = vmatmul.mubr.msk.f32.gmra.mrb[20].mxu1 %vm308_vm1, %v10419_v35  ;;  %8970 = vmatmul.mubr.msk.f32.gmra.mrb[52].mxu0 %vm308_vm1, %v10422_v42  ;;  %v10462_v42 = vld [vmem:[%s9868_s26 + $0x2f2] sm:$0xff] }
  0xbf   : > { %8532 = vmatprep.mubr.msk.f32.mxu1 %vm308_vm1, %v10425_v23  ;;  %8972 = vmatprep.mubr.msk.f32.mxu0 %vm308_vm1, %v10428_v19  ;;  %v10459_v19 = vld [vmem:[%s9868_s26 + $0x128] sm:$0xff]  ;;  %11793 = vst [vmem:[#allocation29_spill] sm:$0xff] %v10462_v42 }
  0xc2   : > { %8533 = vmatmul.mubr.msk.f32.gmra.mrb[22].mxu1 %vm308_vm1, %v10439_v27  ;;  %8973 = vmatmul.mubr.msk.f32.gmra.mrb[54].mxu0 %vm308_vm1, %v10442_v47  ;;  %v10482_v47 = vld [vmem:[%s9868_s26 + $0x30a] sm:$0xff] }
  0xc3   : > { %8535 = vmatprep.mubr.msk.f32.mxu1 %vm308_vm1, %v10445_v15  ;;  %8975 = vmatprep.mubr.msk.f32.mxu0 %vm308_vm1, %v10448_v11  ;;  %v10479_v11 = vld [vmem:[%s9868_s26 + $0x140] sm:$0xff]  ;;  %11795 = vst [vmem:[#allocation31_spill] sm:$0xff] %v10482_v47 }
  0xc6   : > { %8536 = vmatmul.mubr.msk.f32.gmra.mrb[24].mxu1 %vm308_vm1, %v10459_v19  ;;  %8976 = vmatmul.mubr.msk.f32.gmra.mrb[56].mxu0 %vm308_vm1, %v10462_v42  ;;  %v10502_v42 = vld [vmem:[%s9868_s26 + $0x322] sm:$0xff] }
  0xc7   : > { %8538 = vmatprep.mubr.msk.f32.mxu1 %vm308_vm1, %v10465_v6  ;;  %8978 = vmatprep.mubr.msk.f32.mxu0 %vm308_vm1, %v10468_v4  ;;  %v10499_v4 = vld [vmem:[%s9868_s26 + $0x158] sm:$0xff]  ;;  %11797 = vst [vmem:[#allocation33_spill] sm:$0xff] %v10502_v42 }
  0xca   : > { %8539 = vmatmul.mubr.msk.f32.gmra.mrb[26].mxu1 %vm308_vm1, %v10479_v11  ;;  %8979 = vmatmul.mubr.msk.f32.gmra.mrb[58].mxu0 %vm308_vm1, %v10482_v47  ;;  %v7354_v47 = vld [vmem:[%s9868_s26 + $0x33a] sm:$0xff] }
  0xcb   : > { %8541 = vmatprep.mubr.msk.f32.mxu1 %vm308_vm1, %v10485_v63  ;;  %8981 = vmatprep.mubr.msk.f32.mxu0 %vm308_vm1, %v10488_v57  ;;  %v10516_v57 = vld [vmem:[%s9868_s26 + $0x170] sm:$0xff] }
  0xce   : > { %8542 = vmatmul.mubr.msk.f32.gmra.mrb[28].mxu1 %vm308_vm1, %v10499_v4  ;;  %8982 = vmatmul.mubr.msk.f32.gmra.mrb[60].mxu0 %vm308_vm1, %v10502_v42  ;;  %v210_v42 = vld [vmem:[%s9868_s26 + $0x1b8] sm:$0xff] }
  0xcf   : > { %8544 = vmatprep.mubr.msk.f32.mxu1 %vm308_vm1, %v10505_v53  ;;  %8984 = vmatprep.mubr.msk.f32.mxu0 %vm308_vm1, %v7353_v49  ;;  %v10533_v49 = vld [vmem:[%s11723_s1 + $0x20] sm:$0x7] }
  0xd2   : > { %8545 = vmatmul.mubr.msk.f32.gmra.mrb[30].mxu1 %vm308_vm1, %v10516_v57  ;;  %8985 = vmatmul.mubr.msk.f32.gmra.mrb[62].mxu0 %vm308_vm1, %v7354_v47  ;;  %v10659_v47 = vld [vmem:[%s9868_s26 + $0x290] sm:$0xff] }
  0xd3   : > { %8547 = vmatprep.mubr.msk.f32.mxu1 %vm308_vm1, %v209_v38  ;;  %8989 = vmatprep.mubr.msk.f32.mxu0 %vm308_vm1, %v10244_v2  ;;  %v10543_v38 = vld [vmem:[%s9868_s26 + $0x1d0] sm:$0xff]  ;;  %v10548_v2 = vld [vmem:[%s9868_s26 + $0x1e0] sm:$0xff] }
  0xd4   : > { %11799 = vst [vmem:[#allocation35_spill] sm:$0xff] %v10543_v38 }
  0xd6   : > { %8548 = vmatmul.mubr.msk.f32.gmra.mrb[32].mxu1 %vm308_vm1, %v210_v42  ;;  %8990 = vmatmul.mubr.msk.f32.vlgmr.msra.gmra.mrb[0].mxu0 %vm308_vm1, %v10259_v10  ;;  %v10564_v10 = vld [vmem:[%s9868_s26 + $0x1f8] sm:$0xff]  ;;  %v10634_v42 = vld [vmem:[%s9868_s26 + $0x270] sm:$0xff] }
  0xd7   : > { %9086 = vmatpush3.msk.msra.mxu0 %vm501_vm0, %v10002_v46  ;;  %8550 = vmatprep.mubr.msk.f32.mxu1 %vm308_vm1, %v10528_v36  ;;  %v10561_v46 = vld [vmem:[%s9868_s26 + $0x1e8] sm:$0xff] }
  0xd8   : > { %8992 = vmatprep.mubr.msk.f32.mxu0 %vm308_vm1, %v10265_v8  ;;  %9183 = vmatprep.subr.msk.mxu0 %vm501_vm0, %v10533_v49  ;;  %v10575_v8 = vld [vmem:[%s9868_s26 + $0x200] sm:$0xff] }
  0xd9   : > { %v1470_v36 = vld [vmem:[%s9868_s26 + $0x2] sm:$0xff] }
  0xda   : > { %8551 = vmatmul.mubr.msk.f32.gmra.mrb[34].mxu1 %vm308_vm1, %v10543_v38  ;;  %8993 = vmatmul.mubr.msk.f32.gmra.mrb[2].mxu0 %vm308_vm1, %v10279_v13  ;;  %v10578_v13 = vld [vmem:[%s9868_s26 + $0x210] sm:$0xff]  ;;  %v7452_v38 = vld [vmem:[%s9868_s26 + $0x1a0] sm:$0xff] }
  0xdb   : > { %8553 = vmatprep.mubr.msk.f32.mxu1 %vm308_vm1, %v10548_v2  ;;  %8995 = vmatprep.mubr.msk.f32.mxu0 %vm308_vm1, %v10285_v17  ;;  %v10589_v17 = vld [vmem:[%s9868_s26 + $0x218] sm:$0xff] }
  0xde   : > { %8554 = vmatmul.mubr.msk.f32.gmra.mrb[36].mxu1 %vm308_vm1, %v10561_v46  ;;  %8996 = vmatmul.mubr.msk.f32.gmra.mrb[4].mxu0 %vm308_vm1, %v10299_v21  ;;  %v10592_v21 = vld [vmem:[%s9868_s26 + $0x228] sm:$0xff] }
  0xdf   : > { %8556 = vmatprep.mubr.msk.f32.mxu1 %vm308_vm1, %v10564_v10  ;;  %8998 = vmatprep.mubr.msk.f32.mxu0 %vm308_vm1, %v10305_v25  ;;  %v10603_v25 = vld [vmem:[%s9868_s26 + $0x230] sm:$0xff] }
  0xe2   : > { %8557 = vmatmul.mubr.msk.f32.gmra.mrb[38].mxu1 %vm308_vm1, %v10575_v8  ;;  %8999 = vmatmul.mubr.msk.f32.gmra.mrb[6].mxu0 %vm308_vm1, %v10319_v29  ;;  %v10606_v29 = vld [vmem:[%s9868_s26 + $0x240] sm:$0xff] }
  0xe3   : > { %8559 = vmatprep.mubr.msk.f32.mxu1 %vm308_vm1, %v10578_v13  ;;  %9001 = vmatprep.mubr.msk.f32.mxu0 %vm308_vm1, %v10325_v33  ;;  %v10617_v33 = vld [vmem:[%s9868_s26 + $0x248] sm:$0xff] }
  0xe6   : > { %8560 = vmatmul.mubr.msk.f32.gmra.mrb[40].mxu1 %vm308_vm1, %v10589_v17  ;;  %9002 = vmatmul.mubr.msk.f32.gmra.mrb[8].mxu0 %vm308_vm1, %v10339_v37  ;;  %v10620_v37 = vld [vmem:[%s9868_s26 + $0x258] sm:$0xff] }
  0xe7   : > { %8562 = vmatprep.mubr.msk.f32.mxu1 %vm308_vm1, %v10592_v21  ;;  %9004 = vmatprep.mubr.msk.f32.mxu0 %vm308_vm1, %v10345_v40  ;;  %v10631_v40 = vld [vmem:[%s9868_s26 + $0x260] sm:$0xff] }
  0xea   : > { %8563 = vmatmul.mubr.msk.f32.gmra.mrb[42].mxu1 %vm308_vm1, %v10603_v25  ;;  %9005 = vmatmul.mubr.msk.f32.gmra.mrb[10].mxu0 %vm308_vm1, %v10359_v44  ;;  %v10645_v44 = vld [vmem:[%s9868_s26 + $0x278] sm:$0xff] }
  0xeb   : > { %8565 = vmatprep.mubr.msk.f32.mxu1 %vm308_vm1, %v10606_v29  ;;  %9007 = vmatprep.mubr.msk.f32.mxu0 %vm308_vm1, %v10365_v51  ;;  %v10721_v51 = vld [vmem:[%s9868_s26 + $0x180] sm:$0xff] }
  0xee   : > { %8566 = vmatmul.mubr.msk.f32.gmra.mrb[44].mxu1 %vm308_vm1, %v10617_v33  ;;  %9008 = vmatmul.mubr.msk.f32.gmra.mrb[12].mxu0 %vm308_vm1, %v10379_v61  ;;  %v7451_v61 = vld [vmem:[%s9868_s26 + $0x198] sm:$0xff] }
  0xef   : > { %8568 = vmatprep.mubr.msk.f32.mxu1 %vm308_vm1, %v10620_v37  ;;  %9010 = vmatprep.mubr.msk.f32.mxu0 %vm308_vm1, %v10385_v39  ;;  %v10648_v39 = vld [vmem:[%s9868_s26 + $0x288] sm:$0xff] }
  0xf2   : > { %8569 = vmatmul.mubr.msk.f32.gmra.mrb[46].mxu1 %vm308_vm1, %v10631_v40  ;;  %9011 = vmatmul.mubr.msk.f32.gmra.mrb[14].mxu0 %vm308_vm1, %v10399_v55  ;;  %v10738_v55 = vld [vmem:[%s9868_s26 + $0x318] sm:$0xff] }
  0xf3   : > { %8571 = vmatprep.mubr.msk.f32.mxu1 %vm308_vm1, %v10634_v42  ;;  %9013 = vmatprep.mubr.msk.f32.mxu0 %vm308_vm1, %v10405_v31  ;;  %v10662_v31 = vld [vmem:[%s9868_s26 + $0x2a0] sm:$0xff] }
  0xf6   : > { %8572 = vmatmul.mubr.msk.f32.gmra.mrb[48].mxu1 %vm308_vm1, %v10645_v44  ;;  %9014 = vmatmul.mubr.msk.f32.gmra.mrb[16].mxu0 %vm308_vm1, %v10419_v35  ;;  %v10673_v35 = vld [vmem:[%s9868_s26 + $0x2a8] sm:$0xff] }
  0xf7   : > { %8574 = vmatprep.mubr.msk.f32.mxu1 %vm308_vm1, %v10648_v39  ;;  %9016 = vmatprep.mubr.msk.f32.mxu0 %vm308_vm1, %v10425_v23  ;;  %v10676_v23 = vld [vmem:[%s9868_s26 + $0x2b8] sm:$0xff] }
  0xfa   : > { %8575 = vmatmul.mubr.msk.f32.gmra.mrb[50].mxu1 %vm308_vm1, %v10659_v47  ;;  %9017 = vmatmul.mubr.msk.f32.gmra.mrb[18].mxu0 %vm308_vm1, %v10439_v27  ;;  %v10690_v27 = vld [vmem:[%s9868_s26 + $0x2d0] sm:$0xff] }
  0xfb   : > { %8577 = vmatprep.mubr.msk.f32.mxu1 %vm308_vm1, %v10662_v31  ;;  %9019 = vmatprep.mubr.msk.f32.mxu0 %vm308_vm1, %v10445_v15  ;;  %v10687_v15 = vld [vmem:[%s9868_s26 + $0x2c0] sm:$0xff] }
  0xfe   : > { %8578 = vmatmul.mubr.msk.f32.gmra.mrb[52].mxu1 %vm308_vm1, %v10673_v35  ;;  %9020 = vmatmul.mubr.msk.f32.gmra.mrb[20].mxu0 %vm308_vm1, %v10459_v19  ;;  %v10704_v19 = vld [vmem:[%s9868_s26 + $0x2e8] sm:$0xff] }
  0xff   : > { %8580 = vmatprep.mubr.msk.f32.mxu1 %vm308_vm1, %v10676_v23  ;;  %9022 = vmatprep.mubr.msk.f32.mxu0 %vm308_vm1, %v10465_v6  ;;  %v10701_v6 = vld [vmem:[%s9868_s26 + $0x2d8] sm:$0xff] }
 0x102   : > { %8581 = vmatmul.mubr.msk.f32.gmra.mrb[54].mxu1 %vm308_vm1, %v10687_v15  ;;  %9023 = vmatmul.mubr.msk.f32.gmra.mrb[22].mxu0 %vm308_vm1, %v10479_v11  ;;  %v10718_v11 = vld [vmem:[%s9868_s26 + $0x300] sm:$0xff] }
 0x103   : > { %8583 = vmatprep.mubr.msk.f32.mxu1 %vm308_vm1, %v10690_v27  ;;  %9025 = vmatprep.mubr.msk.f32.mxu0 %vm308_vm1, %v10485_v63  ;;  %v10715_v63 = vld [vmem:[%s9868_s26 + $0x2f0] sm:$0xff] }
 0x106   : > { %8584 = vmatmul.mubr.msk.f32.gmra.mrb[56].mxu1 %vm308_vm1, %v10701_v6  ;;  %9026 = vmatmul.mubr.msk.f32.gmra.mrb[24].mxu0 %vm308_vm1, %v10499_v4  ;;  %v10735_v4 = vld [vmem:[%s9868_s26 + $0x188] sm:$0xff] }
 0x107   : > { %8586 = vmatprep.mubr.msk.f32.mxu1 %vm308_vm1, %v10704_v19  ;;  %9028 = vmatprep.mubr.msk.f32.mxu0 %vm308_vm1, %v10505_v53  ;;  %v10732_v53 = vld [vmem:[%s9868_s26 + $0x308] sm:$0xff]  ;;  %11800 = vst [vmem:[#allocation36_spill] sm:$0xff] %v10735_v4 }
 0x10a   : > { %8587 = vmatmul.mubr.msk.f32.gmra.mrb[58].mxu1 %vm308_vm1, %v10715_v63  ;;  %9029 = vmatmul.mubr.msk.f32.gmra.mrb[26].mxu0 %vm308_vm1, %v10516_v57  ;;  %v10749_v57 = vld [vmem:[%s9868_s26 + $0x320] sm:$0xff] }
 0x10b   : > { %8589 = vmatprep.mubr.msk.f32.mxu1 %vm308_vm1, %v10718_v11  ;;  %9031 = vmatprep.mubr.msk.f32.mxu0 %vm308_vm1, %v10721_v51 }
 0x10e   : > { %8590 = vmatmul.mubr.msk.f32.gmra.mrb[60].mxu1 %vm308_vm1, %v10732_v53  ;;  %9032 = vmatmul.mubr.msk.f32.gmra.mrb[28].mxu0 %vm308_vm1, %v10735_v4  ;;  %v1471_v4 = vld [vmem:[%s9868_s26 + $0xa] sm:$0xff] }
 0x10f   : > { %8592 = vmatprep.mubr.msk.f32.mxu1 %vm308_vm1, %v10738_v55  ;;  %9034 = vmatprep.mubr.msk.f32.mxu0 %vm308_vm1, %v7451_v61  ;;  %v11814_v61 = vld [vmem:[#allocation15_spill] sm:$0xff] }
 0x112   : > { %8593 = vmatmul.mubr.msk.f32.gmra.mrb[62].mxu1 %vm308_vm1, %v10749_v57  ;;  %9035 = vmatmul.mubr.msk.f32.gmra.mrb[30].mxu0 %vm308_vm1, %v7452_v38  ;;  %v7564_v38 = vld [vmem:[%s9868_s26 + $0xc9] sm:$0xff] }
 0x113   : > { %8597 = vmatprep.mubr.msk.f32.mxu1 %vm308_vm1, %v1470_v36  ;;  %9037 = vmatprep.mubr.msk.f32.mxu0 %vm308_vm1, %v10548_v2  ;;  %v7563_v36 = vld [vmem:[%s9868_s26 + $0xc1] sm:$0xff] }
 0x116   : > { %8598 = vmatmul.mubr.msk.f32.vlgmr.msra.gmra.mrb[0].mxu1 %vm308_vm1, %v1471_v4  ;;  %9038 = vmatmul.mubr.msk.f32.gmra.mrb[32].mxu0 %vm308_vm1, %v10561_v46  ;;  %v7565_v4 = vld [vmem:[%s9868_s26 + $0xd9] sm:$0xff] }
 0x117   : > { %8694 = vmatpush3.msk.msra.mxu1 %vm501_vm0, %v10229_v59  ;;  %8600 = vmatprep.mubr.msk.f32.mxu1 %vm308_vm1, %v9984_v41  ;;  %v10879_v41 = vld [vmem:[%s9868_s26 + $0x338] sm:$0xff] }
 0x118   : > { %9040 = vmatprep.mubr.msk.f32.mxu0 %vm308_vm1, %v10564_v10  ;;  %9281 = vmatprep.subr.msk.mxu1 %vm501_vm0, %v9847_v1  ;;  %v10868_v1 = vld [vmem:[%s9868_s26 + $0x330] sm:$0xff]  ;;  %v11812_v59 = vld [vmem:[#allocation13_spill] sm:$0xff] }
 0x11a   : > { %8601 = vmatmul.mubr.msk.f32.gmra.mrb[2].mxu1 %vm308_vm1, %v9993_v43  ;;  %9041 = vmatmul.mubr.msk.f32.gmra.mrb[34].mxu0 %vm308_vm1, %v10575_v8  ;;  %v7483_v43 = vld [vmem:[%s9868_s26 + $0x348] sm:$0xff] }
 0x11b   : > { %8603 = vmatprep.mubr.msk.f32.mxu1 %vm308_vm1, %v9997_v45  ;;  %9043 = vmatprep.mubr.msk.f32.mxu0 %vm308_vm1, %v10578_v13  ;;  %v11801_v45 = vld [vmem:[#allocation2_spill] sm:$0xff] }
 0x11e   : > { %8604 = vmatmul.mubr.msk.f32.gmra.mrb[4].mxu1 %vm308_vm1, %v10012_v48  ;;  %9044 = vmatmul.mubr.msk.f32.gmra.mrb[36].mxu0 %vm308_vm1, %v10589_v17  ;;  %v7484_v48 = vld [vmem:[%s9868_s26 + $0x350] sm:$0xff] }
 0x11f   : > { %8606 = vmatprep.mubr.msk.f32.mxu1 %vm308_vm1, %v10018_v50  ;;  %9046 = vmatprep.mubr.msk.f32.mxu0 %vm308_vm1, %v10592_v21  ;;  %v1502_v50 = vld [vmem:[%s9868_s26 + $0x1b2] sm:$0xff] }
 0x122   : > { %8607 = vmatmul.mubr.msk.f32.gmra.mrb[6].mxu1 %vm308_vm1, %v10030_v52  ;;  %9047 = vmatmul.mubr.msk.f32.gmra.mrb[38].mxu0 %vm308_vm1, %v10603_v25  ;;  %v7551_v52 = vld [vmem:[%s9868_s26 + $0x31] sm:$0xff] }
 0x123   : > { %8609 = vmatprep.mubr.msk.f32.mxu1 %vm308_vm1, %v10034_v54  ;;  %9049 = vmatprep.mubr.msk.f32.mxu0 %vm308_vm1, %v10606_v29  ;;  %v11802_v54 = vld [vmem:[#allocation3_spill] sm:$0xff] }
 0x126   : > { %8610 = vmatmul.mubr.msk.f32.gmra.mrb[8].mxu1 %vm308_vm1, %v10044_v56  ;;  %9050 = vmatmul.mubr.msk.f32.gmra.mrb[40].mxu0 %vm308_vm1, %v10617_v33  ;;  %v1503_v56 = vld [vmem:[%s9868_s26 + $0x1ba] sm:$0xff] }
 0x127   : > { %8612 = vmatprep.mubr.msk.f32.mxu1 %vm308_vm1, %v10048_v58  ;;  %9052 = vmatprep.mubr.msk.f32.mxu0 %vm308_vm1, %v10620_v37  ;;  %v7552_v58 = vld [vmem:[%s9868_s26 + $0x39] sm:$0xff] }
 0x12a   : > { %8613 = vmatmul.mubr.msk.f32.gmra.mrb[10].mxu1 %vm308_vm1, %v10058_v60  ;;  %9053 = vmatmul.mubr.msk.f32.gmra.mrb[42].mxu0 %vm308_vm1, %v10631_v40  ;;  %v7553_v60 = vld [vmem:[%s9868_s26 + $0x49] sm:$0xff] }
 0x12b   : > { %8615 = vmatprep.mubr.msk.f32.mxu1 %vm308_vm1, %v10062_v62  ;;  %9055 = vmatprep.mubr.msk.f32.mxu0 %vm308_vm1, %v10634_v42  ;;  %v11803_v62 = vld [vmem:[#allocation4_spill] sm:$0xff] }
 0x12e   : > { %8616 = vmatmul.mubr.msk.f32.gmra.mrb[12].mxu1 %vm308_vm1, %v10072_v0  ;;  %9056 = vmatmul.mubr.msk.f32.gmra.mrb[44].mxu0 %vm308_vm1, %v10645_v44  ;;  %v7554_v0 = vld [vmem:[%s9868_s26 + $0x51] sm:$0xff] }
 0x12f   : > { %8618 = vmatprep.mubr.msk.f32.mxu1 %vm308_vm1, %v10076_v3  ;;  %9058 = vmatprep.mubr.msk.f32.mxu0 %vm308_vm1, %v10648_v39  ;;  %v7555_v3 = vld [vmem:[%s9868_s26 + $0x61] sm:$0xff] }
 0x132   : > { %8619 = vmatmul.mubr.msk.f32.gmra.mrb[14].mxu1 %vm308_vm1, %v10086_v5  ;;  %9059 = vmatmul.mubr.msk.f32.gmra.mrb[46].mxu0 %vm308_vm1, %v10659_v47  ;;  %v11804_v5 = vld [vmem:[#allocation5_spill] sm:$0xff] }
 0x133   : > { %8621 = vmatprep.mubr.msk.f32.mxu1 %vm308_vm1, %v10090_v7  ;;  %9061 = vmatprep.mubr.msk.f32.mxu0 %vm308_vm1, %v10662_v31  ;;  %v11805_v7 = vld [vmem:[#allocation6_spill] sm:$0xff] }
 0x136   : > { %8622 = vmatmul.mubr.msk.f32.gmra.mrb[16].mxu1 %vm308_vm1, %v10100_v9  ;;  %9062 = vmatmul.mubr.msk.f32.gmra.mrb[48].mxu0 %vm308_vm1, %v10673_v35  ;;  %v7556_v9 = vld [vmem:[%s9868_s26 + $0x69] sm:$0xff] }
 0x137   : > { %8624 = vmatprep.mubr.msk.f32.mxu1 %vm308_vm1, %v10104_v12  ;;  %9064 = vmatprep.mubr.msk.f32.mxu0 %vm308_vm1, %v10676_v23  ;;  %v7557_v12 = vld [vmem:[%s9868_s26 + $0x79] sm:$0xff] }
 0x13a   : > { %8625 = vmatmul.mubr.msk.f32.gmra.mrb[18].mxu1 %vm308_vm1, %v10114_v14  ;;  %9065 = vmatmul.mubr.msk.f32.gmra.mrb[50].mxu0 %vm308_vm1, %v10687_v15  ;;  %v11806_v14 = vld [vmem:[#allocation7_spill] sm:$0xff] }
 0x13b   : > { %8627 = vmatprep.mubr.msk.f32.mxu1 %vm308_vm1, %v10118_v16  ;;  %9067 = vmatprep.mubr.msk.f32.mxu0 %vm308_vm1, %v10690_v27  ;;  %v11807_v16 = vld [vmem:[#allocation8_spill] sm:$0xff] }
 0x13e   : > { %8628 = vmatmul.mubr.msk.f32.gmra.mrb[20].mxu1 %vm308_vm1, %v10128_v18  ;;  %9068 = vmatmul.mubr.msk.f32.gmra.mrb[52].mxu0 %vm308_vm1, %v10701_v6  ;;  %v7558_v18 = vld [vmem:[%s9868_s26 + $0x81] sm:$0xff] }
 0x13f   : > { %8630 = vmatprep.mubr.msk.f32.mxu1 %vm308_vm1, %v10132_v20  ;;  %9070 = vmatprep.mubr.msk.f32.mxu0 %vm308_vm1, %v10704_v19  ;;  %v7559_v20 = vld [vmem:[%s9868_s26 + $0x91] sm:$0xff] }
 0x142   : > { %8631 = vmatmul.mubr.msk.f32.gmra.mrb[22].mxu1 %vm308_vm1, %v10142_v22  ;;  %9071 = vmatmul.mubr.msk.f32.gmra.mrb[54].mxu0 %vm308_vm1, %v10715_v63  ;;  %v11808_v22 = vld [vmem:[#allocation9_spill] sm:$0xff] }
 0x143   : > { %8633 = vmatprep.mubr.msk.f32.mxu1 %vm308_vm1, %v10146_v24  ;;  %9073 = vmatprep.mubr.msk.f32.mxu0 %vm308_vm1, %v10718_v11  ;;  %v11809_v24 = vld [vmem:[#allocation10_spill] sm:$0xff] }
 0x146   : > { %8634 = vmatmul.mubr.msk.f32.gmra.mrb[24].mxu1 %vm308_vm1, %v10156_v26  ;;  %9074 = vmatmul.mubr.msk.f32.gmra.mrb[56].mxu0 %vm308_vm1, %v10732_v53  ;;  %v7560_v26 = vld [vmem:[%s9868_s26 + $0x99] sm:$0xff] }
 0x147   : > { %8636 = vmatprep.mubr.msk.f32.mxu1 %vm308_vm1, %v10160_v28  ;;  %9076 = vmatprep.mubr.msk.f32.mxu0 %vm308_vm1, %v10738_v55  ;;  %v7561_v28 = vld [vmem:[%s9868_s26 + $0xa9] sm:$0xff] }
 0x14a   : > { %8637 = vmatmul.mubr.msk.f32.gmra.mrb[26].mxu1 %vm308_vm1, %v10170_v30  ;;  %9077 = vmatmul.mubr.msk.f32.gmra.mrb[58].mxu0 %vm308_vm1, %v10749_v57  ;;  %v11810_v30 = vld [vmem:[#allocation11_spill] sm:$0xff] }
 0x14b   : > { %8639 = vmatprep.mubr.msk.f32.mxu1 %vm308_vm1, %v10174_v32  ;;  %9079 = vmatprep.mubr.msk.f32.mxu0 %vm308_vm1, %v10868_v1  ;;  %v11811_v32 = vld [vmem:[#allocation12_spill] sm:$0xff] }
 0x14e   : > { %8640 = vmatmul.mubr.msk.f32.gmra.mrb[28].mxu1 %vm308_vm1, %v10184_v34  ;;  %9080 = vmatmul.mubr.msk.f32.gmra.mrb[60].mxu0 %vm308_vm1, %v10879_v41  ;;  %v7562_v34 = vld [vmem:[%s9868_s26 + $0xb1] sm:$0xff] }
 0x14f   : > { %8642 = vmatprep.mubr.msk.f32.mxu1 %vm308_vm1, %v11801_v45  ;;  %9082 = vmatprep.mubr.msk.f32.mxu0 %vm308_vm1, %v7483_v43  ;;  %v11815_v43 = vld [vmem:[#allocation16_spill] sm:$0xff]  ;;  %v7566_v45 = vld [vmem:[%s9868_s26 + $0xe1] sm:$0xff] }
 0x152   : > { %8643 = vmatmul.mubr.msk.f32.gmra.mrb[30].mxu1 %vm308_vm1, %v11802_v54  ;;  %9083 = vmatmul.mubr.msk.f32.gmra.mrb[62].mxu0 %vm308_vm1, %v7484_v48  ;;  %v7567_v48 = vld [vmem:[%s9868_s26 + $0xf1] sm:$0xff]  ;;  %v7568_v54 = vld [vmem:[%s9868_s26 + $0xf9] sm:$0xff] }
 0x153   : > { %8645 = vmatprep.mubr.msk.f32.mxu1 %vm308_vm1, %v1502_v50  ;;  %9087 = vmatprep.mubr.msk.f32.mxu0 %vm308_vm1, %v7551_v52  ;;  %v11816_v50 = vld [vmem:[#allocation17_spill] sm:$0xff]  ;;  %v11817_v52 = vld [vmem:[#allocation18_spill] sm:$0xff] }
 0x156   : > { %8646 = vmatmul.mubr.msk.f32.gmra.mrb[32].mxu1 %vm308_vm1, %v1503_v56  ;;  %9088 = vmatmul.mubr.msk.f32.vlgmr.msra.gmra.mrb[0].mxu0 %vm308_vm1, %v7552_v58  ;;  %v7569_v56 = vld [vmem:[%s9868_s26 + $0x109] sm:$0xff] }
 0x157   : > { %9184 = vmatpush3.msk.msra.mxu0 %vm501_vm0, %v10533_v49  ;;  %8648 = vmatprep.mubr.msk.f32.mxu1 %vm308_vm1, %v11803_v62  ;;  %v11813_v49 = vld [vmem:[#allocation14_spill] sm:$0xff]  ;;  %v11818_v58 = vld [vmem:[#allocation19_spill] sm:$0xff]  ;;  %v7570_v62 = vld [vmem:[%s9868_s26 + $0x111] sm:$0xff] }
 0x158   : > { %9090 = vmatprep.mubr.msk.f32.mxu0 %vm308_vm1, %v7553_v60  ;;  %v11819_v60 = vld [vmem:[#allocation20_spill] sm:$0xff] }
 0x15a   : > { %8649 = vmatmul.mubr.msk.f32.gmra.mrb[34].mxu1 %vm308_vm1, %v11804_v5  ;;  %9091 = vmatmul.mubr.msk.f32.gmra.mrb[2].mxu0 %vm308_vm1, %v7554_v0  ;;  %v7571_v0 = vld [vmem:[%s9868_s26 + $0x121] sm:$0xff] }
 0x15b   : > { %8651 = vmatprep.mubr.msk.f32.mxu1 %vm308_vm1, %v11805_v7  ;;  %9093 = vmatprep.mubr.msk.f32.mxu0 %vm308_vm1, %v7555_v3  ;;  %v11820_v3 = vld [vmem:[#allocation21_spill] sm:$0xff]  ;;  %v11821_v5 = vld [vmem:[#allocation22_spill] sm:$0xff]  ;;  %v7572_v7 = vld [vmem:[%s9868_s26 + $0x129] sm:$0xff] }
 0x15e   : > { %8652 = vmatmul.mubr.msk.f32.gmra.mrb[36].mxu1 %vm308_vm1, %v11806_v14  ;;  %9094 = vmatmul.mubr.msk.f32.gmra.mrb[4].mxu0 %vm308_vm1, %v7556_v9  ;;  %v7573_v9 = vld [vmem:[%s9868_s26 + $0x139] sm:$0xff]  ;;  %v11823_v14 = vld [vmem:[#allocation24_spill] sm:$0xff] }
 0x15f   : > { %8654 = vmatprep.mubr.msk.f32.mxu1 %vm308_vm1, %v11807_v16  ;;  %9096 = vmatprep.mubr.msk.f32.mxu0 %vm308_vm1, %v7557_v12  ;;  %v11822_v12 = vld [vmem:[#allocation23_spill] sm:$0xff] }
 0x160   : > { %v7574_v16 = vld [vmem:[%s9868_s26 + $0x141] sm:$0xff] }
 0x162   : > { %8655 = vmatmul.mubr.msk.f32.gmra.mrb[38].mxu1 %vm308_vm1, %v11808_v22  ;;  %9097 = vmatmul.mubr.msk.f32.gmra.mrb[6].mxu0 %vm308_vm1, %v7558_v18  ;;  %v7575_v18 = vld [vmem:[%s9868_s26 + $0x151] sm:$0xff]  ;;  %v11825_v22 = vld [vmem:[#allocation26_spill] sm:$0xff] }
 0x163   : > { %8657 = vmatprep.mubr.msk.f32.mxu1 %vm308_vm1, %v11809_v24  ;;  %9099 = vmatprep.mubr.msk.f32.mxu0 %vm308_vm1, %v7559_v20  ;;  %v11824_v20 = vld [vmem:[#allocation25_spill] sm:$0xff] }
 0x164   : > { %v7576_v24 = vld [vmem:[%s9868_s26 + $0x159] sm:$0xff] }
 0x166   : > { %8658 = vmatmul.mubr.msk.f32.gmra.mrb[40].mxu1 %vm308_vm1, %v11810_v30  ;;  %9100 = vmatmul.mubr.msk.f32.gmra.mrb[8].mxu0 %vm308_vm1, %v7560_v26  ;;  %v7577_v26 = vld [vmem:[%s9868_s26 + $0x169] sm:$0xff] }
 0x167   : > { %8660 = vmatprep.mubr.msk.f32.mxu1 %vm308_vm1, %v11811_v32  ;;  %9102 = vmatprep.mubr.msk.f32.mxu0 %vm308_vm1, %v7561_v28  ;;  %v11826_v28 = vld [vmem:[#allocation27_spill] sm:$0xff]  ;;  %v11827_v30 = vld [vmem:[#allocation28_spill] sm:$0xff] }
 0x168   : > { %v7578_v32 = vld [vmem:[%s9868_s26 + $0x171] sm:$0xff] }
 0x16a   : > { %8661 = vmatmul.mubr.msk.f32.gmra.mrb[42].mxu1 %vm308_vm1, %v11812_v59  ;;  %9103 = vmatmul.mubr.msk.f32.gmra.mrb[10].mxu0 %vm308_vm1, %v7562_v34  ;;  %v7579_v34 = vld [vmem:[%s9868_s26 + $0x181] sm:$0xff] }
 0x16b   : > { %8663 = vmatprep.mubr.msk.f32.mxu1 %vm308_vm1, %v11813_v49  ;;  %9105 = vmatprep.mubr.msk.f32.mxu0 %vm308_vm1, %v7563_v36  ;;  %v11828_v36 = vld [vmem:[#allocation29_spill] sm:$0xff]  ;;  %v11829_v59 = vld [vmem:[#allocation30_spill] sm:$0xff]  ;;  %v7580_v49 = vld [vmem:[%s9868_s26 + $0x189] sm:$0xff] }
 0x16e   : > { %8664 = vmatmul.mubr.msk.f32.gmra.mrb[44].mxu1 %vm308_vm1, %v11814_v61  ;;  %9106 = vmatmul.mubr.msk.f32.gmra.mrb[12].mxu0 %vm308_vm1, %v7564_v38  ;;  %v7581_v38 = vld [vmem:[%s9868_s26 + $0x199] sm:$0xff]  ;;  %v11831_v61 = vld [vmem:[#allocation32_spill] sm:$0xff] }
 0x16f   : > { %8666 = vmatprep.mubr.msk.f32.mxu1 %vm308_vm1, %v11815_v43  ;;  %9108 = vmatprep.mubr.msk.f32.mxu0 %vm308_vm1, %v7565_v4  ;;  %v11830_v4 = vld [vmem:[#allocation31_spill] sm:$0xff] }
 0x170   : > { %v7582_v43 = vld [vmem:[%s9868_s26 + $0x1a1] sm:$0xff] }
 0x172   : > { %8667 = vmatmul.mubr.msk.f32.gmra.mrb[46].mxu1 %vm308_vm1, %v11816_v50  ;;  %9109 = vmatmul.mubr.msk.f32.gmra.mrb[14].mxu0 %vm308_vm1, %v7566_v45  ;;  %v7031_v45 = vld [vmem:[%s9868_s26 + $0x18] sm:$0xff] }
 0x173   : > { %8669 = vmatprep.mubr.msk.f32.mxu1 %vm308_vm1, %v11817_v52  ;;  %9111 = vmatprep.mubr.msk.f32.mxu0 %vm308_vm1, %v7567_v48  ;;  %v11022_v48 = vld [vmem:[%s9868_s26 + $0x1e1] sm:$0xff]  ;;  %v11832_v50 = vld [vmem:[#allocation33_spill] sm:$0xff] }
 0x174   : > { %v7032_v52 = vld [vmem:[%s9868_s26 + $0x20] sm:$0xff] }
 0x176   : > { %8670 = vmatmul.mubr.msk.f32.gmra.mrb[48].mxu1 %vm308_vm1, %v11818_v58  ;;  %9112 = vmatmul.mubr.msk.f32.gmra.mrb[16].mxu0 %vm308_vm1, %v7568_v54  ;;  %v11032_v54 = vld [vmem:[%s9868_s26 + $0x1e9] sm:$0xff]  ;;  %v11036_v58 = vld [vmem:[%s9868_s26 + $0x1f9] sm:$0xff] }
 0x177   : > { %8672 = vmatprep.mubr.msk.f32.mxu1 %vm308_vm1, %v11819_v60  ;;  %9114 = vmatprep.mubr.msk.f32.mxu0 %vm308_vm1, %v7569_v56  ;;  %v7033_v56 = vld [vmem:[%s9868_s26 + $0x30] sm:$0xff] }
 0x178   : > { %v9804_v60 = vld [vmem:[%s11723_s1 + $0x10] sm:$0x7] }
 0x17a   : > { %8673 = vmatmul.mubr.msk.f32.gmra.mrb[50].mxu1 %vm308_vm1, %v11820_v3  ;;  %9115 = vmatmul.mubr.msk.f32.gmra.mrb[18].mxu0 %vm308_vm1, %v7570_v62  ;;  %v7034_v62 = vld [vmem:[%s9868_s26 + $0x38] sm:$0xff]  ;;  %v7035_v3 = vld [vmem:[%s9868_s26 + $0x48] sm:$0xff] }
 0x17b   : > { %8675 = vmatprep.mubr.msk.f32.mxu1 %vm308_vm1, %v11821_v5  ;;  %9117 = vmatprep.mubr.msk.f32.mxu0 %vm308_vm1, %v7571_v0  ;;  %v11048_v0 = vld [vmem:[%s9868_s26 + $0x201] sm:$0xff]  ;;  %v11054_v5 = vld [vmem:[%s9868_s26 + $0x211] sm:$0xff] }
 0x17e   : > { %8676 = vmatmul.mubr.msk.f32.gmra.mrb[52].mxu1 %vm308_vm1, %v11822_v12  ;;  %9118 = vmatmul.mubr.msk.f32.gmra.mrb[20].mxu0 %vm308_vm1, %v7572_v7  ;;  %v7036_v7 = vld [vmem:[%s9868_s26 + $0x50] sm:$0xff]  ;;  %v7037_v12 = vld [vmem:[%s9868_s26 + $0x60] sm:$0xff] }
 0x17f   : > { %8678 = vmatprep.mubr.msk.f32.mxu1 %vm308_vm1, %v11823_v14  ;;  %9120 = vmatprep.mubr.msk.f32.mxu0 %vm308_vm1, %v7573_v9  ;;  %v11064_v9 = vld [vmem:[%s9868_s26 + $0x219] sm:$0xff]  ;;  %v11068_v14 = vld [vmem:[%s9868_s26 + $0x229] sm:$0xff] }
 0x182   : > { %8679 = vmatmul.mubr.msk.f32.gmra.mrb[54].mxu1 %vm308_vm1, %v11824_v20  ;;  %9121 = vmatmul.mubr.msk.f32.gmra.mrb[22].mxu0 %vm308_vm1, %v7574_v16  ;;  %v7038_v16 = vld [vmem:[%s9868_s26 + $0x68] sm:$0xff]  ;;  %v7039_v20 = vld [vmem:[%s9868_s26 + $0x78] sm:$0xff] }
 0x183   : > { %8681 = vmatprep.mubr.msk.f32.mxu1 %vm308_vm1, %v11825_v22  ;;  %9123 = vmatprep.mubr.msk.f32.mxu0 %vm308_vm1, %v7575_v18  ;;  %v11078_v18 = vld [vmem:[%s9868_s26 + $0x231] sm:$0xff]  ;;  %v11082_v22 = vld [vmem:[%s9868_s26 + $0x241] sm:$0xff] }
 0x186   : > { %8682 = vmatmul.mubr.msk.f32.gmra.mrb[56].mxu1 %vm308_vm1, %v11826_v28  ;;  %9124 = vmatmul.mubr.msk.f32.gmra.mrb[24].mxu0 %vm308_vm1, %v7576_v24  ;;  %v7040_v24 = vld [vmem:[%s9868_s26 + $0x80] sm:$0xff]  ;;  %v7041_v28 = vld [vmem:[%s9868_s26 + $0x90] sm:$0xff] }
 0x187   : > { %8684 = vmatprep.mubr.msk.f32.mxu1 %vm308_vm1, %v11827_v30  ;;  %9126 = vmatprep.mubr.msk.f32.mxu0 %vm308_vm1, %v7577_v26  ;;  %v11092_v26 = vld [vmem:[%s9868_s26 + $0x249] sm:$0xff]  ;;  %v11096_v30 = vld [vmem:[%s9868_s26 + $0x259] sm:$0xff] }
 0x18a   : > { %8685 = vmatmul.mubr.msk.f32.gmra.mrb[58].mxu1 %vm308_vm1, %v11828_v36  ;;  %9127 = vmatmul.mubr.msk.f32.gmra.mrb[26].mxu0 %vm308_vm1, %v7578_v32  ;;  %v7042_v32 = vld [vmem:[%s9868_s26 + $0x98] sm:$0xff]  ;;  %v7043_v36 = vld [vmem:[%s9868_s26 + $0xa8] sm:$0xff] }
 0x18b   : > { %8687 = vmatprep.mubr.msk.f32.mxu1 %vm308_vm1, %v11829_v59  ;;  %9129 = vmatprep.mubr.msk.f32.mxu0 %vm308_vm1, %v7579_v34  ;;  %v11106_v34 = vld [vmem:[%s9868_s26 + $0x261] sm:$0xff]  ;;  %v11110_v59 = vld [vmem:[%s9868_s26 + $0x271] sm:$0xff] }
 0x18e   : > { %8688 = vmatmul.mubr.msk.f32.gmra.mrb[60].mxu1 %vm308_vm1, %v11830_v4  ;;  %9130 = vmatmul.mubr.msk.f32.gmra.mrb[28].mxu0 %vm308_vm1, %v7580_v49  ;;  %v7044_v49 = vld [vmem:[%s9868_s26 + $0xb0] sm:$0xff]  ;;  %v7045_v4 = vld [vmem:[%s9868_s26 + $0xc0] sm:$0xff] }
 0x18f   : > { %8690 = vmatprep.mubr.msk.f32.mxu1 %vm308_vm1, %v11831_v61  ;;  %9132 = vmatprep.mubr.msk.f32.mxu0 %vm308_vm1, %v7581_v38  ;;  %v11120_v38 = vld [vmem:[%s9868_s26 + $0x279] sm:$0xff]  ;;  %v11124_v61 = vld [vmem:[%s9868_s26 + $0x289] sm:$0xff] }
 0x192   : > { %8691 = vmatmul.mubr.msk.f32.gmra.mrb[62].mxu1 %vm308_vm1, %v11832_v50  ;;  %9133 = vmatmul.mubr.msk.f32.gmra.mrb[30].mxu0 %vm308_vm1, %v7582_v43  ;;  %v7046_v43 = vld [vmem:[%s9868_s26 + $0xc8] sm:$0xff]  ;;  %v7047_v50 = vld [vmem:[%s9868_s26 + $0xd8] sm:$0xff] }
 0x193   : > { %8695 = vmatprep.mubr.msk.f32.mxu1 %vm308_vm1, %v7031_v45  ;;  %9135 = vmatprep.mubr.msk.f32.mxu0 %vm308_vm1, %v11022_v48  ;;  %v11134_v45 = vld [vmem:[%s9868_s26 + $0x291] sm:$0xff] }
 0x196   : > { %8696 = vmatmul.mubr.msk.f32.vlgmr.msra.gmra.mrb[0].mxu1 %vm308_vm1, %v7032_v52  ;;  %9136 = vmatmul.mubr.msk.f32.gmra.mrb[32].mxu0 %vm308_vm1, %v11032_v54  ;;  %v11138_v52 = vld [vmem:[%s9868_s26 + $0x2a1] sm:$0xff] }
 0x197   : > { %9282 = vmatpush3.msk.msra.mxu1 %vm501_vm0, %v9804_v60  ;;  %8698 = vmatprep.mubr.msk.f32.mxu1 %vm308_vm1, %v7033_v56  ;;  %v7048_v56 = vld [vmem:[%s9868_s26 + $0xe0] sm:$0xff]  ;;  %v11148_v60 = vld [vmem:[%s9868_s26 + $0x2a9] sm:$0xff] }
 0x198   : > { %9138 = vmatprep.mubr.msk.f32.mxu0 %vm308_vm1, %v11036_v58 }
 0x19a   : > { %8699 = vmatmul.mubr.msk.f32.gmra.mrb[2].mxu1 %vm308_vm1, %v7034_v62  ;;  %9139 = vmatmul.mubr.msk.f32.gmra.mrb[34].mxu0 %vm308_vm1, %v11048_v0  ;;  %v7049_v62 = vld [vmem:[%s9868_s26 + $0xf0] sm:$0xff] }
 0x19b   : > { %8701 = vmatprep.mubr.msk.f32.mxu1 %vm308_vm1, %v7035_v3  ;;  %9141 = vmatprep.mubr.msk.f32.mxu0 %vm308_vm1, %v11054_v5  ;;  %v11152_v3 = vld [vmem:[%s9868_s26 + $0x2b9] sm:$0xff] }
 0x19e   : > { %8702 = vmatmul.mubr.msk.f32.gmra.mrb[4].mxu1 %vm308_vm1, %v7036_v7  ;;  %9142 = vmatmul.mubr.msk.f32.gmra.mrb[36].mxu0 %vm308_vm1, %v11064_v9  ;;  %v7050_v7 = vld [vmem:[%s9868_s26 + $0xf8] sm:$0xff] }
 0x19f   : > { %8704 = vmatprep.mubr.msk.f32.mxu1 %vm308_vm1, %v7037_v12  ;;  %9144 = vmatprep.mubr.msk.f32.mxu0 %vm308_vm1, %v11068_v14  ;;  %v11162_v12 = vld [vmem:[%s9868_s26 + $0x2c1] sm:$0xff] }
 0x1a2   : > { %8705 = vmatmul.mubr.msk.f32.gmra.mrb[6].mxu1 %vm308_vm1, %v7038_v16  ;;  %9145 = vmatmul.mubr.msk.f32.gmra.mrb[38].mxu0 %vm308_vm1, %v11078_v18  ;;  %v7051_v16 = vld [vmem:[%s9868_s26 + $0x108] sm:$0xff] }
 0x1a3   : > { %8707 = vmatprep.mubr.msk.f32.mxu1 %vm308_vm1, %v7039_v20  ;;  %9147 = vmatprep.mubr.msk.f32.mxu0 %vm308_vm1, %v11082_v22  ;;  %v11166_v20 = vld [vmem:[%s9868_s26 + $0x2d1] sm:$0xff] }
 0x1a6   : > { %8708 = vmatmul.mubr.msk.f32.gmra.mrb[8].mxu1 %vm308_vm1, %v7040_v24  ;;  %9148 = vmatmul.mubr.msk.f32.gmra.mrb[40].mxu0 %vm308_vm1, %v11092_v26  ;;  %v7052_v24 = vld [vmem:[%s9868_s26 + $0x110] sm:$0xff] }
 0x1a7   : > { %8710 = vmatprep.mubr.msk.f32.mxu1 %vm308_vm1, %v7041_v28  ;;  %9150 = vmatprep.mubr.msk.f32.mxu0 %vm308_vm1, %v11096_v30  ;;  %v11176_v28 = vld [vmem:[%s9868_s26 + $0x2d9] sm:$0xff] }
 0x1aa   : > { %8711 = vmatmul.mubr.msk.f32.gmra.mrb[10].mxu1 %vm308_vm1, %v7042_v32  ;;  %9151 = vmatmul.mubr.msk.f32.gmra.mrb[42].mxu0 %vm308_vm1, %v11106_v34  ;;  %v7053_v32 = vld [vmem:[%s9868_s26 + $0x120] sm:$0xff] }
 0x1ab   : > { %8713 = vmatprep.mubr.msk.f32.mxu1 %vm308_vm1, %v7043_v36  ;;  %9153 = vmatprep.mubr.msk.f32.mxu0 %vm308_vm1, %v11110_v59  ;;  %v11180_v36 = vld [vmem:[%s9868_s26 + $0x2e9] sm:$0xff] }
 0x1ae   : > { %8714 = vmatmul.mubr.msk.f32.gmra.mrb[12].mxu1 %vm308_vm1, %v7044_v49  ;;  %9154 = vmatmul.mubr.msk.f32.gmra.mrb[44].mxu0 %vm308_vm1, %v11120_v38  ;;  %v7054_v49 = vld [vmem:[%s9868_s26 + $0x128] sm:$0xff] }
 0x1af   : > { %8716 = vmatprep.mubr.msk.f32.mxu1 %vm308_vm1, %v7045_v4  ;;  %9156 = vmatprep.mubr.msk.f32.mxu0 %vm308_vm1, %v11124_v61  ;;  %v11190_v4 = vld [vmem:[%s9868_s26 + $0x2f1] sm:$0xff] }
 0x1b2   : > { %8717 = vmatmul.mubr.msk.f32.gmra.mrb[14].mxu1 %vm308_vm1, %v7046_v43  ;;  %9157 = vmatmul.mubr.msk.f32.gmra.mrb[46].mxu0 %vm308_vm1, %v11134_v45  ;;  %v7055_v43 = vld [vmem:[%s9868_s26 + $0x138] sm:$0xff] }
 0x1b3   : > { %8719 = vmatprep.mubr.msk.f32.mxu1 %vm308_vm1, %v7047_v50  ;;  %9159 = vmatprep.mubr.msk.f32.mxu0 %vm308_vm1, %v11138_v52  ;;  %v11194_v50 = vld [vmem:[%s9868_s26 + $0x301] sm:$0xff] }
 0x1b6   : > { %8720 = vmatmul.mubr.msk.f32.gmra.mrb[16].mxu1 %vm308_vm1, %v7048_v56  ;;  %9160 = vmatmul.mubr.msk.f32.gmra.mrb[48].mxu0 %vm308_vm1, %v11148_v60  ;;  %v7056_v56 = vld [vmem:[%s9868_s26 + $0x140] sm:$0xff] }
 0x1b7   : > { %8722 = vmatprep.mubr.msk.f32.mxu1 %vm308_vm1, %v7049_v62  ;;  %9162 = vmatprep.mubr.msk.f32.mxu0 %vm308_vm1, %v11152_v3  ;;  %v11204_v62 = vld [vmem:[%s9868_s26 + $0x309] sm:$0xff] }
 0x1b8   : > { %11833 = vst [vmem:[#allocation2_spill] sm:$0xff] %v11204_v62 }
 0x1ba   : > { %8723 = vmatmul.mubr.msk.f32.gmra.mrb[18].mxu1 %vm308_vm1, %v7050_v7  ;;  %9163 = vmatmul.mubr.msk.f32.gmra.mrb[50].mxu0 %vm308_vm1, %v11162_v12  ;;  %v7057_v7 = vld [vmem:[%s9868_s26 + $0x150] sm:$0xff] }
 0x1bb   : > { %8725 = vmatprep.mubr.msk.f32.mxu1 %vm308_vm1, %v7051_v16  ;;  %9165 = vmatprep.mubr.msk.f32.mxu0 %vm308_vm1, %v11166_v20  ;;  %v11208_v16 = vld [vmem:[%s9868_s26 + $0x319] sm:$0xff] }
 0x1bc   : > { %11834 = vst [vmem:[#allocation3_spill] sm:$0xff] %v11208_v16 }
 0x1be   : > { %8726 = vmatmul.mubr.msk.f32.gmra.mrb[20].mxu1 %vm308_vm1, %v7052_v24  ;;  %9166 = vmatmul.mubr.msk.f32.gmra.mrb[52].mxu0 %vm308_vm1, %v11176_v28  ;;  %v7058_v24 = vld [vmem:[%s9868_s26 + $0x158] sm:$0xff] }
 0x1bf   : > { %8728 = vmatprep.mubr.msk.f32.mxu1 %vm308_vm1, %v7053_v32  ;;  %9168 = vmatprep.mubr.msk.f32.mxu0 %vm308_vm1, %v11180_v36  ;;  %v11218_v32 = vld [vmem:[%s9868_s26 + $0x321] sm:$0xff] }
 0x1c0   : > { %11835 = vst [vmem:[#allocation4_spill] sm:$0xff] %v11218_v32 }
 0x1c2   : > { %8729 = vmatmul.mubr.msk.f32.gmra.mrb[22].mxu1 %vm308_vm1, %v7054_v49  ;;  %9169 = vmatmul.mubr.msk.f32.gmra.mrb[54].mxu0 %vm308_vm1, %v11190_v4  ;;  %v7059_v49 = vld [vmem:[%s9868_s26 + $0x168] sm:$0xff] }
 0x1c3   : > { %8731 = vmatprep.mubr.msk.f32.mxu1 %vm308_vm1, %v7055_v43  ;;  %9171 = vmatprep.mubr.msk.f32.mxu0 %vm308_vm1, %v11194_v50  ;;  %v11222_v43 = vld [vmem:[%s9868_s26 + $0x331] sm:$0xff] }
 0x1c4   : > { %11836 = vst [vmem:[#allocation5_spill] sm:$0xff] %v11222_v43 }
 0x1c6   : > { %8732 = vmatmul.mubr.msk.f32.gmra.mrb[24].mxu1 %vm308_vm1, %v7056_v56  ;;  %9172 = vmatmul.mubr.msk.f32.gmra.mrb[56].mxu0 %vm308_vm1, %v11204_v62  ;;  %v7060_v56 = vld [vmem:[%s9868_s26 + $0x170] sm:$0xff]  ;;  %v11840_v62 = vld [vmem:[#allocation35_spill] sm:$0xff] }
 0x1c7   : > { %8734 = vmatprep.mubr.msk.f32.mxu1 %vm308_vm1, %v7057_v7  ;;  %9174 = vmatprep.mubr.msk.f32.mxu0 %vm308_vm1, %v11208_v16  ;;  %v11232_v7 = vld [vmem:[%s9868_s26 + $0x339] sm:$0xff]  ;;  %v7613_v16 = vld [vmem:[%s9868_s26 + $0x349] sm:$0xff] }
 0x1c8   : > { %11837 = vst [vmem:[#allocation6_spill] sm:$0xff] %v11232_v7 }
 0x1ca   : > { %8735 = vmatmul.mubr.msk.f32.gmra.mrb[26].mxu1 %vm308_vm1, %v7058_v24  ;;  %9175 = vmatmul.mubr.msk.f32.gmra.mrb[58].mxu0 %vm308_vm1, %v11218_v32  ;;  %v7614_v24 = vld [vmem:[%s9868_s26 + $0x351] sm:$0xff] }
 0x1cb   : > { %8737 = vmatprep.mubr.msk.f32.mxu1 %vm308_vm1, %v7059_v49  ;;  %9177 = vmatprep.mubr.msk.f32.mxu0 %vm308_vm1, %v11222_v43  ;;  %v7681_v49 = vld [vmem:[%s9868_s26 + $0x32] sm:$0xff]  ;;  %v11839_v43 = vld [vmem:[#allocation34_spill] sm:$0xff] }
 0x1cc   : > { %v11838_v32 = vld [vmem:[#allocation36_spill] sm:$0xff] }
 0x1ce   : > { %8738 = vmatmul.mubr.msk.f32.gmra.mrb[28].mxu1 %vm308_vm1, %v7060_v56  ;;  %9178 = vmatmul.mubr.msk.f32.gmra.mrb[60].mxu0 %vm308_vm1, %v11232_v7  ;;  %v7682_v56 = vld [vmem:[%s9868_s26 + $0x3a] sm:$0xff]  ;;  %v7683_v7 = vld [vmem:[%s9868_s26 + $0x4a] sm:$0xff] }
 0x1cf   : > { %8740 = vmatprep.mubr.msk.f32.mxu1 %vm308_vm1, %v10721_v51  ;;  %9180 = vmatprep.mubr.msk.f32.mxu0 %vm308_vm1, %v7613_v16  ;;  %v7684_v51 = vld [vmem:[%s9868_s26 + $0x52] sm:$0xff]  ;;  %v7685_v16 = vld [vmem:[%s9868_s26 + $0x62] sm:$0xff] }
 0x1d2   : > { %8741 = vmatmul.mubr.msk.f32.gmra.mrb[30].mxu1 %vm308_vm1, %v11838_v32  ;;  %9181 = vmatmul.mubr.msk.f32.gmra.mrb[62].mxu0 %vm308_vm1, %v7614_v24  ;;  %v7687_v32 = vld [vmem:[%s9868_s26 + $0x7a] sm:$0xff] }
 0x1d3   : > { %8743 = vmatprep.mubr.msk.f32.mxu1 %vm308_vm1, %v11839_v43  ;;  %9185 = vmatprep.mubr.msk.f32.mxu0 %vm308_vm1, %v7681_v49  ;;  %v7715_v43 = vld [vmem:[%s9868_s26 + $0x1fa] sm:$0xff]  ;;  %v7719_v49 = vld [vmem:[%s9868_s26 + $0x22a] sm:$0xff] }
 0x1d4   : > { %v7718_v24 = vld [vmem:[%s9868_s26 + $0x21a] sm:$0xff] }
 0x1d6   : > { %8744 = vmatmul.mubr.msk.f32.gmra.mrb[32].mxu1 %vm308_vm1, %v11840_v62  ;;  %9186 = vmatmul.mubr.msk.f32.vlgmr.msra.gmra.mrb[0].mxu0 %vm308_vm1, %v7682_v56  ;;  %v7686_v62 = vld [vmem:[%s9868_s26 + $0x6a] sm:$0xff]  ;;  %v11841_v56 = vld [vmem:[#allocation2_spill] sm:$0xff] }
 0x1d7   : > { %8746 = vmatprep.mubr.msk.f32.mxu1 %vm308_vm1, %v10548_v2  ;;  %9188 = vmatprep.mubr.msk.f32.mxu0 %vm308_vm1, %v7683_v7  ;;  %v7688_v2 = vld [vmem:[%s9868_s26 + $0x82] sm:$0xff]  ;;  %v7717_v7 = vld [vmem:[%s9868_s26 + $0x212] sm:$0xff] }
 0x1da   : > { %8747 = vmatmul.mubr.msk.f32.gmra.mrb[34].mxu1 %vm308_vm1, %v10561_v46  ;;  %9189 = vmatmul.mubr.msk.f32.gmra.mrb[2].mxu0 %vm308_vm1, %v7684_v51  ;;  %v7689_v46 = vld [vmem:[%s9868_s26 + $0x92] sm:$0xff]  ;;  %v7743_v51 = vld [vmem:[%s9868_s26 + $0x34a] sm:$0xff] }
 0x1db   : > { %8749 = vmatprep.mubr.msk.f32.mxu1 %vm308_vm1, %v10564_v10  ;;  %9191 = vmatprep.mubr.msk.f32.mxu0 %vm308_vm1, %v7685_v16  ;;  %v7690_v10 = vld [vmem:[%s9868_s26 + $0x9a] sm:$0xff]  ;;  %v11843_v16 = vld [vmem:[#allocation4_spill] sm:$0xff] }
 0x1de   : > { %8750 = vmatmul.mubr.msk.f32.gmra.mrb[36].mxu1 %vm308_vm1, %v10575_v8  ;;  %9192 = vmatmul.mubr.msk.f32.gmra.mrb[4].mxu0 %vm308_vm1, %v7686_v62  ;;  %v7691_v8 = vld [vmem:[%s9868_s26 + $0xaa] sm:$0xff]  ;;  %v7744_v62 = vld [vmem:[%s9868_s26 + $0x352] sm:$0xff] }
 0x1df   : > { %8752 = vmatprep.mubr.msk.f32.mxu1 %vm308_vm1, %v10578_v13  ;;  %9194 = vmatprep.mubr.msk.f32.mxu0 %vm308_vm1, %v7687_v32  ;;  %v7692_v13 = vld [vmem:[%s9868_s26 + $0xb2] sm:$0xff]  ;;  %v11845_v32 = vld [vmem:[#allocation6_spill] sm:$0xff] }
 0x1e2   : > { %8753 = vmatmul.mubr.msk.f32.gmra.mrb[38].mxu1 %vm308_vm1, %v10589_v17  ;;  %9195 = vmatmul.mubr.msk.f32.gmra.mrb[6].mxu0 %vm308_vm1, %v7688_v2  ;;  %v7693_v17 = vld [vmem:[%s9868_s26 + $0xc2] sm:$0xff] }
 0x1e3   : > { %8755 = vmatprep.mubr.msk.f32.mxu1 %vm308_vm1, %v10592_v21  ;;  %9197 = vmatprep.mubr.msk.f32.mxu0 %vm308_vm1, %v7689_v46  ;;  %v7694_v21 = vld [vmem:[%s9868_s26 + $0xca] sm:$0xff] }
 0x1e6   : > { %8756 = vmatmul.mubr.msk.f32.gmra.mrb[40].mxu1 %vm308_vm1, %v10603_v25  ;;  %9198 = vmatmul.mubr.msk.f32.gmra.mrb[8].mxu0 %vm308_vm1, %v7690_v10  ;;  %v7695_v25 = vld [vmem:[%s9868_s26 + $0xda] sm:$0xff] }
 0x1e7   : > { %8758 = vmatprep.mubr.msk.f32.mxu1 %vm308_vm1, %v10606_v29  ;;  %9200 = vmatprep.mubr.msk.f32.mxu0 %vm308_vm1, %v7691_v8  ;;  %v7696_v29 = vld [vmem:[%s9868_s26 + $0xe2] sm:$0xff] }
 0x1ea   : > { %8759 = vmatmul.mubr.msk.f32.gmra.mrb[42].mxu1 %vm308_vm1, %v10617_v33  ;;  %9201 = vmatmul.mubr.msk.f32.gmra.mrb[10].mxu0 %vm308_vm1, %v7692_v13  ;;  %v7697_v33 = vld [vmem:[%s9868_s26 + $0xf2] sm:$0xff] }
 0x1eb   : > { %8761 = vmatprep.mubr.msk.f32.mxu1 %vm308_vm1, %v10620_v37  ;;  %9203 = vmatprep.mubr.msk.f32.mxu0 %vm308_vm1, %v7693_v17  ;;  %v7698_v37 = vld [vmem:[%s9868_s26 + $0xfa] sm:$0xff] }
 0x1ee   : > { %8762 = vmatmul.mubr.msk.f32.gmra.mrb[44].mxu1 %vm308_vm1, %v10631_v40  ;;  %9204 = vmatmul.mubr.msk.f32.gmra.mrb[12].mxu0 %vm308_vm1, %v7694_v21  ;;  %v7699_v40 = vld [vmem:[%s9868_s26 + $0x10a] sm:$0xff] }
 0x1ef   : > { %8764 = vmatprep.mubr.msk.f32.mxu1 %vm308_vm1, %v10634_v42  ;;  %9206 = vmatprep.mubr.msk.f32.mxu0 %vm308_vm1, %v7695_v25  ;;  %v7700_v42 = vld [vmem:[%s9868_s26 + $0x112] sm:$0xff] }
 0x1f2   : > { %8765 = vmatmul.mubr.msk.f32.gmra.mrb[46].mxu1 %vm308_vm1, %v10645_v44  ;;  %9207 = vmatmul.mubr.msk.f32.gmra.mrb[14].mxu0 %vm308_vm1, %v7696_v29  ;;  %v7701_v44 = vld [vmem:[%s9868_s26 + $0x122] sm:$0xff] }
 0x1f3   : > { %8767 = vmatprep.mubr.msk.f32.mxu1 %vm308_vm1, %v10648_v39  ;;  %9209 = vmatprep.mubr.msk.f32.mxu0 %vm308_vm1, %v7697_v33  ;;  %v7702_v39 = vld [vmem:[%s9868_s26 + $0x12a] sm:$0xff] }
 0x1f6   : > { %8768 = vmatmul.mubr.msk.f32.gmra.mrb[48].mxu1 %vm308_vm1, %v10659_v47  ;;  %9210 = vmatmul.mubr.msk.f32.gmra.mrb[16].mxu0 %vm308_vm1, %v7698_v37  ;;  %v7703_v47 = vld [vmem:[%s9868_s26 + $0x13a] sm:$0xff] }
 0x1f7   : > { %8770 = vmatprep.mubr.msk.f32.mxu1 %vm308_vm1, %v10662_v31  ;;  %9212 = vmatprep.mubr.msk.f32.mxu0 %vm308_vm1, %v7699_v40  ;;  %v7704_v31 = vld [vmem:[%s9868_s26 + $0x142] sm:$0xff] }
 0x1fa   : > { %8771 = vmatmul.mubr.msk.f32.gmra.mrb[50].mxu1 %vm308_vm1, %v10673_v35  ;;  %9213 = vmatmul.mubr.msk.f32.gmra.mrb[18].mxu0 %vm308_vm1, %v7700_v42  ;;  %v7705_v35 = vld [vmem:[%s9868_s26 + $0x152] sm:$0xff] }
 0x1fb   : > { %8773 = vmatprep.mubr.msk.f32.mxu1 %vm308_vm1, %v10676_v23  ;;  %9215 = vmatprep.mubr.msk.f32.mxu0 %vm308_vm1, %v7701_v44  ;;  %v7706_v23 = vld [vmem:[%s9868_s26 + $0x15a] sm:$0xff] }
 0x1fe   : > { %8774 = vmatmul.mubr.msk.f32.gmra.mrb[52].mxu1 %vm308_vm1, %v10687_v15  ;;  %9216 = vmatmul.mubr.msk.f32.gmra.mrb[20].mxu0 %vm308_vm1, %v7702_v39  ;;  %v7707_v15 = vld [vmem:[%s9868_s26 + $0x16a] sm:$0xff] }
 0x1ff   : > { %8776 = vmatprep.mubr.msk.f32.mxu1 %vm308_vm1, %v10690_v27  ;;  %9218 = vmatprep.mubr.msk.f32.mxu0 %vm308_vm1, %v7703_v47  ;;  %v7708_v27 = vld [vmem:[%s9868_s26 + $0x172] sm:$0xff] }
 0x202   : > { %8777 = vmatmul.mubr.msk.f32.gmra.mrb[54].mxu1 %vm308_vm1, %v10701_v6  ;;  %9219 = vmatmul.mubr.msk.f32.gmra.mrb[22].mxu0 %vm308_vm1, %v7704_v31  ;;  %v7709_v6 = vld [vmem:[%s9868_s26 + $0x182] sm:$0xff] }
 0x203   : > { %8779 = vmatprep.mubr.msk.f32.mxu1 %vm308_vm1, %v10704_v19  ;;  %9221 = vmatprep.mubr.msk.f32.mxu0 %vm308_vm1, %v7705_v35  ;;  %v7710_v19 = vld [vmem:[%s9868_s26 + $0x18a] sm:$0xff] }
 0x206   : > { %8780 = vmatmul.mubr.msk.f32.gmra.mrb[56].mxu1 %vm308_vm1, %v10715_v63  ;;  %9222 = vmatmul.mubr.msk.f32.gmra.mrb[24].mxu0 %vm308_vm1, %v7706_v23  ;;  %v7711_v63 = vld [vmem:[%s9868_s26 + $0x19a] sm:$0xff] }
 0x207   : > { %8782 = vmatprep.mubr.msk.f32.mxu1 %vm308_vm1, %v10718_v11  ;;  %9224 = vmatprep.mubr.msk.f32.mxu0 %vm308_vm1, %v7707_v15  ;;  %v7712_v11 = vld [vmem:[%s9868_s26 + $0x1a2] sm:$0xff] }
 0x20a   : > { %8783 = vmatmul.mubr.msk.f32.gmra.mrb[58].mxu1 %vm308_vm1, %v10732_v53  ;;  %9225 = vmatmul.mubr.msk.f32.gmra.mrb[26].mxu0 %vm308_vm1, %v7708_v27  ;;  %v7193_v53 = vld [vmem:[%s9868_s26 + $0x1c9] sm:$0xff] }
 0x20b   : > { %8785 = vmatprep.mubr.msk.f32.mxu1 %vm308_vm1, %v10738_v55  ;;  %9227 = vmatprep.mubr.msk.f32.mxu0 %vm308_vm1, %v7709_v6  ;;  %v7713_v55 = vld [vmem:[%s9868_s26 + $0x1e2] sm:$0xff] }
 0x20e   : > { %8786 = vmatmul.mubr.msk.f32.gmra.mrb[60].mxu1 %vm308_vm1, %v10749_v57  ;;  %9228 = vmatmul.mubr.msk.f32.gmra.mrb[28].mxu0 %vm308_vm1, %v7710_v19  ;;  %v7194_v57 = vld [vmem:[%s9868_s26 + $0x1d1] sm:$0xff] }
 0x20f   : > { %8788 = vmatprep.mubr.msk.f32.mxu1 %vm308_vm1, %v10868_v1  ;;  %9230 = vmatprep.mubr.msk.f32.mxu0 %vm308_vm1, %v7711_v63  ;;  %v7714_v1 = vld [vmem:[%s9868_s26 + $0x1ea] sm:$0xff] }
 0x212   : > { %8789 = vmatmul.mubr.msk.f32.gmra.mrb[62].mxu1 %vm308_vm1, %v10879_v41  ;;  %9231 = vmatmul.mubr.msk.f32.gmra.mrb[30].mxu0 %vm308_vm1, %v7712_v11  ;;  %v7716_v41 = vld [vmem:[%s9868_s26 + $0x202] sm:$0xff] }
 0x213   : > { %8841 = vmatprep.mubr.msk.f32.mxu1 %vm308_vm1, %v7193_v53  ;;  %9233 = vmatprep.mubr.msk.f32.mxu0 %vm308_vm1, %v7713_v55 }
 0x216   : > { %8842 = vmatmul.mubr.msk.f32.vlgmr.msra.gmra.mrb[32].mxu1 %vm308_vm1, %v7194_v57  ;;  %9234 = vmatmul.mubr.msk.f32.gmra.mrb[32].mxu0 %vm308_vm1, %v7714_v1 }
 0x217   : > { %8844 = vmatprep.mubr.msk.f32.mxu1 %vm308_vm1, %v11022_v48  ;;  %9236 = vmatprep.mubr.msk.f32.mxu0 %vm308_vm1, %v7715_v43  ;;  %v7720_v48 = vld [vmem:[%s9868_s26 + $0x232] sm:$0xff] }
 0x21a   : > { %8845 = vmatmul.mubr.msk.f32.gmra.mrb[34].mxu1 %vm308_vm1, %v11032_v54  ;;  %9237 = vmatmul.mubr.msk.f32.gmra.mrb[34].mxu0 %vm308_vm1, %v7716_v41  ;;  %v7721_v54 = vld [vmem:[%s9868_s26 + $0x242] sm:$0xff] }
 0x21b   : > { %8847 = vmatprep.mubr.msk.f32.mxu1 %vm308_vm1, %v11036_v58  ;;  %9239 = vmatprep.mubr.msk.f32.mxu0 %vm308_vm1, %v7717_v7  ;;  %v7722_v58 = vld [vmem:[%s9868_s26 + $0x24a] sm:$0xff] }
 0x21e   : > { %8848 = vmatmul.mubr.msk.f32.gmra.mrb[36].mxu1 %vm308_vm1, %v11048_v0  ;;  %9240 = vmatmul.mubr.msk.f32.gmra.mrb[36].mxu0 %vm308_vm1, %v7718_v24  ;;  %v7723_v0 = vld [vmem:[%s9868_s26 + $0x25a] sm:$0xff] }
 0x21f   : > { %8850 = vmatprep.mubr.msk.f32.mxu1 %vm308_vm1, %v11054_v5  ;;  %9242 = vmatprep.mubr.msk.f32.mxu0 %vm308_vm1, %v7719_v49  ;;  %v7724_v5 = vld [vmem:[%s9868_s26 + $0x262] sm:$0xff]  ;;  %v11558_v49 = vld [vmem:[%s11724_s2] ss:$0 sm:$0xff] }
 0x222   : > { %8851 = vmatmul.mubr.msk.f32.gmra.mrb[38].mxu1 %vm308_vm1, %v11064_v9  ;;  %9243 = vmatmul.mubr.msk.f32.gmra.mrb[38].mxu0 %vm308_vm1, %v7720_v48  ;;  %v7725_v9 = vld [vmem:[%s9868_s26 + $0x272] sm:$0xff] }
 0x223   : > { %8853 = vmatprep.mubr.msk.f32.mxu1 %vm308_vm1, %v11068_v14  ;;  %9245 = vmatprep.mubr.msk.f32.mxu0 %vm308_vm1, %v7721_v54  ;;  %v7726_v14 = vld [vmem:[%s9868_s26 + $0x27a] sm:$0xff] }
 0x226   : > { %8854 = vmatmul.mubr.msk.f32.gmra.mrb[40].mxu1 %vm308_vm1, %v11078_v18  ;;  %9246 = vmatmul.mubr.msk.f32.gmra.mrb[40].mxu0 %vm308_vm1, %v7722_v58  ;;  %v7727_v18 = vld [vmem:[%s9868_s26 + $0x28a] sm:$0xff] }
 0x227   : > { %8856 = vmatprep.mubr.msk.f32.mxu1 %vm308_vm1, %v11082_v22  ;;  %9248 = vmatprep.mubr.msk.f32.mxu0 %vm308_vm1, %v7723_v0  ;;  %v7728_v22 = vld [vmem:[%s9868_s26 + $0x292] sm:$0xff] }
 0x22a   : > { %8857 = vmatmul.mubr.msk.f32.gmra.mrb[42].mxu1 %vm308_vm1, %v11092_v26  ;;  %9249 = vmatmul.mubr.msk.f32.gmra.mrb[42].mxu0 %vm308_vm1, %v7724_v5  ;;  %v7729_v26 = vld [vmem:[%s9868_s26 + $0x2a2] sm:$0xff] }
 0x22b   : > { %8859 = vmatprep.mubr.msk.f32.mxu1 %vm308_vm1, %v11096_v30  ;;  %9251 = vmatprep.mubr.msk.f32.mxu0 %vm308_vm1, %v7725_v9  ;;  %v7730_v30 = vld [vmem:[%s9868_s26 + $0x2aa] sm:$0xff] }
 0x22e   : > { %8860 = vmatmul.mubr.msk.f32.gmra.mrb[44].mxu1 %vm308_vm1, %v11106_v34  ;;  %9252 = vmatmul.mubr.msk.f32.gmra.mrb[44].mxu0 %vm308_vm1, %v7726_v14  ;;  %v7731_v34 = vld [vmem:[%s9868_s26 + $0x2ba] sm:$0xff] }
 0x22f   : > { %8862 = vmatprep.mubr.msk.f32.mxu1 %vm308_vm1, %v11110_v59  ;;  %9254 = vmatprep.mubr.msk.f32.mxu0 %vm308_vm1, %v7727_v18  ;;  %v7732_v59 = vld [vmem:[%s9868_s26 + $0x2c2] sm:$0xff] }
 0x232   : > { %8863 = vmatmul.mubr.msk.f32.gmra.mrb[46].mxu1 %vm308_vm1, %v11120_v38  ;;  %9255 = vmatmul.mubr.msk.f32.gmra.mrb[46].mxu0 %vm308_vm1, %v7728_v22  ;;  %v7733_v38 = vld [vmem:[%s9868_s26 + $0x2d2] sm:$0xff] }
 0x233   : > { %8865 = vmatprep.mubr.msk.f32.mxu1 %vm308_vm1, %v11124_v61  ;;  %9257 = vmatprep.mubr.msk.f32.mxu0 %vm308_vm1, %v7729_v26  ;;  %v7734_v61 = vld [vmem:[%s9868_s26 + $0x2da] sm:$0xff] }
 0x236   : > { %8866 = vmatmul.mubr.msk.f32.gmra.mrb[48].mxu1 %vm308_vm1, %v11134_v45  ;;  %9258 = vmatmul.mubr.msk.f32.gmra.mrb[48].mxu0 %vm308_vm1, %v7730_v30  ;;  %v7735_v45 = vld [vmem:[%s9868_s26 + $0x2ea] sm:$0xff] }
 0x237   : > { %8868 = vmatprep.mubr.msk.f32.mxu1 %vm308_vm1, %v11138_v52  ;;  %9260 = vmatprep.mubr.msk.f32.mxu0 %vm308_vm1, %v7731_v34  ;;  %v7736_v52 = vld [vmem:[%s9868_s26 + $0x2f2] sm:$0xff] }
 0x23a   : > { %8869 = vmatmul.mubr.msk.f32.gmra.mrb[50].mxu1 %vm308_vm1, %v11148_v60  ;;  %9261 = vmatmul.mubr.msk.f32.gmra.mrb[50].mxu0 %vm308_vm1, %v7732_v59  ;;  %v7737_v60 = vld [vmem:[%s9868_s26 + $0x302] sm:$0xff] }
 0x23b   : > { %8871 = vmatprep.mubr.msk.f32.mxu1 %vm308_vm1, %v11152_v3  ;;  %9263 = vmatprep.mubr.msk.f32.mxu0 %vm308_vm1, %v7733_v38  ;;  %v7738_v3 = vld [vmem:[%s9868_s26 + $0x30a] sm:$0xff] }
 0x23e   : > { %8872 = vmatmul.mubr.msk.f32.gmra.mrb[52].mxu1 %vm308_vm1, %v11162_v12  ;;  %9264 = vmatmul.mubr.msk.f32.gmra.mrb[52].mxu0 %vm308_vm1, %v7734_v61  ;;  %v7739_v12 = vld [vmem:[%s9868_s26 + $0x31a] sm:$0xff] }
 0x23f   : > { %8874 = vmatprep.mubr.msk.f32.mxu1 %vm308_vm1, %v11166_v20  ;;  %9266 = vmatprep.mubr.msk.f32.mxu0 %vm308_vm1, %v7735_v45  ;;  %v7740_v20 = vld [vmem:[%s9868_s26 + $0x322] sm:$0xff] }
 0x242   : > { %8875 = vmatmul.mubr.msk.f32.gmra.mrb[54].mxu1 %vm308_vm1, %v11176_v28  ;;  %9267 = vmatmul.mubr.msk.f32.gmra.mrb[54].mxu0 %vm308_vm1, %v7736_v52  ;;  %v7741_v28 = vld [vmem:[%s9868_s26 + $0x332] sm:$0xff] }
 0x243   : > { %8877 = vmatprep.mubr.msk.f32.mxu1 %vm308_vm1, %v11180_v36  ;;  %9269 = vmatprep.mubr.msk.f32.mxu0 %vm308_vm1, %v7737_v60  ;;  %v11842_v36 = vld [vmem:[#allocation3_spill] sm:$0xff] }
 0x246   : > { %8878 = vmatmul.mubr.msk.f32.gmra.mrb[56].mxu1 %vm308_vm1, %v11190_v4  ;;  %9270 = vmatmul.mubr.msk.f32.gmra.mrb[56].mxu0 %vm308_vm1, %v7738_v3  ;;  %v7742_v4 = vld [vmem:[%s9868_s26 + $0x33a] sm:$0xff] }
 0x247   : > { %8880 = vmatprep.mubr.msk.f32.mxu1 %vm308_vm1, %v11194_v50  ;;  %9272 = vmatprep.mubr.msk.f32.mxu0 %vm308_vm1, %v7739_v12  ;;  %v11844_v50 = vld [vmem:[#allocation5_spill] sm:$0xff] }
 0x24a   : > { %8881 = vmatmul.mubr.msk.f32.gmra.mrb[58].mxu1 %vm308_vm1, %v11841_v56  ;;  %9273 = vmatmul.mubr.msk.f32.gmra.mrb[58].mxu0 %vm308_vm1, %v7740_v20 }
 0x24b   : > { %8883 = vmatprep.mubr.msk.f32.mxu1 %vm308_vm1, %v11842_v36  ;;  %9275 = vmatprep.mubr.msk.f32.mxu0 %vm308_vm1, %v7741_v28 }
 0x24e   : > { %8884 = vmatmul.mubr.msk.f32.gmra.mrb[60].mxu1 %vm308_vm1, %v11843_v16  ;;  %9276 = vmatmul.mubr.msk.f32.gmra.mrb[60].mxu0 %vm308_vm1, %v7742_v4 }
 0x24f   : > { %8886 = vmatprep.mubr.msk.f32.mxu1 %vm308_vm1, %v11844_v50  ;;  %9278 = vmatprep.mubr.msk.f32.mxu0 %vm308_vm1, %v7743_v51 }
 0x252   : > { %8887 = vmatmul.mubr.msk.f32.gmra.mrb[62].mxu1 %vm308_vm1, %v11845_v32  ;;  %9279 = vmatmul.mubr.msk.f32.gmra.mrb[62].mxu0 %vm308_vm1, %v7744_v62 }
 0x269   : > { %v8697_v2 = vpop.f32.mrb[0].mxu1 }
 0x26a   : > { %v2508_v46 = vpop.f32.mrb[1].mxu1 }
 0x26d   : > { %v8700_v10 = vpop.f32.mrb[2].mxu1 }
 0x26e   : > { %v2518_v8 = vpop.f32.mrb[3].mxu1 }
 0x271   : > { %v8703_v13 = vpop.f32.mrb[4].mxu1 }
 0x272   : > { %v2528_v17 = vpop.f32.mrb[5].mxu1 }
 0x275   : > { %v11501_v21 = vpop.f32.mrb[6].mxu1 }
 0x276   : > { %v11503_v25 = vpop.f32.mrb[7].mxu1 }
 0x279   : > { %v11505_v29 = vpop.f32.mrb[8].mxu1 }
 0x27a   : > { %v11507_v33 = vpop.f32.mrb[9].mxu1 }
 0x27d   : > { %v11509_v37 = vpop.f32.mrb[10].mxu1 }
 0x27e   : > { %v11511_v40 = vpop.f32.mrb[11].mxu1 }
 0x281   : > { %v11513_v42 = vpop.f32.mrb[12].mxu1 }
 0x282   : > { %v11515_v44 = vpop.f32.mrb[13].mxu1 }
 0x285   : > { %v11517_v39 = vpop.f32.mrb[14].mxu1 }
 0x286   : > { %v11519_v47 = vpop.f32.mrb[15].mxu1 }
 0x289   : > { %v11521_v31 = vpop.f32.mrb[16].mxu1 }
 0x28a   : > { %v11523_v35 = vpop.f32.mrb[17].mxu1 }
 0x28d   : > { %v11525_v23 = vpop.f32.mrb[18].mxu1 }
 0x28e   : > { %v11527_v15 = vpop.f32.mrb[19].mxu1 }
 0x291   : > { %v11529_v27 = vpop.f32.mrb[20].mxu1 }
 0x292   : > { %v11531_v6 = vpop.f32.mrb[21].mxu1 }
 0x295   : > { %v11533_v19 = vpop.f32.mrb[22].mxu1 }
 0x296   : > { %v11535_v63 = vpop.f32.mrb[23].mxu1 }
 0x299   : > { %v11537_v11 = vpop.f32.mrb[24].mxu1 }
 0x29a   : > { %v11539_v53 = vpop.f32.mrb[25].mxu1 }
 0x29d   : > { %v11541_v55 = vpop.f32.mrb[26].mxu1 }
 0x29e   : > { %v11543_v57 = vpop.f32.mrb[27].mxu1 }
 0x2a1   : > { %v11547_v1 = vpop.f32.mrb[28].mxu1 }
 0x2a2   : > { %v11549_v43 = vpop.f32.mrb[29].mxu1 }
 0x2a5   : > { %v11551_v41 = vpop.f32.mrb[30].mxu1 }
 0x2a6   : > { %v11553_v7 = vpop.f32.mrb[31].mxu1 }
 0x2a9   : > { %v9187_v24 = vpop.f32.mrb[0].mxu0 }
 0x2aa   : > { %v9283_v48 = vadd.f32 %v9187_v24, %v8697_v2  ;;  %v6059_v54 = vpop.f32.mrb[1].mxu0 }
 0x2ab   : > { %v9284_v58 = vadd.f32 %v6059_v54, %v2508_v46 }
 0x2ac   : > { %v6450_v0 = vadd.f32 %v9283_v48, %v11558_v49 }
 0x2ad   : > { %v6449_v5 = vadd.f32 %v9284_v58, %v11558_v49  ;;  %v9190_v9 = vpop.f32.mrb[2].mxu0 }
 0x2ae   : > { %vm6514_vm2 = vcmp.gt.f32.partialorder %v6450_v0, 0.0  ;;  %v6578_v14 = vmul.f32 0.2, %v6450_v0  ;;  %v9285_v18 = vadd.f32 %v9190_v9, %v8700_v10  ;;  %v6069_v22 = vpop.f32.mrb[3].mxu0 }
 0x2af   : > { %vm6513_vm3 = vcmp.gt.f32.partialorder %v6449_v5, 0.0  ;;  %v6577_v26 = vmul.f32 0.2, %v6449_v5  ;;  %v9286_v30 = vadd.f32 %v6069_v22, %v2518_v8 }
 0x2b0   : > { %v6642_v34 = vsel %vm6514_vm2, %v6450_v0, %v6578_v14  ;;  %v6452_v59 = vadd.f32 %v9285_v18, %v11558_v49 }
 0x2b1   : > { %6706 = vst [vmem:[%s11565_s19 + $0x8] sm:$0xff] %v6642_v34  ;;  %v6641_v38 = vsel %vm6513_vm3, %v6449_v5, %v6577_v26  ;;  %v6451_v61 = vadd.f32 %v9286_v30, %v11558_v49  ;;  %v9193_v45 = vpop.f32.mrb[4].mxu0 }
 0x2b2   : > { %6705 = vst [vmem:[%s11565_s19] sm:$0xff] %v6641_v38  ;;  %vm6516_vm4 = vcmp.gt.f32.partialorder %v6452_v59, 0.0  ;;  %v6580_v52 = vmul.f32 0.2, %v6452_v59  ;;  %v9287_v60 = vadd.f32 %v9193_v45, %v8703_v13  ;;  %v6079_v3 = vpop.f32.mrb[5].mxu0 }
 0x2b3   : > { %vm6515_vm5 = vcmp.gt.f32.partialorder %v6451_v61, 0.0  ;;  %v6579_v12 = vmul.f32 0.2, %v6451_v61  ;;  %v9288_v20 = vadd.f32 %v6079_v3, %v2528_v17 }
 0x2b4   : > { %v6644_v28 = vsel %vm6516_vm4, %v6452_v59, %v6580_v52  ;;  %v6454_v56 = vadd.f32 %v9287_v60, %v11558_v49 }
 0x2b5   : > { %6708 = vst [vmem:[%s11565_s19 + $0x18] sm:$0xff] %v6644_v28  ;;  %v6643_v36 = vsel %vm6515_vm5, %v6451_v61, %v6579_v12  ;;  %v6453_v4 = vadd.f32 %v9288_v20, %v11558_v49  ;;  %v9196_v51 = vpop.f32.mrb[6].mxu0 }
 0x2b6   : > { %6707 = vst [vmem:[%s11565_s19 + $0x10] sm:$0xff] %v6643_v36  ;;  %vm6518_vm6 = vcmp.gt.f32.partialorder %v6454_v56, 0.0  ;;  %v6582_v16 = vmul.f32 0.2, %v6454_v56  ;;  %v9289_v50 = vadd.f32 %v9196_v51, %v11501_v21  ;;  %v6089_v62 = vpop.f32.mrb[7].mxu0 }
 0x2b7   : > { %vm6517_vm7 = vcmp.gt.f32.partialorder %v6453_v4, 0.0  ;;  %v6581_v32 = vmul.f32 0.2, %v6453_v4  ;;  %v9290_v2 = vadd.f32 %v6089_v62, %v11503_v25 }
 0x2b8   : > { %v6646_v46 = vsel %vm6518_vm6, %v6454_v56, %v6582_v16  ;;  %v6456_v10 = vadd.f32 %v9289_v50, %v11558_v49 }
 0x2b9   : > { %6710 = vst [vmem:[%s11565_s19 + $0x28] sm:$0xff] %v6646_v46  ;;  %v6645_v8 = vsel %vm6517_vm7, %v6453_v4, %v6581_v32  ;;  %v6455_v13 = vadd.f32 %v9290_v2, %v11558_v49  ;;  %v9199_v17 = vpop.f32.mrb[8].mxu0 }
 0x2ba   : > { %6709 = vst [vmem:[%s11565_s19 + $0x20] sm:$0xff] %v6645_v8  ;;  %vm6520_vm8 = vcmp.gt.f32.partialorder %v6456_v10, 0.0  ;;  %v6584_v24 = vmul.f32 0.2, %v6456_v10  ;;  %v9291_v21 = vadd.f32 %v9199_v17, %v11505_v29  ;;  %v6099_v48 = vpop.f32.mrb[9].mxu0 }
 0x2bb   : > { %vm6519_vm9 = vcmp.gt.f32.partialorder %v6455_v13, 0.0  ;;  %v6583_v54 = vmul.f32 0.2, %v6455_v13  ;;  %v9292_v25 = vadd.f32 %v6099_v48, %v11507_v33 }
 0x2bc   : > { %v6648_v58 = vsel %vm6520_vm8, %v6456_v10, %v6584_v24  ;;  %v6458_v0 = vadd.f32 %v9291_v21, %v11558_v49 }
 0x2bd   : > { %6712 = vst [vmem:[%s11565_s19 + $0x38] sm:$0xff] %v6648_v58  ;;  %v6647_v5 = vsel %vm6519_vm9, %v6455_v13, %v6583_v54  ;;  %v6457_v9 = vadd.f32 %v9292_v25, %v11558_v49  ;;  %v9202_v14 = vpop.f32.mrb[10].mxu0 }
 0x2be   : > { %6711 = vst [vmem:[%s11565_s19 + $0x30] sm:$0xff] %v6647_v5  ;;  %vm6522_vm10 = vcmp.gt.f32.partialorder %v6458_v0, 0.0  ;;  %v6586_v18 = vmul.f32 0.2, %v6458_v0  ;;  %v9293_v29 = vadd.f32 %v9202_v14, %v11509_v37  ;;  %v6109_v22 = vpop.f32.mrb[11].mxu0 }
 0x2bf   : > { %vm6521_vm11 = vcmp.gt.f32.partialorder %v6457_v9, 0.0  ;;  %v6585_v26 = vmul.f32 0.2, %v6457_v9  ;;  %v9294_v33 = vadd.f32 %v6109_v22, %v11511_v40 }
 0x2c0   : > { %v6650_v30 = vsel %vm6522_vm10, %v6458_v0, %v6586_v18  ;;  %v6460_v34 = vadd.f32 %v9293_v29, %v11558_v49 }
 0x2c1   : > { %6714 = vst [vmem:[%s11565_s19 + $0x48] sm:$0xff] %v6650_v30  ;;  %v6649_v59 = vsel %vm6521_vm11, %v6457_v9, %v6585_v26  ;;  %v6459_v38 = vadd.f32 %v9294_v33, %v11558_v49  ;;  %v9205_v61 = vpop.f32.mrb[12].mxu0 }
 0x2c2   : > { %6713 = vst [vmem:[%s11565_s19 + $0x40] sm:$0xff] %v6649_v59  ;;  %vm6524_vm12 = vcmp.gt.f32.partialorder %v6460_v34, 0.0  ;;  %v6588_v45 = vmul.f32 0.2, %v6460_v34  ;;  %v9295_v37 = vadd.f32 %v9205_v61, %v11513_v42  ;;  %v6119_v52 = vpop.f32.mrb[13].mxu0 }
 0x2c3   : > { %vm6523_vm13 = vcmp.gt.f32.partialorder %v6459_v38, 0.0  ;;  %v6587_v60 = vmul.f32 0.2, %v6459_v38  ;;  %v9296_v40 = vadd.f32 %v6119_v52, %v11515_v44 }
 0x2c4   : > { %v6652_v3 = vsel %vm6524_vm12, %v6460_v34, %v6588_v45  ;;  %v6462_v12 = vadd.f32 %v9295_v37, %v11558_v49 }
 0x2c5   : > { %6716 = vst [vmem:[%s11565_s19 + $0x58] sm:$0xff] %v6652_v3  ;;  %v6651_v20 = vsel %vm6523_vm13, %v6459_v38, %v6587_v60  ;;  %v6461_v28 = vadd.f32 %v9296_v40, %v11558_v49  ;;  %v9208_v56 = vpop.f32.mrb[14].mxu0 }
 0x2c6   : > { %6715 = vst [vmem:[%s11565_s19 + $0x50] sm:$0xff] %v6651_v20  ;;  %vm6526_vm14 = vcmp.gt.f32.partialorder %v6462_v12, 0.0  ;;  %v6590_v36 = vmul.f32 0.2, %v6462_v12  ;;  %v9297_v42 = vadd.f32 %v9208_v56, %v11517_v39  ;;  %v6129_v4 = vpop.f32.mrb[15].mxu0 }
 0x2c7   : > { %vm6525_vm15 = vcmp.gt.f32.partialorder %v6461_v28, 0.0  ;;  %v6589_v51 = vmul.f32 0.2, %v6461_v28  ;;  %v9298_v44 = vadd.f32 %v6129_v4, %v11519_v47 }
 0x2c8   : > { %v6654_v16 = vsel %vm6526_vm14, %v6462_v12, %v6590_v36  ;;  %v6464_v50 = vadd.f32 %v9297_v42, %v11558_v49 }
 0x2c9   : > { %6718 = vst [vmem:[%s11565_s19 + $0x68] sm:$0xff] %v6654_v16  ;;  %v6653_v62 = vsel %vm6525_vm15, %v6461_v28, %v6589_v51  ;;  %v6463_v32 = vadd.f32 %v9298_v44, %v11558_v49  ;;  %v9211_v2 = vpop.f32.mrb[16].mxu0 }
 0x2ca   : > { %6717 = vst [vmem:[%s11565_s19 + $0x60] sm:$0xff] %v6653_v62  ;;  %vm6528_vm0 = vcmp.gt.f32.partialorder %v6464_v50, 0.0  ;;  %v6592_v46 = vmul.f32 0.2, %v6464_v50  ;;  %v9299_v39 = vadd.f32 %v9211_v2, %v11521_v31  ;;  %v6139_v10 = vpop.f32.mrb[17].mxu0 }
 0x2cb   : > { %vm6527_vm1 = vcmp.gt.f32.partialorder %v6463_v32, 0.0  ;;  %v6591_v8 = vmul.f32 0.2, %v6463_v32  ;;  %v9300_v47 = vadd.f32 %v6139_v10, %v11523_v35 }
 0x2cc   : > { %v6656_v13 = vsel %vm6528_vm0, %v6464_v50, %v6592_v46  ;;  %v6466_v17 = vadd.f32 %v9299_v39, %v11558_v49 }
 0x2cd   : > { %6720 = vst [vmem:[%s11565_s19 + $0x78] sm:$0xff] %v6656_v13  ;;  %v6655_v24 = vsel %vm6527_vm1, %v6463_v32, %v6591_v8  ;;  %v6465_v21 = vadd.f32 %v9300_v47, %v11558_v49  ;;  %v9214_v48 = vpop.f32.mrb[18].mxu0 }
 0x2ce   : > { %6719 = vst [vmem:[%s11565_s19 + $0x70] sm:$0xff] %v6655_v24  ;;  %vm6530_vm2 = vcmp.gt.f32.partialorder %v6466_v17, 0.0  ;;  %v6594_v54 = vmul.f32 0.2, %v6466_v17  ;;  %v9301_v31 = vadd.f32 %v9214_v48, %v11525_v23  ;;  %v6149_v25 = vpop.f32.mrb[19].mxu0 }
 0x2cf   : > { %vm6529_vm3 = vcmp.gt.f32.partialorder %v6465_v21, 0.0  ;;  %v6593_v58 = vmul.f32 0.2, %v6465_v21  ;;  %v9302_v35 = vadd.f32 %v6149_v25, %v11527_v15 }
 0x2d0   : > { %v6658_v0 = vsel %vm6530_vm2, %v6466_v17, %v6594_v54  ;;  %v6468_v5 = vadd.f32 %v9301_v31, %v11558_v49 }
 0x2d1   : > { %6722 = vst [vmem:[%s11565_s19 + $0x88] sm:$0xff] %v6658_v0  ;;  %v6657_v9 = vsel %vm6529_vm3, %v6465_v21, %v6593_v58  ;;  %v6467_v14 = vadd.f32 %v9302_v35, %v11558_v49  ;;  %v9217_v18 = vpop.f32.mrb[20].mxu0 }
 0x2d2   : > { %6721 = vst [vmem:[%s11565_s19 + $0x80] sm:$0xff] %v6657_v9  ;;  %vm6532_vm4 = vcmp.gt.f32.partialorder %v6468_v5, 0.0  ;;  %v6596_v29 = vmul.f32 0.2, %v6468_v5  ;;  %v9303_v23 = vadd.f32 %v9217_v18, %v11529_v27  ;;  %v6159_v22 = vpop.f32.mrb[21].mxu0 }
 0x2d3   : > { %vm6531_vm5 = vcmp.gt.f32.partialorder %v6467_v14, 0.0  ;;  %v6595_v26 = vmul.f32 0.2, %v6467_v14  ;;  %v9304_v15 = vadd.f32 %v6159_v22, %v11531_v6 }
 0x2d4   : > { %v6660_v33 = vsel %vm6532_vm4, %v6468_v5, %v6596_v29  ;;  %v6470_v30 = vadd.f32 %v9303_v23, %v11558_v49 }
 0x2d5   : > { %6724 = vst [vmem:[%s11565_s19 + $0x98] sm:$0xff] %v6660_v33  ;;  %v6659_v34 = vsel %vm6531_vm5, %v6467_v14, %v6595_v26  ;;  %v6469_v59 = vadd.f32 %v9304_v15, %v11558_v49  ;;  %v9220_v38 = vpop.f32.mrb[22].mxu0 }
 0x2d6   : > { %6723 = vst [vmem:[%s11565_s19 + $0x90] sm:$0xff] %v6659_v34  ;;  %vm6534_vm6 = vcmp.gt.f32.partialorder %v6470_v30, 0.0  ;;  %v6598_v61 = vmul.f32 0.2, %v6470_v30  ;;  %v9305_v27 = vadd.f32 %v9220_v38, %v11533_v19  ;;  %v6169_v45 = vpop.f32.mrb[23].mxu0 }
 0x2d7   : > { %vm6533_vm7 = vcmp.gt.f32.partialorder %v6469_v59, 0.0  ;;  %v6597_v37 = vmul.f32 0.2, %v6469_v59  ;;  %v9306_v6 = vadd.f32 %v6169_v45, %v11535_v63 }
 0x2d8   : > { %v6662_v52 = vsel %vm6534_vm6, %v6470_v30, %v6598_v61  ;;  %v6472_v60 = vadd.f32 %v9305_v27, %v11558_v49 }
 0x2d9   : > { %6726 = vst [vmem:[%s11565_s19 + $0xa8] sm:$0xff] %v6662_v52  ;;  %v6661_v40 = vsel %vm6533_vm7, %v6469_v59, %v6597_v37  ;;  %v6471_v3 = vadd.f32 %v9306_v6, %v11558_v49  ;;  %v9223_v12 = vpop.f32.mrb[24].mxu0 }
 0x2da   : > { %6725 = vst [vmem:[%s11565_s19 + $0xa0] sm:$0xff] %v6661_v40  ;;  %vm6536_vm8 = vcmp.gt.f32.partialorder %v6472_v60, 0.0  ;;  %v6600_v20 = vmul.f32 0.2, %v6472_v60  ;;  %v9307_v19 = vadd.f32 %v9223_v12, %v11537_v11  ;;  %v6179_v28 = vpop.f32.mrb[25].mxu0 }
 0x2db   : > { %vm6535_vm9 = vcmp.gt.f32.partialorder %v6471_v3, 0.0  ;;  %v6599_v56 = vmul.f32 0.2, %v6471_v3  ;;  %v9308_v63 = vadd.f32 %v6179_v28, %v11539_v53 }
 0x2dc   : > { %v6664_v36 = vsel %vm6536_vm8, %v6472_v60, %v6600_v20  ;;  %v6474_v42 = vadd.f32 %v9307_v19, %v11558_v49 }
 0x2dd   : > { %6728 = vst [vmem:[%s11565_s19 + $0xb8] sm:$0xff] %v6664_v36  ;;  %v6663_v4 = vsel %vm6535_vm9, %v6471_v3, %v6599_v56  ;;  %v6473_v51 = vadd.f32 %v9308_v63, %v11558_v49  ;;  %v9226_v44 = vpop.f32.mrb[26].mxu0 }
 0x2de   : > { %6727 = vst [vmem:[%s11565_s19 + $0xb0] sm:$0xff] %v6663_v4  ;;  %vm6538_vm10 = vcmp.gt.f32.partialorder %v6474_v42, 0.0  ;;  %v6602_v16 = vmul.f32 0.2, %v6474_v42  ;;  %v9309_v11 = vadd.f32 %v9226_v44, %v11541_v55  ;;  %v6189_v50 = vpop.f32.mrb[27].mxu0 }
 0x2df   : > { %vm6537_vm11 = vcmp.gt.f32.partialorder %v6473_v51, 0.0  ;;  %v6601_v62 = vmul.f32 0.2, %v6473_v51  ;;  %v9310_v53 = vadd.f32 %v6189_v50, %v11543_v57 }
 0x2e0   : > { %v6666_v32 = vsel %vm6538_vm10, %v6474_v42, %v6602_v16  ;;  %v6476_v2 = vadd.f32 %v9309_v11, %v11558_v49 }
 0x2e1   : > { %6730 = vst [vmem:[%s11565_s19 + $0xc8] sm:$0xff] %v6666_v32  ;;  %v6665_v46 = vsel %vm6537_vm11, %v6473_v51, %v6601_v62  ;;  %v6475_v39 = vadd.f32 %v9310_v53, %v11558_v49  ;;  %v9229_v10 = vpop.f32.mrb[28].mxu0 }
 0x2e2   : > { %6729 = vst [vmem:[%s11565_s19 + $0xc0] sm:$0xff] %v6665_v46  ;;  %vm6540_vm12 = vcmp.gt.f32.partialorder %v6476_v2, 0.0  ;;  %v6604_v8 = vmul.f32 0.2, %v6476_v2  ;;  %v9311_v55 = vadd.f32 %v9229_v10, %v11547_v1  ;;  %v6199_v47 = vpop.f32.mrb[29].mxu0 }
 0x2e3   : > { %vm6539_vm13 = vcmp.gt.f32.partialorder %v6475_v39, 0.0  ;;  %v6603_v13 = vmul.f32 0.2, %v6475_v39  ;;  %v9312_v57 = vadd.f32 %v6199_v47, %v11549_v43 }
 0x2e4   : > { %v6668_v17 = vsel %vm6540_vm12, %v6476_v2, %v6604_v8  ;;  %v6478_v24 = vadd.f32 %v9311_v55, %v11558_v49 }
 0x2e5   : > { %6732 = vst [vmem:[%s11565_s19 + $0xd8] sm:$0xff] %v6668_v17  ;;  %v6667_v21 = vsel %vm6539_vm13, %v6475_v39, %v6603_v13  ;;  %v6477_v48 = vadd.f32 %v9312_v57, %v11558_v49  ;;  %v9232_v54 = vpop.f32.mrb[30].mxu0 }
 0x2e6   : > { %6731 = vst [vmem:[%s11565_s19 + $0xd0] sm:$0xff] %v6667_v21  ;;  %vm6542_vm14 = vcmp.gt.f32.partialorder %v6478_v24, 0.0  ;;  %v6606_v31 = vmul.f32 0.2, %v6478_v24  ;;  %v9313_v1 = vadd.f32 %v9232_v54, %v11551_v41  ;;  %v6209_v25 = vpop.f32.mrb[31].mxu0 }
 0x2e7   : > { %vm6541_vm15 = vcmp.gt.f32.partialorder %v6477_v48, 0.0  ;;  %v6605_v58 = vmul.f32 0.2, %v6477_v48  ;;  %v9314_v43 = vadd.f32 %v6209_v25, %v11553_v7 }
 0x2e8   : > { %v6670_v35 = vsel %vm6542_vm14, %v6478_v24, %v6606_v31  ;;  %v6480_v0 = vadd.f32 %v9313_v1, %v11558_v49 }
 0x2e9   : > { %6734 = vst [vmem:[%s11565_s19 + $0xe8] sm:$0xff] %v6670_v35  ;;  %v6669_v5 = vsel %vm6541_vm15, %v6477_v48, %v6605_v58  ;;  %v6479_v9 = vadd.f32 %v9314_v43, %v11558_v49  ;;  %v8843_v14 = vpop.f32.mrb[32].mxu1  ;;  %v9235_v18 = vpop.f32.mrb[32].mxu0 }
 0x2ea   : > { %6733 = vst [vmem:[%s11565_s19 + $0xe0] sm:$0xff] %v6669_v5  ;;  %vm6544_vm0 = vcmp.gt.f32.partialorder %v6480_v0, 0.0  ;;  %v6608_v29 = vmul.f32 0.2, %v6480_v0  ;;  %v9315_v41 = vadd.f32 %v9235_v18, %v8843_v14  ;;  %v3378_v23 = vpop.f32.mrb[33].mxu1  ;;  %v6219_v22 = vpop.f32.mrb[33].mxu0 }
 0x2eb   : > { %vm6543_vm1 = vcmp.gt.f32.partialorder %v6479_v9, 0.0  ;;  %v6607_v26 = vmul.f32 0.2, %v6479_v9  ;;  %v9316_v7 = vadd.f32 %v6219_v22, %v3378_v23 }
 0x2ec   : > { %v6672_v15 = vsel %vm6544_vm0, %v6480_v0, %v6608_v29  ;;  %v6482_v33 = vadd.f32 %v9315_v41, %v11558_v49 }
 0x2ed   : > { %6736 = vst [vmem:[%s11565_s19 + $0xf8] sm:$0xff] %v6672_v15  ;;  %v6671_v30 = vsel %vm6543_vm1, %v6479_v9, %v6607_v26  ;;  %v6481_v34 = vadd.f32 %v9316_v7, %v11558_v49  ;;  %v8846_v59 = vpop.f32.mrb[34].mxu1  ;;  %v9238_v38 = vpop.f32.mrb[34].mxu0 }
 0x2ee   : > { %6735 = vst [vmem:[%s11565_s19 + $0xf0] sm:$0xff] %v6671_v30  ;;  %vm6546_vm2 = vcmp.gt.f32.partialorder %v6482_v33, 0.0  ;;  %v6610_v61 = vmul.f32 0.2, %v6482_v33  ;;  %v9317_v27 = vadd.f32 %v9238_v38, %v8846_v59  ;;  %v3388_v45 = vpop.f32.mrb[35].mxu1  ;;  %v6229_v37 = vpop.f32.mrb[35].mxu0 }
 0x2ef   : > { %vm6545_vm3 = vcmp.gt.f32.partialorder %v6481_v34, 0.0  ;;  %v6609_v6 = vmul.f32 0.2, %v6481_v34  ;;  %v9318_v52 = vadd.f32 %v6229_v37, %v3388_v45 }
 0x2f0   : > { %v6674_v60 = vsel %vm6546_vm2, %v6482_v33, %v6610_v61  ;;  %v6484_v40 = vadd.f32 %v9317_v27, %v11558_v49 }
 0x2f1   : > { %6738 = vst [vmem:[%s11565_s19 + $0x108] sm:$0xff] %v6674_v60  ;;  %v6673_v3 = vsel %vm6545_vm3, %v6481_v34, %v6609_v6  ;;  %v6483_v12 = vadd.f32 %v9318_v52, %v11558_v49  ;;  %v8849_v20 = vpop.f32.mrb[36].mxu1  ;;  %v9241_v19 = vpop.f32.mrb[36].mxu0 }
 0x2f2   : > { %6737 = vst [vmem:[%s11565_s19 + $0x100] sm:$0xff] %v6673_v3  ;;  %vm6548_vm4 = vcmp.gt.f32.partialorder %v6484_v40, 0.0  ;;  %v6612_v28 = vmul.f32 0.2, %v6484_v40  ;;  %v9319_v56 = vadd.f32 %v9241_v19, %v8849_v20  ;;  %v3398_v63 = vpop.f32.mrb[37].mxu1  ;;  %v6239_v36 = vpop.f32.mrb[37].mxu0 }
 0x2f3   : > { %vm6547_vm5 = vcmp.gt.f32.partialorder %v6483_v12, 0.0  ;;  %v6611_v42 = vmul.f32 0.2, %v6483_v12  ;;  %v9320_v4 = vadd.f32 %v6239_v36, %v3398_v63 }
 0x2f4   : > { %v6676_v51 = vsel %vm6548_vm4, %v6484_v40, %v6612_v28  ;;  %v6486_v44 = vadd.f32 %v9319_v56, %v11558_v49 }
 0x2f5   : > { %6740 = vst [vmem:[%s11565_s19 + $0x118] sm:$0xff] %v6676_v51  ;;  %v6675_v16 = vsel %vm6547_vm5, %v6483_v12, %v6611_v42  ;;  %v6485_v11 = vadd.f32 %v9320_v4, %v11558_v49  ;;  %v8852_v50 = vpop.f32.mrb[38].mxu1  ;;  %v9244_v62 = vpop.f32.mrb[38].mxu0 }
 0x2f6   : > { %6739 = vst [vmem:[%s11565_s19 + $0x110] sm:$0xff] %v6675_v16  ;;  %vm6550_vm6 = vcmp.gt.f32.partialorder %v6486_v44, 0.0  ;;  %v6614_v53 = vmul.f32 0.2, %v6486_v44  ;;  %v9321_v32 = vadd.f32 %v9244_v62, %v8852_v50  ;;  %v3408_v2 = vpop.f32.mrb[39].mxu1  ;;  %v6249_v46 = vpop.f32.mrb[39].mxu0 }
 0x2f7   : > { %vm6549_vm7 = vcmp.gt.f32.partialorder %v6485_v11, 0.0  ;;  %v6613_v39 = vmul.f32 0.2, %v6485_v11  ;;  %v9322_v10 = vadd.f32 %v6249_v46, %v3408_v2 }
 0x2f8   : > { %v6678_v8 = vsel %vm6550_vm6, %v6486_v44, %v6614_v53  ;;  %v6488_v55 = vadd.f32 %v9321_v32, %v11558_v49 }
 0x2f9   : > { %6742 = vst [vmem:[%s11565_s19 + $0x128] sm:$0xff] %v6678_v8  ;;  %v6677_v47 = vsel %vm6549_vm7, %v6485_v11, %v6613_v39  ;;  %v6487_v13 = vadd.f32 %v9322_v10, %v11558_v49  ;;  %v8855_v57 = vpop.f32.mrb[40].mxu1  ;;  %v9247_v17 = vpop.f32.mrb[40].mxu0 }
 0x2fa   : > { %6741 = vst [vmem:[%s11565_s19 + $0x120] sm:$0xff] %v6677_v47  ;;  %vm6552_vm8 = vcmp.gt.f32.partialorder %v6488_v55, 0.0  ;;  %v6616_v24 = vmul.f32 0.2, %v6488_v55  ;;  %v9323_v21 = vadd.f32 %v9247_v17, %v8855_v57  ;;  %v3418_v48 = vpop.f32.mrb[41].mxu1  ;;  %v6259_v54 = vpop.f32.mrb[41].mxu0 }
 0x2fb   : > { %vm6551_vm9 = vcmp.gt.f32.partialorder %v6487_v13, 0.0  ;;  %v6615_v31 = vmul.f32 0.2, %v6487_v13  ;;  %v9324_v1 = vadd.f32 %v6259_v54, %v3418_v48 }
 0x2fc   : > { %v6680_v25 = vsel %vm6552_vm8, %v6488_v55, %v6616_v24  ;;  %v6490_v58 = vadd.f32 %v9323_v21, %v11558_v49 }
 0x2fd   : > { %6744 = vst [vmem:[%s11565_s19 + $0x138] sm:$0xff] %v6680_v25  ;;  %v6679_v43 = vsel %vm6551_vm9, %v6487_v13, %v6615_v31  ;;  %v6489_v35 = vadd.f32 %v9324_v1, %v11558_v49  ;;  %v8858_v0 = vpop.f32.mrb[42].mxu1  ;;  %v9250_v5 = vpop.f32.mrb[42].mxu0 }
 0x2fe   : > { %6743 = vst [vmem:[%s11565_s19 + $0x130] sm:$0xff] %v6679_v43  ;;  %vm6554_vm10 = vcmp.gt.f32.partialorder %v6490_v58, 0.0  ;;  %v6618_v9 = vmul.f32 0.2, %v6490_v58  ;;  %v9325_v14 = vadd.f32 %v9250_v5, %v8858_v0  ;;  %v3428_v18 = vpop.f32.mrb[43].mxu1  ;;  %v6269_v29 = vpop.f32.mrb[43].mxu0 }
 0x2ff   : > { %vm6553_vm11 = vcmp.gt.f32.partialorder %v6489_v35, 0.0  ;;  %v6617_v41 = vmul.f32 0.2, %v6489_v35  ;;  %v9326_v23 = vadd.f32 %v6269_v29, %v3428_v18 }
 0x300   : > { %v6682_v22 = vsel %vm6554_vm10, %v6490_v58, %v6618_v9  ;;  %v6492_v26 = vadd.f32 %v9325_v14, %v11558_v49 }
 0x301   : > { %6746 = vst [vmem:[%s11565_s19 + $0x148] sm:$0xff] %v6682_v22  ;;  %v6681_v7 = vsel %vm6553_vm11, %v6489_v35, %v6617_v41  ;;  %v6491_v15 = vadd.f32 %v9326_v23, %v11558_v49  ;;  %v8861_v33 = vpop.f32.mrb[44].mxu1  ;;  %v9253_v30 = vpop.f32.mrb[44].mxu0 }
 0x302   : > { %6745 = vst [vmem:[%s11565_s19 + $0x140] sm:$0xff] %v6681_v7  ;;  %vm6556_vm12 = vcmp.gt.f32.partialorder %v6492_v26, 0.0  ;;  %v6620_v34 = vmul.f32 0.2, %v6492_v26  ;;  %v9327_v59 = vadd.f32 %v9253_v30, %v8861_v33  ;;  %v3438_v38 = vpop.f32.mrb[45].mxu1  ;;  %v6279_v61 = vpop.f32.mrb[45].mxu0 }
 0x303   : > { %vm6555_vm13 = vcmp.gt.f32.partialorder %v6491_v15, 0.0  ;;  %v6619_v27 = vmul.f32 0.2, %v6491_v15  ;;  %v9328_v45 = vadd.f32 %v6279_v61, %v3438_v38 }
 0x304   : > { %v6684_v37 = vsel %vm6556_vm12, %v6492_v26, %v6620_v34  ;;  %v6494_v6 = vadd.f32 %v9327_v59, %v11558_v49 }
 0x305   : > { %6748 = vst [vmem:[%s11565_s19 + $0x158] sm:$0xff] %v6684_v37  ;;  %v6683_v52 = vsel %vm6555_vm13, %v6491_v15, %v6619_v27  ;;  %v6493_v60 = vadd.f32 %v9328_v45, %v11558_v49  ;;  %v8864_v40 = vpop.f32.mrb[46].mxu1  ;;  %v9256_v3 = vpop.f32.mrb[46].mxu0 }
 0x306   : > { %6747 = vst [vmem:[%s11565_s19 + $0x150] sm:$0xff] %v6683_v52  ;;  %vm6558_vm14 = vcmp.gt.f32.partialorder %v6494_v6, 0.0  ;;  %v6622_v12 = vmul.f32 0.2, %v6494_v6  ;;  %v9329_v20 = vadd.f32 %v9256_v3, %v8864_v40  ;;  %v3448_v19 = vpop.f32.mrb[47].mxu1  ;;  %v6289_v28 = vpop.f32.mrb[47].mxu0 }
 0x307   : > { %vm6557_vm15 = vcmp.gt.f32.partialorder %v6493_v60, 0.0  ;;  %v6621_v56 = vmul.f32 0.2, %v6493_v60  ;;  %v9330_v63 = vadd.f32 %v6289_v28, %v3448_v19 }
 0x308   : > { %v6686_v36 = vsel %vm6558_vm14, %v6494_v6, %v6622_v12  ;;  %v6496_v42 = vadd.f32 %v9329_v20, %v11558_v49 }
 0x309   : > { %6750 = vst [vmem:[%s11565_s19 + $0x168] sm:$0xff] %v6686_v36  ;;  %v6685_v4 = vsel %vm6557_vm15, %v6493_v60, %v6621_v56  ;;  %v6495_v51 = vadd.f32 %v9330_v63, %v11558_v49  ;;  %v8867_v44 = vpop.f32.mrb[48].mxu1  ;;  %v9259_v16 = vpop.f32.mrb[48].mxu0 }
 0x30a   : > { %6749 = vst [vmem:[%s11565_s19 + $0x160] sm:$0xff] %v6685_v4  ;;  %vm6560_vm0 = vcmp.gt.f32.partialorder %v6496_v42, 0.0  ;;  %v6624_v11 = vmul.f32 0.2, %v6496_v42  ;;  %v9331_v50 = vadd.f32 %v9259_v16, %v8867_v44  ;;  %v3458_v62 = vpop.f32.mrb[49].mxu1  ;;  %v6299_v53 = vpop.f32.mrb[49].mxu0 }
 0x30b   : > { %vm6559_vm1 = vcmp.gt.f32.partialorder %v6495_v51, 0.0  ;;  %v6623_v32 = vmul.f32 0.2, %v6495_v51  ;;  %v9332_v2 = vadd.f32 %v6299_v53, %v3458_v62 }
 0x30c   : > { %v6688_v46 = vsel %vm6560_vm0, %v6496_v42, %v6624_v11  ;;  %v6498_v39 = vadd.f32 %v9331_v50, %v11558_v49 }
 0x30d   : > { %6752 = vst [vmem:[%s11565_s19 + $0x178] sm:$0xff] %v6688_v46  ;;  %v6687_v10 = vsel %vm6559_vm1, %v6495_v51, %v6623_v32  ;;  %v6497_v8 = vadd.f32 %v9332_v2, %v11558_v49  ;;  %v8870_v55 = vpop.f32.mrb[50].mxu1  ;;  %v9262_v47 = vpop.f32.mrb[50].mxu0 }
 0x30e   : > { %6751 = vst [vmem:[%s11565_s19 + $0x170] sm:$0xff] %v6687_v10  ;;  %vm6562_vm2 = vcmp.gt.f32.partialorder %v6498_v39, 0.0  ;;  %v6626_v13 = vmul.f32 0.2, %v6498_v39  ;;  %v9333_v57 = vadd.f32 %v9262_v47, %v8870_v55  ;;  %v3468_v17 = vpop.f32.mrb[51].mxu1  ;;  %v6309_v24 = vpop.f32.mrb[51].mxu0 }
 0x30f   : > { %vm6561_vm3 = vcmp.gt.f32.partialorder %v6497_v8, 0.0  ;;  %v6625_v21 = vmul.f32 0.2, %v6497_v8  ;;  %v9334_v48 = vadd.f32 %v6309_v24, %v3468_v17 }
 0x310   : > { %v6690_v54 = vsel %vm6562_vm2, %v6498_v39, %v6626_v13  ;;  %v6500_v31 = vadd.f32 %v9333_v57, %v11558_v49 }
 0x311   : > { %6754 = vst [vmem:[%s11565_s19 + $0x188] sm:$0xff] %v6690_v54  ;;  %v6689_v1 = vsel %vm6561_vm3, %v6497_v8, %v6625_v21  ;;  %v6499_v25 = vadd.f32 %v9334_v48, %v11558_v49  ;;  %v8873_v58 = vpop.f32.mrb[52].mxu1  ;;  %v9265_v43 = vpop.f32.mrb[52].mxu0 }
 0x312   : > { %6753 = vst [vmem:[%s11565_s19 + $0x180] sm:$0xff] %v6689_v1  ;;  %vm6564_vm4 = vcmp.gt.f32.partialorder %v6500_v31, 0.0  ;;  %v6628_v35 = vmul.f32 0.2, %v6500_v31  ;;  %v9335_v0 = vadd.f32 %v9265_v43, %v8873_v58  ;;  %v3478_v5 = vpop.f32.mrb[53].mxu1  ;;  %v6319_v9 = vpop.f32.mrb[53].mxu0 }
 0x313   : > { %vm6563_vm5 = vcmp.gt.f32.partialorder %v6499_v25, 0.0  ;;  %v6627_v14 = vmul.f32 0.2, %v6499_v25  ;;  %v9336_v18 = vadd.f32 %v6319_v9, %v3478_v5 }
 0x314   : > { %v6692_v29 = vsel %vm6564_vm4, %v6500_v31, %v6628_v35  ;;  %v6502_v41 = vadd.f32 %v9335_v0, %v11558_v49 }
 0x315   : > { %6756 = vst [vmem:[%s11565_s19 + $0x198] sm:$0xff] %v6692_v29  ;;  %v6691_v23 = vsel %vm6563_vm5, %v6499_v25, %v6627_v14  ;;  %v6501_v22 = vadd.f32 %v9336_v18, %v11558_v49  ;;  %v8876_v26 = vpop.f32.mrb[54].mxu1  ;;  %v9268_v7 = vpop.f32.mrb[54].mxu0 }
 0x316   : > { %6755 = vst [vmem:[%s11565_s19 + $0x190] sm:$0xff] %v6691_v23  ;;  %vm6566_vm6 = vcmp.gt.f32.partialorder %v6502_v41, 0.0  ;;  %v6630_v15 = vmul.f32 0.2, %v6502_v41  ;;  %v9337_v33 = vadd.f32 %v9268_v7, %v8876_v26  ;;  %v3488_v30 = vpop.f32.mrb[55].mxu1  ;;  %v6329_v34 = vpop.f32.mrb[55].mxu0 }
 0x317   : > { %vm6565_vm7 = vcmp.gt.f32.partialorder %v6501_v22, 0.0  ;;  %v6629_v59 = vmul.f32 0.2, %v6501_v22  ;;  %v9338_v38 = vadd.f32 %v6329_v34, %v3488_v30 }
 0x318   : > { %v6694_v61 = vsel %vm6566_vm6, %v6502_v41, %v6630_v15  ;;  %v6504_v27 = vadd.f32 %v9337_v33, %v11558_v49 }
 0x319   : > { %6758 = vst [vmem:[%s11565_s19 + $0x1a8] sm:$0xff] %v6694_v61  ;;  %v6693_v45 = vsel %vm6565_vm7, %v6501_v22, %v6629_v59  ;;  %v6503_v37 = vadd.f32 %v9338_v38, %v11558_v49  ;;  %v8879_v6 = vpop.f32.mrb[56].mxu1  ;;  %v9271_v52 = vpop.f32.mrb[56].mxu0 }
 0x31a   : > { %6757 = vst [vmem:[%s11565_s19 + $0x1a0] sm:$0xff] %v6693_v45  ;;  %vm6568_vm8 = vcmp.gt.f32.partialorder %v6504_v27, 0.0  ;;  %v6632_v60 = vmul.f32 0.2, %v6504_v27  ;;  %v9339_v40 = vadd.f32 %v9271_v52, %v8879_v6  ;;  %v3498_v3 = vpop.f32.mrb[57].mxu1  ;;  %v6339_v12 = vpop.f32.mrb[57].mxu0 }
 0x31b   : > { %vm6567_vm9 = vcmp.gt.f32.partialorder %v6503_v37, 0.0  ;;  %v6631_v20 = vmul.f32 0.2, %v6503_v37  ;;  %v9340_v19 = vadd.f32 %v6339_v12, %v3498_v3 }
 0x31c   : > { %v6696_v28 = vsel %vm6568_vm8, %v6504_v27, %v6632_v60  ;;  %v6506_v56 = vadd.f32 %v9339_v40, %v11558_v49 }
 0x31d   : > { %6760 = vst [vmem:[%s11565_s19 + $0x1b8] sm:$0xff] %v6696_v28  ;;  %v6695_v63 = vsel %vm6567_vm9, %v6503_v37, %v6631_v20  ;;  %v6505_v36 = vadd.f32 %v9340_v19, %v11558_v49  ;;  %v8882_v42 = vpop.f32.mrb[58].mxu1  ;;  %v9274_v4 = vpop.f32.mrb[58].mxu0 }
 0x31e   : > { %6759 = vst [vmem:[%s11565_s19 + $0x1b0] sm:$0xff] %v6695_v63  ;;  %vm6570_vm10 = vcmp.gt.f32.partialorder %v6506_v56, 0.0  ;;  %v6634_v51 = vmul.f32 0.2, %v6506_v56  ;;  %v9341_v44 = vadd.f32 %v9274_v4, %v8882_v42  ;;  %v3508_v16 = vpop.f32.mrb[59].mxu1  ;;  %v6349_v11 = vpop.f32.mrb[59].mxu0 }
 0x31f   : > { %vm6569_vm11 = vcmp.gt.f32.partialorder %v6505_v36, 0.0  ;;  %v6633_v50 = vmul.f32 0.2, %v6505_v36  ;;  %v9342_v62 = vadd.f32 %v6349_v11, %v3508_v16 }
 0x320   : > { %v6698_v53 = vsel %vm6570_vm10, %v6506_v56, %v6634_v51  ;;  %v6508_v32 = vadd.f32 %v9341_v44, %v11558_v49 }
 0x321   : > { %6762 = vst [vmem:[%s11565_s19 + $0x1c8] sm:$0xff] %v6698_v53  ;;  %v6697_v2 = vsel %vm6569_vm11, %v6505_v36, %v6633_v50  ;;  %v6507_v46 = vadd.f32 %v9342_v62, %v11558_v49  ;;  %v8885_v39 = vpop.f32.mrb[60].mxu1  ;;  %v9277_v10 = vpop.f32.mrb[60].mxu0 }
 0x322   : > { %6761 = vst [vmem:[%s11565_s19 + $0x1c0] sm:$0xff] %v6697_v2  ;;  %vm6572_vm12 = vcmp.gt.f32.partialorder %v6508_v32, 0.0  ;;  %v6636_v8 = vmul.f32 0.2, %v6508_v32  ;;  %v9343_v55 = vadd.f32 %v9277_v10, %v8885_v39  ;;  %v3518_v47 = vpop.f32.mrb[61].mxu1  ;;  %v6359_v13 = vpop.f32.mrb[61].mxu0 }
 0x323   : > { %vm6571_vm13 = vcmp.gt.f32.partialorder %v6507_v46, 0.0  ;;  %v6635_v57 = vmul.f32 0.2, %v6507_v46  ;;  %v9344_v17 = vadd.f32 %v6359_v13, %v3518_v47 }
 0x324   : > { %v6700_v24 = vsel %vm6572_vm12, %v6508_v32, %v6636_v8  ;;  %v6510_v21 = vadd.f32 %v9343_v55, %v11558_v49 }
 0x325   : > { %6764 = vst [vmem:[%s11565_s19 + $0x1d8] sm:$0xff] %v6700_v24  ;;  %v6699_v48 = vsel %vm6571_vm13, %v6507_v46, %v6635_v57  ;;  %v6509_v54 = vadd.f32 %v9344_v17, %v11558_v49  ;;  %v8888_v31 = vpop.f32.mrb[62].mxu1  ;;  %v9280_v1 = vpop.f32.mrb[62].mxu0 }
 0x326   : > { %6763 = vst [vmem:[%s11565_s19 + $0x1d0] sm:$0xff] %v6699_v48  ;;  %vm6574_vm14 = vcmp.gt.f32.partialorder %v6510_v21, 0.0  ;;  %v6638_v25 = vmul.f32 0.2, %v6510_v21  ;;  %v9345_v58 = vadd.f32 %v9280_v1, %v8888_v31  ;;  %v3528_v43 = vpop.f32.mrb[63].mxu1  ;;  %v6369_v35 = vpop.f32.mrb[63].mxu0 }
 0x327   : > { %vm6573_vm15 = vcmp.gt.f32.partialorder %v6509_v54, 0.0  ;;  %v6637_v0 = vmul.f32 0.2, %v6509_v54  ;;  %v9346_v5 = vadd.f32 %v6369_v35, %v3528_v43 }
 0x328   : > { %v6702_v9 = vsel %vm6574_vm14, %v6510_v21, %v6638_v25  ;;  %v6512_v14 = vadd.f32 %v9345_v58, %v11558_v49 }
 0x329   : > { %6766 = vst [vmem:[%s11565_s19 + $0x1e8] sm:$0xff] %v6702_v9  ;;  %v6701_v18 = vsel %vm6573_vm15, %v6509_v54, %v6637_v0  ;;  %v6511_v29 = vadd.f32 %v9346_v5, %v11558_v49 }
 0x32a   : > { %6765 = vst [vmem:[%s11565_s19 + $0x1e0] sm:$0xff] %v6701_v18  ;;  %vm6576_vm0 = vcmp.gt.f32.partialorder %v6512_v14, 0.0  ;;  %v6640_v41 = vmul.f32 0.2, %v6512_v14 }
 0x32b   : > { %vm6575_vm1 = vcmp.gt.f32.partialorder %v6511_v29, 0.0  ;;  %v6639_v23 = vmul.f32 0.2, %v6511_v29 }
 0x32c   : > { %v6704_v22 = vsel %vm6576_vm0, %v6512_v14, %v6640_v41 }
 0x32d   : > { %6768 = vst [vmem:[%s11565_s19 + $0x1f8] sm:$0xff] %v6704_v22  ;;  %v6703_v26 = vsel %vm6575_vm1, %v6511_v29, %v6639_v23 }
 0x32e   : > { %6767 = vst [vmem:[%s11565_s19 + $0x1f0] sm:$0xff] %v6703_v26 }
 0x32f PF: > { %s13_s12 = sadd.s32 1, %s9811_s12  }
 0x330   : > { %p10_p5 = scmp.ge.s32.totalorder %s13_s12, 4  }
 0x332   :  { %12 = sbr.rel (!%p10_p5) target bundleno = 1 (0x1), region = 72 }

</bundles_post_ra>
